<compile_context>
chip_gen: v5e
topology: v5e:2x2
jax: 0.10.0
libtpu: 0.0.40
codegen_flags: <defaults>
</compile_context>

<pallas_src>
import functools

import jax
import jax.numpy as jnp
import numpy as np
from jax.experimental import pallas as pl
from jax.experimental.pallas import tpu as pltpu

# ---------------------------------------------------------------------------
# Model hyper-parameters (small but consistent with the module: the forward
# hard-codes x.view(-1, 28*28), so input_size must be 784).
# ---------------------------------------------------------------------------
INPUT_SIZE = 28 * 28                              # 784
OUTPUT_SIZE = 10
HIDDEN_SIZES = [128, 64, 128]                     # stand-in for [2400, 1200, 2400]
NUM_WEIGHTS = INPUT_SIZE * OUTPUT_SIZE            # 7840
NW_PAD = 8192                                     # 64 * 128: lane aligned & tileable
TILE_K = 2048                                     # NW streaming tile (bf16 w0/w3 tile = 512 KB)
ENSEMBLE_NUM = 3
E_PAD = 8                                         # sublane tile
BATCH = 2

# Module-level constants (built once, become jit constants — no per-call prep).
_k_idx = np.arange(NW_PAD)
_ONEHOT_NP = ((_k_idx[:, None] % OUTPUT_SIZE) == np.arange(OUTPUT_SIZE)[None, :]
              ).astype(np.float32)
_ONEHOT_NP *= (_k_idx[:, None] < NUM_WEIGHTS).astype(np.float32)  # zero NW padding


def _ensemble_weights(num_ens):
    ew = np.zeros((E_PAD, 1), np.float32)
    ew[:num_ens, 0] = 1.0 / num_ens
    return ew


# ---------------------------------------------------------------------------
# Fused kernel: two-phase pipeline over NW tiles.
#   phase 0:  acc_h0 += hin_tile @ w0_tile            (w0 streams)
#             ... last tile: tiny mid-MLP -> h2
#   phase 1:  hout_tile = h2 @ w3_tile                (w3 streams)
#             w_flat    = where(mask, hin, hout)
#             logits   += w_flat(bf16) @ xsel_tile(bf16)
#             ... last tile: softmax (eval) + ensemble mean -> out
# ---------------------------------------------------------------------------
def fused_kernel(hin_ref, mask_ref, w0_ref, w1_ref, b1_ref, w2_ref, b2_ref,
                 w3_ref, xsel_ref, ew_ref, out_ref,
                 acc_h0, h2_scr, logits_acc, *, batch, apply_softmax):
    phase = pl.program_id(0)
    k = pl.program_id(1)
    nk = pl.num_programs(1)
    k_off = pl.multiple_of(k * TILE_K, TILE_K)

    # ---------------- phase 0: hin @ w0 reduction over NW tiles -------------
    @pl.when(jnp.logical_and(phase == 0, k == 0))
    def _():
        acc_h0[...] = jnp.zeros_like(acc_h0)

    @pl.when(phase == 0)
    def _():
        hin_t = hin_ref[:, pl.ds(k_off, TILE_K)]                 # (E_PAD, TK) bf16
        acc_h0[...] += jnp.dot(hin_t, w0_ref[...],
                               preferred_element_type=jnp.float32)

    # Tiny mid-MLP once, at the end of phase 0.
    @pl.when(jnp.logical_and(phase == 0, k == nk - 1))
    def _():
        h0 = jnp.maximum(acc_h0[...], 0.0)
        h1 = jnp.maximum(jnp.dot(h0, w1_ref[...],
                                 preferred_element_type=jnp.float32)
                         + b1_ref[...], 0.0)
        h2 = jnp.maximum(jnp.dot(h1, w2_ref[...],
                                 preferred_element_type=jnp.float32)
                         + b2_ref[...], 0.0)
        h2_scr[...] = h2.astype(jnp.bfloat16)
        logits_acc[...] = jnp.zeros_like(logits_acc)

    # ---------------- phase 1: w3 tile + mask merge + classifier ------------
    @pl.when(phase == 1)
    def _():
        hout = jnp.dot(h2_scr[...], w3_ref[...],
                       preferred_element_type=jnp.float32)        # (E_PAD, TK) f32
        hin_t = hin_ref[:, pl.ds(k_off, TILE_K)]                  # bf16
        mask_t = mask_ref[:, pl.ds(k_off, TILE_K)]                # bf16 {0,1}
        # hypernet_output[mask] = hypernet_input[mask]; bf16 for the MXU.
        w_flat = jnp.where(mask_t > 0.5, hin_t, hout.astype(jnp.bfloat16))
        xsel_t = xsel_ref[pl.ds(k_off, TILE_K), :]                # (TK, B*O) bf16
        logits_acc[...] += jnp.dot(w_flat, xsel_t,
                                   preferred_element_type=jnp.float32)

    # ---------------- finalize: softmax (eval) + ensemble mean --------------
    @pl.when(jnp.logical_and(phase == 1, k == nk - 1))
    def _():
        logits = logits_acc[...]                                  # (E_PAD, B*O)
        ew = ew_ref[...]                                          # (E_PAD, 1)
        for b in range(batch):                                    # tiny static unroll
            lb = logits[:, b * OUTPUT_SIZE:(b + 1) * OUTPUT_SIZE]  # (E_PAD, O)
            if apply_softmax:
                m = jnp.max(lb, axis=-1, keepdims=True)
                e = jnp.exp(lb - m)
                denom = jnp.sum(e, axis=-1, keepdims=True)
                # NOTE: approx reciprocal -> probs may not sum to exactly 1.
                pb = e * pl.reciprocal(denom, approx=True)
            else:
                pb = lb
            # Padded ensemble rows carry zero weight in ew -> no contribution.
            out_ref[pl.ds(b, 1), :] = jnp.sum(pb * ew, axis=0, keepdims=True)


def fused_forward_pallas(hin_p, mask_p, xsel, ew, params, *, batch, apply_softmax):
    h0, h1, h2 = HIDDEN_SIZES
    nk = NW_PAD // TILE_K
    bo = batch * OUTPUT_SIZE
    kernel = functools.partial(fused_kernel, batch=batch,
                               apply_softmax=apply_softmax)
    return pl.pallas_call(
        kernel,
        out_shape=jax.ShapeDtypeStruct((batch, OUTPUT_SIZE), jnp.float32),
        grid_spec=pltpu.PrefetchScalarGridSpec(
            num_scalar_prefetch=0,
            grid=(2, nk),
            in_specs=[
                # Small/cheap arrays stay resident (constant block index =>
                # single DMA); the two big weight matrices stream per tile.
                pl.BlockSpec((E_PAD, NW_PAD), lambda p, k: (0, 0)),   # hin  (128 KB)
                pl.BlockSpec((E_PAD, NW_PAD), lambda p, k: (0, 0)),   # mask (128 KB)
                # w0: phase 0 -> tile k; phase 1 -> keep last tile (no re-DMA).
                pl.BlockSpec((TILE_K, h0),
                             lambda p, k: (k * (1 - p) + (nk - 1) * p, 0)),
                pl.BlockSpec((h0, h1), lambda p, k: (0, 0)),          # w1
                pl.BlockSpec((1, h1), lambda p, k: (0, 0)),           # b1
                pl.BlockSpec((h1, h2), lambda p, k: (0, 0)),          # w2
                pl.BlockSpec((1, h2), lambda p, k: (0, 0)),           # b2
                # w3: phase 0 -> tile 0 (acts as prefetch); phase 1 -> tile k.
                pl.BlockSpec((h2, TILE_K), lambda p, k: (0, k * p)),
                pl.BlockSpec((NW_PAD, bo), lambda p, k: (0, 0)),      # xsel (320 KB)
                pl.BlockSpec((E_PAD, 1), lambda p, k: (0, 0)),        # ew
            ],
            out_specs=pl.BlockSpec((batch, OUTPUT_SIZE), lambda p, k: (0, 0)),
            scratch_shapes=[
                pltpu.VMEM((E_PAD, h0), jnp.float32),      # acc_h0
                pltpu.VMEM((E_PAD, h2), jnp.bfloat16),     # h2
                pltpu.VMEM((E_PAD, bo), jnp.float32),      # logits accumulator
            ]),
        compiler_params=pltpu.CompilerParams(
            dimension_semantics=("arbitrary", "arbitrary")),
    )(hin_p, mask_p, params["w0"], params["w1"], params["b1"],
      params["w2"], params["b2"], params["w3"], xsel, ew)


# ---------------------------------------------------------------------------
# Parameter init (deterministic, synthetic; weights stored transposed (in,out)
# relative to nn.Linear; w0/w3 zero-padded along NW and cast to bf16).
# ---------------------------------------------------------------------------
def init_params(key):
    h0, h1, h2 = HIDDEN_SIZES
    k = jax.random.split(key, 6)

    def lin(kk, fan_in, fan_out):
        return (jax.random.normal(kk, (fan_in, fan_out), jnp.float32)
                / jnp.sqrt(jnp.float32(fan_in)))

    w0 = lin(k[0], NUM_WEIGHTS, h0)                    # input_layer (no bias)
    w3 = lin(k[5], h2, NUM_WEIGHTS)                    # output_layer (no bias)
    w0_p = jnp.zeros((NW_PAD, h0), jnp.float32).at[:NUM_WEIGHTS].set(w0)
    w3_p = jnp.zeros((h2, NW_PAD), jnp.float32).at[:, :NUM_WEIGHTS].set(w3)
    return {
        "w0": w0_p.astype(jnp.bfloat16),
        "w1": lin(k[1], h0, h1),                       # hidden_1
        "b1": 0.01 * jax.random.normal(k[2], (1, h1), jnp.float32),
        "w2": lin(k[3], h1, h2),                       # hidden_2
        "b2": 0.01 * jax.random.normal(k[4], (1, h2), jnp.float32),
        "w3": w3_p.astype(jnp.bfloat16),
    }


def _make_hyper_inputs(key, num_ens):
    """All ensemble members' mask and masked random hypernet input at once."""
    kmask, kin = jax.random.split(key)
    mask = (jax.random.uniform(kmask, (num_ens, NUM_WEIGHTS)) >= 0.5
            ).astype(jnp.float32)
    hin = jax.random.normal(kin, (num_ens, NUM_WEIGHTS), jnp.float32) * mask
    return mask, hin


# ---------------------------------------------------------------------------
# Forward pass (Pallas) and pure-JAX reference (same bf16 weight precision).
# ---------------------------------------------------------------------------
@functools.partial(jax.jit, static_argnames=("training",))
def forward_pallas(x, params, key, *, training):
    x2d = x.reshape(-1, INPUT_SIZE).astype(jnp.float32)
    batch = x2d.shape[0]
    num_ens = 1 if training else ENSEMBLE_NUM

    mask, hin = _make_hyper_inputs(key, num_ens)              # (E, NW) f32
    pad_e, pad_k = E_PAD - num_ens, NW_PAD - NUM_WEIGHTS
    mask_p = jnp.pad(mask, ((0, pad_e), (0, pad_k))).astype(jnp.bfloat16)
    hin_p = jnp.pad(hin, ((0, pad_e), (0, pad_k))).astype(jnp.bfloat16)

    # xsel[k, b*O + o] = x[b, k // O] * (k % O == o); zero on NW padding.
    x_rep = jnp.pad(jnp.repeat(x2d, OUTPUT_SIZE, axis=1), ((0, 0), (0, pad_k)))
    xsel = (x_rep.T[:, :, None] * _ONEHOT_NP[:, None, :]
            ).reshape(NW_PAD, batch * OUTPUT_SIZE).astype(jnp.bfloat16)

    ew = jnp.asarray(_ensemble_weights(num_ens))              # jit constant

    return fused_forward_pallas(hin_p, mask_p, xsel, ew, params,
                                batch=batch, apply_softmax=not training)


def forward_ref(x, params, key, *, training):
    """Pure-JAX reference mirroring the kernel's bf16 precision choices."""
    x2d = x.reshape(-1, INPUT_SIZE).astype(jnp.float32)
    num_ens = 1 if training else ENSEMBLE_NUM
    mask, hin = _make_hyper_inputs(key, num_ens)
    hin_b = hin.astype(jnp.bfloat16)
    w0 = params["w0"][:NUM_WEIGHTS, :]                        # (NW, H0) bf16
    w3 = params["w3"][:, :NUM_WEIGHTS]                        # (H2, NW) bf16

    h = jnp.maximum(jnp.dot(hin_b, w0, preferred_element_type=jnp.float32), 0.0)
    h = jnp.maximum(jnp.dot(h, params["w1"],
                            preferred_element_type=jnp.float32) + params["b1"], 0.0)
    h = jnp.maximum(jnp.dot(h, params["w2"],
                            preferred_element_type=jnp.float32) + params["b2"], 0.0)
    hout = jnp.dot(h.astype(jnp.bfloat16), w3,
                   preferred_element_type=jnp.float32)        # (E, NW)
    w_flat = jnp.where(mask > 0.5, hin_b.astype(jnp.float32), hout)
    weights = w_flat.reshape(num_ens, INPUT_SIZE, OUTPUT_SIZE).astype(jnp.bfloat16)
    logits = jnp.einsum("bi,eio->ebo", x2d.astype(jnp.bfloat16), weights,
                        preferred_element_type=jnp.float32)   # (E, B, O)
    if training:
        return logits[0]
    probs = jax.nn.softmax(logits, axis=-1)
    return jnp.mean(probs, axis=0)


# ---------------------------------------------------------------------------
if __name__ == "__main__":
    root = jax.random.PRNGKey(0)
    kparam, kdata, knoise = jax.random.split(root, 3)

    params = init_params(kparam)
    # Scaled input keeps softmax away from full saturation so bf16 rounding
    # differences between kernel and reference stay well inside tolerance.
    x = 0.1 * jax.random.normal(kdata, (BATCH, 1, 28, 28), jnp.float32)  # NCHW

    # Training path: single ensemble member, raw logits.
    train_out = jax.block_until_ready(forward_pallas(x, params, knoise, training=True))
    train_ref = forward_ref(x, params, knoise, training=True)

    # Eval path: ensemble of softmaxed outputs, averaged (all in one kernel).
    eval_out = jax.block_until_ready(forward_pallas(x, params, knoise, training=False))
    eval_ref = forward_ref(x, params, knoise, training=False)

    assert train_out.shape == (BATCH, OUTPUT_SIZE)
    assert eval_out.shape == (BATCH, OUTPUT_SIZE)
    # bf16 weights/activations + approx reciprocal in the fused softmax.
    np.testing.assert_allclose(np.asarray(train_out), np.asarray(train_ref),
                               rtol=2e-2, atol=2e-2)
    np.testing.assert_allclose(np.asarray(eval_out), np.asarray(eval_ref),
                               rtol=2e-2, atol=2e-2)

    print("KERNEL_OK")
</pallas_src>

<mosaic_0001>
module attributes {stable_mosaic.version = 11 : i64} {
  func.func @fused_kernel(%arg0: i32, %arg1: i32, %arg2: memref<8x8192xbf16, #tpu.memory_space<vmem>>, %arg3: memref<8x8192xbf16, #tpu.memory_space<vmem>>, %arg4: memref<2048x128xbf16, #tpu.memory_space<vmem>>, %arg5: memref<128x64xf32, #tpu.memory_space<vmem>>, %arg6: memref<1x64xf32, #tpu.memory_space<vmem>>, %arg7: memref<64x128xf32, #tpu.memory_space<vmem>>, %arg8: memref<1x128xf32, #tpu.memory_space<vmem>>, %arg9: memref<128x2048xbf16, #tpu.memory_space<vmem>>, %arg10: memref<8192x20xbf16, #tpu.memory_space<vmem>>, %arg11: memref<8x1xf32, #tpu.memory_space<vmem>>, %arg12: memref<2x10xf32, #tpu.memory_space<vmem>>, %arg13: memref<8x128xf32, #tpu.memory_space<vmem>>, %arg14: memref<8x128xbf16, #tpu.memory_space<vmem>>, %arg15: memref<8x20xf32, #tpu.memory_space<vmem>>) attributes {dimension_semantics = [#tpu.dimension_semantics<arbitrary>, #tpu.dimension_semantics<arbitrary>], iteration_bounds = array<i64: 2, 4>, scalar_prefetch = 0 : i64, scratch_operands = 3 : i64, tpu.core_type = #tpu.core_type<tc>, window_params = [{pipeline_mode = #tpu.pipeline_mode<synchronous>, transform_indices = @transform_0, window_bounds = array<i64: 8, 8192>}, {pipeline_mode = #tpu.pipeline_mode<synchronous>, transform_indices = @transform_1, window_bounds = array<i64: 8, 8192>}, {transform_indices = @transform_2, window_bounds = array<i64: 2048, 128>}, {pipeline_mode = #tpu.pipeline_mode<synchronous>, transform_indices = @transform_3, window_bounds = array<i64: 128, 64>}, {pipeline_mode = #tpu.pipeline_mode<synchronous>, transform_indices = @transform_4, window_bounds = array<i64: 1, 64>}, {pipeline_mode = #tpu.pipeline_mode<synchronous>, transform_indices = @transform_5, window_bounds = array<i64: 64, 128>}, {pipeline_mode = #tpu.pipeline_mode<synchronous>, transform_indices = @transform_6, window_bounds = array<i64: 1, 128>}, {transform_indices = @transform_7, window_bounds = array<i64: 128, 2048>}, {pipeline_mode = #tpu.pipeline_mode<synchronous>, transform_indices = @transform_8, window_bounds = array<i64: 8192, 20>}, {pipeline_mode = #tpu.pipeline_mode<synchronous>, transform_indices = @transform_9, window_bounds = array<i64: 8, 1>}, {pipeline_mode = #tpu.pipeline_mode<synchronous>, transform_indices = @transform_10, window_bounds = array<i64: 2, 10>}]} {
    %c2048_i32 = arith.constant 2048 : i32
    %0 = arith.muli %arg1, %c2048_i32 : i32
    %1 = tpu.assume_multiple %0, 2048 : i32
    %c0_i32 = arith.constant 0 : i32
    %2 = arith.cmpi eq, %arg0, %c0_i32 : i32
    %c0_i32_0 = arith.constant 0 : i32
    %3 = arith.cmpi eq, %arg1, %c0_i32_0 : i32
    %4 = arith.andi %2, %3 : i1
    %5 = arith.extui %4 : i1 to i32
    %c0_i32_1 = arith.constant 0 : i32
    %6 = arith.cmpi ne, %5, %c0_i32_1 : i32
    scf.if %6 {
      %cst = arith.constant 0.000000e+00 : f32
      %23 = vector.broadcast %cst : f32 to vector<8x128xf32>
      %c0 = arith.constant 0 : index
      %c0_10 = arith.constant 0 : index
      %24 = vector.load %arg13[%c0, %c0_10] : memref<8x128xf32, #tpu.memory_space<vmem>>, vector<8x128xf32>
      tpu.vector_store %arg13[%c0, %c0_10], %23 {strides = array<i32>} : memref<8x128xf32, #tpu.memory_space<vmem>>, vector<8x128xf32>,
    } else {
    }
    %c0_i32_2 = arith.constant 0 : i32
    %7 = arith.cmpi eq, %arg0, %c0_i32_2 : i32
    %8 = arith.extui %7 : i1 to i32
    %c0_i32_3 = arith.constant 0 : i32
    %9 = arith.cmpi ne, %8, %c0_i32_3 : i32
    scf.if %9 {
      %c0 = arith.constant 0 : index
      %23 = arith.index_cast %1 : i32 to index
      %24 = vector.load %arg2[%c0, %23] : memref<8x8192xbf16, #tpu.memory_space<vmem>>, vector<8x2048xbf16>
      %c0_10 = arith.constant 0 : index
      %c0_11 = arith.constant 0 : index
      %25 = vector.load %arg13[%c0_10, %c0_11] : memref<8x128xf32, #tpu.memory_space<vmem>>, vector<8x128xf32>
      %c0_12 = arith.constant 0 : index
      %c0_13 = arith.constant 0 : index
      %26 = vector.load %arg4[%c0_12, %c0_13] : memref<2048x128xbf16, #tpu.memory_space<vmem>>, vector<2048x128xbf16>
      %cst = arith.constant dense<0.000000e+00> : vector<8x128xf32>
      %27 = tpu.matmul %24, %26, %cst {dimension_numbers = #tpu.dot_dimension_numbers<[1], [0], [0], [1], [0, 0, 1, 1], [], []>} : vector<8x2048xbf16>, vector<2048x128xbf16>, vector<8x128xf32> -> vector<8x128xf32>
      %28 = arith.addf %25, %27 : vector<8x128xf32>
      %c0_14 = arith.constant 0 : index
      %c0_15 = arith.constant 0 : index
      %29 = vector.load %arg13[%c0_14, %c0_15] : memref<8x128xf32, #tpu.memory_space<vmem>>, vector<8x128xf32>
      tpu.vector_store %arg13[%c0_14, %c0_15], %28 {strides = array<i32>} : memref<8x128xf32, #tpu.memory_space<vmem>>, vector<8x128xf32>,
    } else {
    }
    %c0_i32_4 = arith.constant 0 : i32
    %10 = arith.cmpi eq, %arg0, %c0_i32_4 : i32
    %c3_i32 = arith.constant 3 : i32
    %11 = arith.cmpi eq, %arg1, %c3_i32 : i32
    %12 = arith.andi %10, %11 : i1
    %13 = arith.extui %12 : i1 to i32
    %c0_i32_5 = arith.constant 0 : i32
    %14 = arith.cmpi ne, %13, %c0_i32_5 : i32
    scf.if %14 {
      %c0 = arith.constant 0 : index
      %c0_10 = arith.constant 0 : index
      %23 = vector.load %arg13[%c0, %c0_10] : memref<8x128xf32, #tpu.memory_space<vmem>>, vector<8x128xf32>
      %cst = arith.constant 0.000000e+00 : f32
      %24 = vector.broadcast %cst : f32 to vector<8x128xf32>
      %25 = arith.maximumf %23, %24 : vector<8x128xf32>
      %c0_11 = arith.constant 0 : index
      %c0_12 = arith.constant 0 : index
      %26 = vector.load %arg5[%c0_11, %c0_12] : memref<128x64xf32, #tpu.memory_space<vmem>>, vector<128x64xf32>
      %cst_13 = arith.constant dense<0.000000e+00> : vector<8x64xf32>
      %27 = tpu.matmul %25, %26, %cst_13 {dimension_numbers = #tpu.dot_dimension_numbers<[1], [0], [0], [1], [0, 0, 1, 1], [], []>} : vector<8x128xf32>, vector<128x64xf32>, vector<8x64xf32> -> vector<8x64xf32>
      %c0_14 = arith.constant 0 : index
      %c0_15 = arith.constant 0 : index
      %28 = vector.load %arg6[%c0_14, %c0_15] : memref<1x64xf32, #tpu.memory_space<vmem>>, vector<1x64xf32>
      %29 = vector.broadcast %28 : vector<1x64xf32> to vector<8x64xf32>
      %30 = arith.addf %27, %29 : vector<8x64xf32>
      %cst_16 = arith.constant 0.000000e+00 : f32
      %31 = vector.broadcast %cst_16 : f32 to vector<8x64xf32>
      %32 = arith.maximumf %30, %31 : vector<8x64xf32>
      %c0_17 = arith.constant 0 : index
      %c0_18 = arith.constant 0 : index
      %33 = vector.load %arg7[%c0_17, %c0_18] : memref<64x128xf32, #tpu.memory_space<vmem>>, vector<64x128xf32>
      %cst_19 = arith.constant dense<0.000000e+00> : vector<8x128xf32>
      %34 = tpu.matmul %32, %33, %cst_19 {dimension_numbers = #tpu.dot_dimension_numbers<[1], [0], [0], [1], [0, 0, 1, 1], [], []>} : vector<8x64xf32>, vector<64x128xf32>, vector<8x128xf32> -> vector<8x128xf32>
      %c0_20 = arith.constant 0 : index
      %c0_21 = arith.constant 0 : index
      %35 = vector.load %arg8[%c0_20, %c0_21] : memref<1x128xf32, #tpu.memory_space<vmem>>, vector<1x128xf32>
      %36 = vector.broadcast %35 : vector<1x128xf32> to vector<8x128xf32>
      %37 = arith.addf %34, %36 : vector<8x128xf32>
      %cst_22 = arith.constant 0.000000e+00 : f32
      %38 = vector.broadcast %cst_22 : f32 to vector<8x128xf32>
      %39 = arith.maximumf %37, %38 : vector<8x128xf32>
      %40 = arith.truncf %39 : vector<8x128xf32> to vector<8x128xbf16>
      %c0_23 = arith.constant 0 : index
      %c0_24 = arith.constant 0 : index
      %41 = vector.load %arg14[%c0_23, %c0_24] : memref<8x128xbf16, #tpu.memory_space<vmem>>, vector<8x128xbf16>
      tpu.vector_store %arg14[%c0_23, %c0_24], %40 {strides = array<i32>} : memref<8x128xbf16, #tpu.memory_space<vmem>>, vector<8x128xbf16>,
      %cst_25 = arith.constant 0.000000e+00 : f32
      %42 = vector.broadcast %cst_25 : f32 to vector<8x20xf32>
      %c0_26 = arith.constant 0 : index
      %c0_27 = arith.constant 0 : index
      %43 = vector.load %arg15[%c0_26, %c0_27] : memref<8x20xf32, #tpu.memory_space<vmem>>, vector<8x20xf32>
      tpu.vector_store %arg15[%c0_26, %c0_27], %42 {strides = array<i32>} : memref<8x20xf32, #tpu.memory_space<vmem>>, vector<8x20xf32>,
    } else {
    }
    %c1_i32 = arith.constant 1 : i32
    %15 = arith.cmpi eq, %arg0, %c1_i32 : i32
    %16 = arith.extui %15 : i1 to i32
    %c0_i32_6 = arith.constant 0 : i32
    %17 = arith.cmpi ne, %16, %c0_i32_6 : i32
    scf.if %17 {
      %c0 = arith.constant 0 : index
      %c0_10 = arith.constant 0 : index
      %23 = vector.load %arg14[%c0, %c0_10] : memref<8x128xbf16, #tpu.memory_space<vmem>>, vector<8x128xbf16>
      %c0_11 = arith.constant 0 : index
      %c0_12 = arith.constant 0 : index
      %24 = vector.load %arg9[%c0_11, %c0_12] : memref<128x2048xbf16, #tpu.memory_space<vmem>>, vector<128x2048xbf16>
      %cst = arith.constant dense<0.000000e+00> : vector<8x2048xf32>
      %25 = tpu.matmul %23, %24, %cst {dimension_numbers = #tpu.dot_dimension_numbers<[1], [0], [0], [1], [0, 0, 1, 1], [], []>} : vector<8x128xbf16>, vector<128x2048xbf16>, vector<8x2048xf32> -> vector<8x2048xf32>
      %c0_13 = arith.constant 0 : index
      %26 = arith.index_cast %1 : i32 to index
      %27 = vector.load %arg2[%c0_13, %26] : memref<8x8192xbf16, #tpu.memory_space<vmem>>, vector<8x2048xbf16>
      %c0_14 = arith.constant 0 : index
      %28 = arith.index_cast %1 : i32 to index
      %29 = vector.load %arg3[%c0_14, %28] : memref<8x8192xbf16, #tpu.memory_space<vmem>>, vector<8x2048xbf16>
      %cst_15 = arith.constant 5.000000e-01 : bf16
      %30 = vector.broadcast %cst_15 : bf16 to vector<8x2048xbf16>
      %31 = arith.cmpf ogt, %29, %30 : vector<8x2048xbf16>
      %32 = arith.truncf %25 : vector<8x2048xf32> to vector<8x2048xbf16>
      %33 = arith.select %31, %27, %32 : vector<8x2048xi1>, vector<8x2048xbf16>
      %34 = arith.index_cast %1 : i32 to index
      %c0_16 = arith.constant 0 : index
      %35 = vector.load %arg10[%34, %c0_16] : memref<8192x20xbf16, #tpu.memory_space<vmem>>, vector<2048x20xbf16>
      %c0_17 = arith.constant 0 : index
      %c0_18 = arith.constant 0 : index
      %36 = vector.load %arg15[%c0_17, %c0_18] : memref<8x20xf32, #tpu.memory_space<vmem>>, vector<8x20xf32>
      %cst_19 = arith.constant dense<0.000000e+00> : vector<8x20xf32>
      %37 = tpu.matmul %33, %35, %cst_19 {dimension_numbers = #tpu.dot_dimension_numbers<[1], [0], [0], [1], [0, 0, 1, 1], [], []>} : vector<8x2048xbf16>, vector<2048x20xbf16>, vector<8x20xf32> -> vector<8x20xf32>
      %38 = arith.addf %36, %37 : vector<8x20xf32>
      %c0_20 = arith.constant 0 : index
      %c0_21 = arith.constant 0 : index
      %39 = vector.load %arg15[%c0_20, %c0_21] : memref<8x20xf32, #tpu.memory_space<vmem>>, vector<8x20xf32>
      tpu.vector_store %arg15[%c0_20, %c0_21], %38 {strides = array<i32>} : memref<8x20xf32, #tpu.memory_space<vmem>>, vector<8x20xf32>,
    } else {
    }
    %c1_i32_7 = arith.constant 1 : i32
    %18 = arith.cmpi eq, %arg0, %c1_i32_7 : i32
    %c3_i32_8 = arith.constant 3 : i32
    %19 = arith.cmpi eq, %arg1, %c3_i32_8 : i32
    %20 = arith.andi %18, %19 : i1
    %21 = arith.extui %20 : i1 to i32
    %c0_i32_9 = arith.constant 0 : i32
    %22 = arith.cmpi ne, %21, %c0_i32_9 : i32
    scf.if %22 {
      %c0 = arith.constant 0 : index
      %c0_10 = arith.constant 0 : index
      %23 = vector.load %arg15[%c0, %c0_10] : memref<8x20xf32, #tpu.memory_space<vmem>>, vector<8x20xf32>
      %c0_11 = arith.constant 0 : index
      %c0_12 = arith.constant 0 : index
      %24 = vector.load %arg11[%c0_11, %c0_12] : memref<8x1xf32, #tpu.memory_space<vmem>>, vector<8x1xf32>
      %25 = vector.extract_strided_slice %23 {offsets = [0, 0], sizes = [8, 10], strides = [1, 1]} : vector<8x20xf32> to vector<8x10xf32>
      %26 = vector.broadcast %24 : vector<8x1xf32> to vector<8x10xf32>
      %27 = arith.mulf %25, %26 : vector<8x10xf32>
      %cst = arith.constant dense<0.000000e+00> : vector<10xf32>
      %28 = vector.multi_reduction <add>, %27, %cst [0] : vector<8x10xf32> to vector<10xf32>
      %29 = vector.shape_cast %28 : vector<10xf32> to vector<1x10xf32>
      %c0_13 = arith.constant 0 : index
      %c0_14 = arith.constant 0 : index
      %30 = vector.load %arg12[%c0_13, %c0_14] : memref<2x10xf32, #tpu.memory_space<vmem>>, vector<1x10xf32>
      tpu.vector_store %arg12[%c0_13, %c0_14], %29 {strides = array<i32>} : memref<2x10xf32, #tpu.memory_space<vmem>>, vector<1x10xf32>,
      %31 = vector.extract_strided_slice %23 {offsets = [0, 10], sizes = [8, 10], strides = [1, 1]} : vector<8x20xf32> to vector<8x10xf32>
      %32 = vector.broadcast %24 : vector<8x1xf32> to vector<8x10xf32>
      %33 = arith.mulf %31, %32 : vector<8x10xf32>
      %cst_15 = arith.constant dense<0.000000e+00> : vector<10xf32>
      %34 = vector.multi_reduction <add>, %33, %cst_15 [0] : vector<8x10xf32> to vector<10xf32>
      %35 = vector.shape_cast %34 : vector<10xf32> to vector<1x10xf32>
      %c1 = arith.constant 1 : index
      %c0_16 = arith.constant 0 : index
      %36 = vector.load %arg12[%c1, %c0_16] : memref<2x10xf32, #tpu.memory_space<vmem>>, vector<1x10xf32>
      tpu.vector_store %arg12[%c1, %c0_16], %35 {strides = array<i32>} : memref<2x10xf32, #tpu.memory_space<vmem>>, vector<1x10xf32>,
    } else {
    }
    return
  }
  func.func @transform_0(%arg0: i32, %arg1: i32) -> (i32, i32) {
    %c0_i32 = arith.constant 0 : i32
    %c0_i32_0 = arith.constant 0 : i32
    %c0_i32_1 = arith.constant 0 : i32
    return %c0_i32, %c0_i32_0 : i32, i32
  }
  func.func @transform_1(%arg0: i32, %arg1: i32) -> (i32, i32) {
    %c0_i32 = arith.constant 0 : i32
    %c0_i32_0 = arith.constant 0 : i32
    %c0_i32_1 = arith.constant 0 : i32
    return %c0_i32, %c0_i32_0 : i32, i32
  }
  func.func @transform_2(%arg0: i32, %arg1: i32) -> (i32, i32) {
    %c1_i32 = arith.constant 1 : i32
    %0 = arith.subi %c1_i32, %arg0 : i32
    %1 = arith.muli %arg1, %0 : i32
    %c3_i32 = arith.constant 3 : i32
    %2 = arith.muli %c3_i32, %arg0 : i32
    %3 = arith.addi %1, %2 : i32
    %c0_i32 = arith.constant 0 : i32
    %c0_i32_0 = arith.constant 0 : i32
    return %3, %c0_i32 : i32, i32
  }
  func.func @transform_3(%arg0: i32, %arg1: i32) -> (i32, i32) {
    %c0_i32 = arith.constant 0 : i32
    %c0_i32_0 = arith.constant 0 : i32
    %c0_i32_1 = arith.constant 0 : i32
    return %c0_i32, %c0_i32_0 : i32, i32
  }
  func.func @transform_4(%arg0: i32, %arg1: i32) -> (i32, i32) {
    %c0_i32 = arith.constant 0 : i32
    %c0_i32_0 = arith.constant 0 : i32
    %c0_i32_1 = arith.constant 0 : i32
    return %c0_i32, %c0_i32_0 : i32, i32
  }
  func.func @transform_5(%arg0: i32, %arg1: i32) -> (i32, i32) {
    %c0_i32 = arith.constant 0 : i32
    %c0_i32_0 = arith.constant 0 : i32
    %c0_i32_1 = arith.constant 0 : i32
    return %c0_i32, %c0_i32_0 : i32, i32
  }
  func.func @transform_6(%arg0: i32, %arg1: i32) -> (i32, i32) {
    %c0_i32 = arith.constant 0 : i32
    %c0_i32_0 = arith.constant 0 : i32
    %c0_i32_1 = arith.constant 0 : i32
    return %c0_i32, %c0_i32_0 : i32, i32
  }
  func.func @transform_7(%arg0: i32, %arg1: i32) -> (i32, i32) {
    %0 = arith.muli %arg1, %arg0 : i32
    %c0_i32 = arith.constant 0 : i32
    %c0_i32_0 = arith.constant 0 : i32
    return %c0_i32, %0 : i32, i32
  }
  func.func @transform_8(%arg0: i32, %arg1: i32) -> (i32, i32) {
    %c0_i32 = arith.constant 0 : i32
    %c0_i32_0 = arith.constant 0 : i32
    %c0_i32_1 = arith.constant 0 : i32
    return %c0_i32, %c0_i32_0 : i32, i32
  }
  func.func @transform_9(%arg0: i32, %arg1: i32) -> (i32, i32) {
    %c0_i32 = arith.constant 0 : i32
    %c0_i32_0 = arith.constant 0 : i32
    %c0_i32_1 = arith.constant 0 : i32
    return %c0_i32, %c0_i32_0 : i32, i32
  }
  func.func @transform_10(%arg0: i32, %arg1: i32) -> (i32, i32) {
    %c0_i32 = arith.constant 0 : i32
    %c0_i32_0 = arith.constant 0 : i32
    %c0_i32_1 = arith.constant 0 : i32
    return %c0_i32, %c0_i32_0 : i32, i32
  }
}

</mosaic_0001>

<bundles_post_ra>
// kernel: forward_pallas.1
= control target key start
LH: loop header
LB: loop body
LE: loop exit
PB: predicated region body
PF: predicated region fallthrough
CT: control target
= control target key end

     0   :  { %s7838_s0 = inlined_call_operand.vmem [shape: bf16[8,8192], index: 0, kind: input, shape index: {}]   ;;  %s7839_s1 = inlined_call_operand.vmem [shape: bf16[8,8192], index: 1, kind: input, shape index: {}]   ;;  %s7840_s2 = inlined_call_operand.vmem [shape: bf16[8192,128], index: 2, kind: input, shape index: {}]   ;;  %s7841_s3 = inlined_call_operand.vmem [shape: f32[128,64], index: 3, kind: input, shape index: {}]   ;;  %s7842_s4 = inlined_call_operand.vmem [shape: f32[1,64], index: 4, kind: input, shape index: {}]   ;;  %s7843_s5 = inlined_call_operand.vmem [shape: f32[64,128], index: 5, kind: input, shape index: {}]   ;;  %s7844_s6 = inlined_call_operand.vmem [shape: f32[1,128], index: 6, kind: input, shape index: {}]   ;;  %s7845_s7 = inlined_call_operand.vmem [shape: bf16[128,8192], index: 7, kind: input, shape index: {}]   ;;  %s7846_s8 = inlined_call_operand.vmem [shape: bf16[8192,20], index: 8, kind: input, shape index: {}]   ;;  %s7847_s9 = inlined_call_operand.vmem [shape: f32[8,1], index: 9, kind: input, shape index: {}]   ;;  %s7848_s10 = inlined_call_operand.hbm [shape: f32[2,10], index: 10, kind: output, shape index: {}]  }
   0x1   :  { %7850 = sst [smem:[#allocation10_spill]] %s7845_s7 }
   0x2   :  { %15 = vsyncpa [#allocation7], 0  ;;  %s6727_s13 = smov 0   ;;  %s6729_s14 = smov 0  }
   0x3   :  { %s6731_s15 = smov 0   ;;  %s6733_s16 = smov 0  }
   0x4   :  { %s6735_s17 = smov 0   ;;  %s6737_s18 = smov 0  }
   0x5   :  { %s6739_s19 = smov 0  }
   0x6 LB: > { %s30_s21 = sadd.s32 1, %s6657_s17  ;;  %s33_s22 = sadd.s32 1, %s6661_s18  ;;  %s6665_s19 = sphi %s6739_s19, %s21_s19   ;;  %s6661_s18 = sphi %s6737_s18, %s7884_s18   ;;  %s6657_s17 = sphi %s6735_s17, %s7883_s17   ;;  %s6653_s16 = sphi %s6733_s16, %s7882_s16   ;;  %s6649_s15 = sphi %s6731_s15, %s7881_s15   ;;  %s6645_s14 = sphi %s6729_s14, %s7880_s14   ;;  %s6641_s13 = sphi %s6727_s13, %s7879_s13  }
   0x7   : > { %p31_p0 = scmp.ge.s32.totalorder %s30_s21, 4  ;;  %p209_p1 = scmp.ne.s32.totalorder %s6645_s14, %s6641_s13 }
   0x8   : > { %p210_p2 = scmp.eq.s32.totalorder %s6665_s19, 0  ;;  %s197_s23 = smul.u32 %s6657_s17, %s6661_s18 }
   0x9   : > { %s7886_s21 = smov (%p31_p0, %s30_s21), 0  ;;  %s7888_s22 = smov (!%p31_p0, %s33_s22), %s6661_s18 }
   0xa   : > { %p35_p3 = scmp.ge.s32.totalorder %s7888_s22, 2  ;;  %p211_p4 = por %p210_p2, %p209_p1 }
   0xb   : > { %s202_s26 = sadd.s32 1, %s6645_s14  ;;  %p4568_p6 = scmp.ge.s32.totalorder %s6665_s19, 8 }
   0xc   : > { %s7890_s22 = smov (%p35_p3, %s7888_s22), 0 }
   0xd   : > { %7851 = sst [smem:[#allocation9_spill]] %s7890_s22  ;;  %s198_s24 = smul.u32 %s7890_s22, %s7886_s21 }
   0xe   : > { %322 = sbr.rel (%p4568_p6) target bundleno = 157 (0x9d), region = 48 }
   0xf   : > { %s199_s25 = ssub.s32 %s197_s23, %s198_s24 }
  0x10   : > { %p200_p5 = scmp.eq.s32.totalorder %s199_s25, 0 }
  0x12   : > { %s6779_s27 = scalar_select %p200_p5, %s6645_s14, %s202_s26  }
  0x13   : > { %342 = sbr.rel (!%p211_p4) target bundleno = 157 (0x9d), region = 56  ;;  %s344_s28 = sand.u32 (%p211_p4), 1, %s6645_s14  }
  0x14   : > { %s6124_s29 = sshll.u32 (%p211_p4), %s197_s23, 6  ;;  %s4569_s30 = sshll.u32 (%p211_p4), %s344_s28, 10 }
  0x15   : > { %s7852_s7 = sld [smem:[#allocation10_spill]] (%p211_p4)  ;;  %s6791_s23 = scalar_lea.vmem (%p211_p4), [#allocation5], %s4569_s30 }
  0x1b   : > { %s6786_s20 = scalar_lea.vmem %s7852_s7, %s6124_s29 }
  0x1c   : > { %v363_v0 = vld [vmem:[%s6786_s20] sm:$0xff]  ;;  %v365_v1 = vld [vmem:[%s6786_s20 + $0x8] sm:$0xff]  ;;  %v367_v2 = vld [vmem:[%s6786_s20 + $0x10] sm:$0xff] }
  0x1d   : > { %364 = vst [vmem:[%s6791_s23] sm:$0xff] %v363_v0  ;;  %v369_v3 = vld [vmem:[%s6786_s20 + $0x18] sm:$0xff]  ;;  %v371_v4 = vld [vmem:[%s6786_s20 + $0x20] sm:$0xff]  ;;  %v373_v5 = vld [vmem:[%s6786_s20 + $0x28] sm:$0xff] }
  0x1e   : > { %366 = vst [vmem:[%s6791_s23 + $0x8] sm:$0xff] %v365_v1  ;;  %v375_v6 = vld [vmem:[%s6786_s20 + $0x30] sm:$0xff]  ;;  %v377_v7 = vld [vmem:[%s6786_s20 + $0x38] sm:$0xff]  ;;  %v379_v8 = vld [vmem:[%s6786_s20 + $0x100] sm:$0xff] }
  0x1f   : > { %368 = vst [vmem:[%s6791_s23 + $0x10] sm:$0xff] %v367_v2  ;;  %v381_v9 = vld [vmem:[%s6786_s20 + $0x108] sm:$0xff]  ;;  %v383_v10 = vld [vmem:[%s6786_s20 + $0x110] sm:$0xff]  ;;  %v385_v11 = vld [vmem:[%s6786_s20 + $0x118] sm:$0xff] }
  0x20   : > { %370 = vst [vmem:[%s6791_s23 + $0x18] sm:$0xff] %v369_v3  ;;  %v387_v12 = vld [vmem:[%s6786_s20 + $0x120] sm:$0xff]  ;;  %v389_v13 = vld [vmem:[%s6786_s20 + $0x128] sm:$0xff]  ;;  %v391_v14 = vld [vmem:[%s6786_s20 + $0x130] sm:$0xff] }
  0x21   : > { %372 = vst [vmem:[%s6791_s23 + $0x20] sm:$0xff] %v371_v4  ;;  %v393_v15 = vld [vmem:[%s6786_s20 + $0x138] sm:$0xff]  ;;  %v395_v16 = vld [vmem:[%s6786_s20 + $0x200] sm:$0xff]  ;;  %v397_v17 = vld [vmem:[%s6786_s20 + $0x208] sm:$0xff] }
  0x22   : > { %374 = vst [vmem:[%s6791_s23 + $0x28] sm:$0xff] %v373_v5  ;;  %v399_v18 = vld [vmem:[%s6786_s20 + $0x210] sm:$0xff]  ;;  %v401_v19 = vld [vmem:[%s6786_s20 + $0x218] sm:$0xff]  ;;  %v403_v20 = vld [vmem:[%s6786_s20 + $0x220] sm:$0xff] }
  0x23   : > { %376 = vst [vmem:[%s6791_s23 + $0x30] sm:$0xff] %v375_v6  ;;  %v405_v21 = vld [vmem:[%s6786_s20 + $0x228] sm:$0xff]  ;;  %v407_v22 = vld [vmem:[%s6786_s20 + $0x230] sm:$0xff]  ;;  %v409_v23 = vld [vmem:[%s6786_s20 + $0x238] sm:$0xff] }
  0x24   : > { %378 = vst [vmem:[%s6791_s23 + $0x38] sm:$0xff] %v377_v7  ;;  %v411_v24 = vld [vmem:[%s6786_s20 + $0x300] sm:$0xff]  ;;  %v413_v25 = vld [vmem:[%s6786_s20 + $0x308] sm:$0xff]  ;;  %v415_v26 = vld [vmem:[%s6786_s20 + $0x310] sm:$0xff] }
  0x25   : > { %380 = vst [vmem:[%s6791_s23 + $0x40] sm:$0xff] %v379_v8  ;;  %v417_v27 = vld [vmem:[%s6786_s20 + $0x318] sm:$0xff]  ;;  %v419_v28 = vld [vmem:[%s6786_s20 + $0x320] sm:$0xff]  ;;  %v421_v29 = vld [vmem:[%s6786_s20 + $0x328] sm:$0xff] }
  0x26   : > { %382 = vst [vmem:[%s6791_s23 + $0x48] sm:$0xff] %v381_v9  ;;  %v423_v30 = vld [vmem:[%s6786_s20 + $0x330] sm:$0xff]  ;;  %v425_v31 = vld [vmem:[%s6786_s20 + $0x338] sm:$0xff]  ;;  %v427_v32 = vld [vmem:[%s6786_s20 + $0x400] sm:$0xff] }
  0x27   : > { %384 = vst [vmem:[%s6791_s23 + $0x50] sm:$0xff] %v383_v10  ;;  %v429_v33 = vld [vmem:[%s6786_s20 + $0x408] sm:$0xff]  ;;  %v431_v34 = vld [vmem:[%s6786_s20 + $0x410] sm:$0xff]  ;;  %v433_v35 = vld [vmem:[%s6786_s20 + $0x418] sm:$0xff] }
  0x28   : > { %386 = vst [vmem:[%s6791_s23 + $0x58] sm:$0xff] %v385_v11  ;;  %v435_v36 = vld [vmem:[%s6786_s20 + $0x420] sm:$0xff]  ;;  %v437_v37 = vld [vmem:[%s6786_s20 + $0x428] sm:$0xff]  ;;  %v439_v38 = vld [vmem:[%s6786_s20 + $0x430] sm:$0xff] }
  0x29   : > { %388 = vst [vmem:[%s6791_s23 + $0x60] sm:$0xff] %v387_v12  ;;  %v441_v39 = vld [vmem:[%s6786_s20 + $0x438] sm:$0xff]  ;;  %v443_v40 = vld [vmem:[%s6786_s20 + $0x500] sm:$0xff]  ;;  %v445_v41 = vld [vmem:[%s6786_s20 + $0x508] sm:$0xff] }
  0x2a   : > { %390 = vst [vmem:[%s6791_s23 + $0x68] sm:$0xff] %v389_v13  ;;  %v447_v42 = vld [vmem:[%s6786_s20 + $0x510] sm:$0xff]  ;;  %v449_v43 = vld [vmem:[%s6786_s20 + $0x518] sm:$0xff]  ;;  %v451_v44 = vld [vmem:[%s6786_s20 + $0x520] sm:$0xff] }
  0x2b   : > { %392 = vst [vmem:[%s6791_s23 + $0x70] sm:$0xff] %v391_v14  ;;  %v453_v45 = vld [vmem:[%s6786_s20 + $0x528] sm:$0xff]  ;;  %v455_v46 = vld [vmem:[%s6786_s20 + $0x530] sm:$0xff]  ;;  %v457_v47 = vld [vmem:[%s6786_s20 + $0x538] sm:$0xff] }
  0x2c   : > { %394 = vst [vmem:[%s6791_s23 + $0x78] sm:$0xff] %v393_v15  ;;  %v459_v48 = vld [vmem:[%s6786_s20 + $0x600] sm:$0xff]  ;;  %v461_v49 = vld [vmem:[%s6786_s20 + $0x608] sm:$0xff]  ;;  %v463_v50 = vld [vmem:[%s6786_s20 + $0x610] sm:$0xff] }
  0x2d   : > { %396 = vst [vmem:[%s6791_s23 + $0x80] sm:$0xff] %v395_v16  ;;  %v465_v51 = vld [vmem:[%s6786_s20 + $0x618] sm:$0xff]  ;;  %v467_v52 = vld [vmem:[%s6786_s20 + $0x620] sm:$0xff]  ;;  %v469_v53 = vld [vmem:[%s6786_s20 + $0x628] sm:$0xff] }
  0x2e   : > { %398 = vst [vmem:[%s6791_s23 + $0x88] sm:$0xff] %v397_v17  ;;  %v471_v54 = vld [vmem:[%s6786_s20 + $0x630] sm:$0xff]  ;;  %v473_v55 = vld [vmem:[%s6786_s20 + $0x638] sm:$0xff]  ;;  %v475_v56 = vld [vmem:[%s6786_s20 + $0x700] sm:$0xff] }
  0x2f   : > { %400 = vst [vmem:[%s6791_s23 + $0x90] sm:$0xff] %v399_v18  ;;  %v477_v57 = vld [vmem:[%s6786_s20 + $0x708] sm:$0xff]  ;;  %v479_v58 = vld [vmem:[%s6786_s20 + $0x710] sm:$0xff]  ;;  %v481_v59 = vld [vmem:[%s6786_s20 + $0x718] sm:$0xff] }
  0x30   : > { %402 = vst [vmem:[%s6791_s23 + $0x98] sm:$0xff] %v401_v19  ;;  %v483_v60 = vld [vmem:[%s6786_s20 + $0x720] sm:$0xff]  ;;  %v485_v61 = vld [vmem:[%s6786_s20 + $0x728] sm:$0xff]  ;;  %v487_v62 = vld [vmem:[%s6786_s20 + $0x730] sm:$0xff] }
  0x31   : > { %404 = vst [vmem:[%s6791_s23 + $0xa0] sm:$0xff] %v403_v20  ;;  %v489_v63 = vld [vmem:[%s6786_s20 + $0x738] sm:$0xff]  ;;  %v491_v0 = vld [vmem:[%s6786_s20 + $0x800] sm:$0xff]  ;;  %v493_v1 = vld [vmem:[%s6786_s20 + $0x808] sm:$0xff] }
  0x32   : > { %406 = vst [vmem:[%s6791_s23 + $0xa8] sm:$0xff] %v405_v21  ;;  %v495_v2 = vld [vmem:[%s6786_s20 + $0x810] sm:$0xff]  ;;  %v497_v3 = vld [vmem:[%s6786_s20 + $0x818] sm:$0xff]  ;;  %v499_v4 = vld [vmem:[%s6786_s20 + $0x820] sm:$0xff] }
  0x33   : > { %408 = vst [vmem:[%s6791_s23 + $0xb0] sm:$0xff] %v407_v22  ;;  %v501_v5 = vld [vmem:[%s6786_s20 + $0x828] sm:$0xff]  ;;  %v503_v6 = vld [vmem:[%s6786_s20 + $0x830] sm:$0xff]  ;;  %v505_v7 = vld [vmem:[%s6786_s20 + $0x838] sm:$0xff] }
  0x34   : > { %410 = vst [vmem:[%s6791_s23 + $0xb8] sm:$0xff] %v409_v23  ;;  %v507_v8 = vld [vmem:[%s6786_s20 + $0x900] sm:$0xff]  ;;  %v509_v9 = vld [vmem:[%s6786_s20 + $0x908] sm:$0xff]  ;;  %v511_v10 = vld [vmem:[%s6786_s20 + $0x910] sm:$0xff] }
  0x35   : > { %412 = vst [vmem:[%s6791_s23 + $0xc0] sm:$0xff] %v411_v24  ;;  %v513_v11 = vld [vmem:[%s6786_s20 + $0x918] sm:$0xff]  ;;  %v515_v12 = vld [vmem:[%s6786_s20 + $0x920] sm:$0xff]  ;;  %v517_v13 = vld [vmem:[%s6786_s20 + $0x928] sm:$0xff] }
  0x36   : > { %414 = vst [vmem:[%s6791_s23 + $0xc8] sm:$0xff] %v413_v25  ;;  %v519_v14 = vld [vmem:[%s6786_s20 + $0x930] sm:$0xff]  ;;  %v521_v15 = vld [vmem:[%s6786_s20 + $0x938] sm:$0xff]  ;;  %v523_v16 = vld [vmem:[%s6786_s20 + $0xa00] sm:$0xff] }
  0x37   : > { %416 = vst [vmem:[%s6791_s23 + $0xd0] sm:$0xff] %v415_v26  ;;  %v525_v17 = vld [vmem:[%s6786_s20 + $0xa08] sm:$0xff]  ;;  %v527_v18 = vld [vmem:[%s6786_s20 + $0xa10] sm:$0xff]  ;;  %v529_v19 = vld [vmem:[%s6786_s20 + $0xa18] sm:$0xff] }
  0x38   : > { %418 = vst [vmem:[%s6791_s23 + $0xd8] sm:$0xff] %v417_v27  ;;  %v531_v20 = vld [vmem:[%s6786_s20 + $0xa20] sm:$0xff]  ;;  %v533_v21 = vld [vmem:[%s6786_s20 + $0xa28] sm:$0xff]  ;;  %v535_v22 = vld [vmem:[%s6786_s20 + $0xa30] sm:$0xff] }
  0x39   : > { %420 = vst [vmem:[%s6791_s23 + $0xe0] sm:$0xff] %v419_v28  ;;  %v537_v23 = vld [vmem:[%s6786_s20 + $0xa38] sm:$0xff]  ;;  %v539_v24 = vld [vmem:[%s6786_s20 + $0xb00] sm:$0xff]  ;;  %v541_v25 = vld [vmem:[%s6786_s20 + $0xb08] sm:$0xff] }
  0x3a   : > { %422 = vst [vmem:[%s6791_s23 + $0xe8] sm:$0xff] %v421_v29  ;;  %v543_v26 = vld [vmem:[%s6786_s20 + $0xb10] sm:$0xff]  ;;  %v545_v27 = vld [vmem:[%s6786_s20 + $0xb18] sm:$0xff]  ;;  %v547_v28 = vld [vmem:[%s6786_s20 + $0xb20] sm:$0xff] }
  0x3b   : > { %424 = vst [vmem:[%s6791_s23 + $0xf0] sm:$0xff] %v423_v30  ;;  %v549_v29 = vld [vmem:[%s6786_s20 + $0xb28] sm:$0xff]  ;;  %v551_v30 = vld [vmem:[%s6786_s20 + $0xb30] sm:$0xff] }
  0x3c   : > { %426 = vst [vmem:[%s6791_s23 + $0xf8] sm:$0xff] %v425_v31  ;;  %v553_v31 = vld [vmem:[%s6786_s20 + $0xb38] sm:$0xff] }
  0x3d   : > { %428 = vst [vmem:[%s6791_s23 + $0x100] sm:$0xff] %v427_v32  ;;  %v555_v32 = vld [vmem:[%s6786_s20 + $0xc00] sm:$0xff] }
  0x3e   : > { %430 = vst [vmem:[%s6791_s23 + $0x108] sm:$0xff] %v429_v33  ;;  %v557_v33 = vld [vmem:[%s6786_s20 + $0xc08] sm:$0xff] }
  0x3f   : > { %432 = vst [vmem:[%s6791_s23 + $0x110] sm:$0xff] %v431_v34  ;;  %v559_v34 = vld [vmem:[%s6786_s20 + $0xc10] sm:$0xff] }
  0x40   : > { %434 = vst [vmem:[%s6791_s23 + $0x118] sm:$0xff] %v433_v35  ;;  %v561_v35 = vld [vmem:[%s6786_s20 + $0xc18] sm:$0xff] }
  0x41   : > { %436 = vst [vmem:[%s6791_s23 + $0x120] sm:$0xff] %v435_v36  ;;  %v563_v36 = vld [vmem:[%s6786_s20 + $0xc20] sm:$0xff] }
  0x42   : > { %438 = vst [vmem:[%s6791_s23 + $0x128] sm:$0xff] %v437_v37  ;;  %v565_v37 = vld [vmem:[%s6786_s20 + $0xc28] sm:$0xff] }
  0x43   : > { %440 = vst [vmem:[%s6791_s23 + $0x130] sm:$0xff] %v439_v38  ;;  %v567_v38 = vld [vmem:[%s6786_s20 + $0xc30] sm:$0xff] }
  0x44   : > { %442 = vst [vmem:[%s6791_s23 + $0x138] sm:$0xff] %v441_v39  ;;  %v569_v39 = vld [vmem:[%s6786_s20 + $0xc38] sm:$0xff] }
  0x45   : > { %444 = vst [vmem:[%s6791_s23 + $0x140] sm:$0xff] %v443_v40  ;;  %v571_v40 = vld [vmem:[%s6786_s20 + $0xd00] sm:$0xff] }
  0x46   : > { %446 = vst [vmem:[%s6791_s23 + $0x148] sm:$0xff] %v445_v41  ;;  %v573_v41 = vld [vmem:[%s6786_s20 + $0xd08] sm:$0xff] }
  0x47   : > { %448 = vst [vmem:[%s6791_s23 + $0x150] sm:$0xff] %v447_v42  ;;  %v575_v42 = vld [vmem:[%s6786_s20 + $0xd10] sm:$0xff] }
  0x48   : > { %450 = vst [vmem:[%s6791_s23 + $0x158] sm:$0xff] %v449_v43  ;;  %v577_v43 = vld [vmem:[%s6786_s20 + $0xd18] sm:$0xff] }
  0x49   : > { %452 = vst [vmem:[%s6791_s23 + $0x160] sm:$0xff] %v451_v44  ;;  %v579_v44 = vld [vmem:[%s6786_s20 + $0xd20] sm:$0xff] }
  0x4a   : > { %454 = vst [vmem:[%s6791_s23 + $0x168] sm:$0xff] %v453_v45  ;;  %v581_v45 = vld [vmem:[%s6786_s20 + $0xd28] sm:$0xff] }
  0x4b   : > { %456 = vst [vmem:[%s6791_s23 + $0x170] sm:$0xff] %v455_v46  ;;  %v583_v46 = vld [vmem:[%s6786_s20 + $0xd30] sm:$0xff] }
  0x4c   : > { %458 = vst [vmem:[%s6791_s23 + $0x178] sm:$0xff] %v457_v47  ;;  %v585_v47 = vld [vmem:[%s6786_s20 + $0xd38] sm:$0xff] }
  0x4d   : > { %460 = vst [vmem:[%s6791_s23 + $0x180] sm:$0xff] %v459_v48  ;;  %v587_v48 = vld [vmem:[%s6786_s20 + $0xe00] sm:$0xff] }
  0x4e   : > { %462 = vst [vmem:[%s6791_s23 + $0x188] sm:$0xff] %v461_v49  ;;  %v589_v49 = vld [vmem:[%s6786_s20 + $0xe08] sm:$0xff] }
  0x4f   : > { %464 = vst [vmem:[%s6791_s23 + $0x190] sm:$0xff] %v463_v50  ;;  %v591_v50 = vld [vmem:[%s6786_s20 + $0xe10] sm:$0xff] }
  0x50   : > { %466 = vst [vmem:[%s6791_s23 + $0x198] sm:$0xff] %v465_v51  ;;  %v593_v51 = vld [vmem:[%s6786_s20 + $0xe18] sm:$0xff] }
  0x51   : > { %468 = vst [vmem:[%s6791_s23 + $0x1a0] sm:$0xff] %v467_v52  ;;  %v595_v52 = vld [vmem:[%s6786_s20 + $0xe20] sm:$0xff] }
  0x52   : > { %470 = vst [vmem:[%s6791_s23 + $0x1a8] sm:$0xff] %v469_v53  ;;  %v597_v53 = vld [vmem:[%s6786_s20 + $0xe28] sm:$0xff] }
  0x53   : > { %472 = vst [vmem:[%s6791_s23 + $0x1b0] sm:$0xff] %v471_v54  ;;  %v599_v54 = vld [vmem:[%s6786_s20 + $0xe30] sm:$0xff] }
  0x54   : > { %474 = vst [vmem:[%s6791_s23 + $0x1b8] sm:$0xff] %v473_v55  ;;  %v601_v55 = vld [vmem:[%s6786_s20 + $0xe38] sm:$0xff] }
  0x55   : > { %476 = vst [vmem:[%s6791_s23 + $0x1c0] sm:$0xff] %v475_v56  ;;  %v603_v56 = vld [vmem:[%s6786_s20 + $0xf00] sm:$0xff] }
  0x56   : > { %478 = vst [vmem:[%s6791_s23 + $0x1c8] sm:$0xff] %v477_v57  ;;  %v605_v57 = vld [vmem:[%s6786_s20 + $0xf08] sm:$0xff] }
  0x57   : > { %480 = vst [vmem:[%s6791_s23 + $0x1d0] sm:$0xff] %v479_v58  ;;  %v607_v58 = vld [vmem:[%s6786_s20 + $0xf10] sm:$0xff] }
  0x58   : > { %482 = vst [vmem:[%s6791_s23 + $0x1d8] sm:$0xff] %v481_v59  ;;  %v609_v59 = vld [vmem:[%s6786_s20 + $0xf18] sm:$0xff] }
  0x59   : > { %484 = vst [vmem:[%s6791_s23 + $0x1e0] sm:$0xff] %v483_v60  ;;  %v611_v60 = vld [vmem:[%s6786_s20 + $0xf20] sm:$0xff] }
  0x5a   : > { %486 = vst [vmem:[%s6791_s23 + $0x1e8] sm:$0xff] %v485_v61  ;;  %v613_v61 = vld [vmem:[%s6786_s20 + $0xf28] sm:$0xff] }
  0x5b   : > { %488 = vst [vmem:[%s6791_s23 + $0x1f0] sm:$0xff] %v487_v62  ;;  %v615_v62 = vld [vmem:[%s6786_s20 + $0xf30] sm:$0xff] }
  0x5c   : > { %490 = vst [vmem:[%s6791_s23 + $0x1f8] sm:$0xff] %v489_v63  ;;  %v617_v63 = vld [vmem:[%s6786_s20 + $0xf38] sm:$0xff] }
  0x5d   : > { %492 = vst [vmem:[%s6791_s23 + $0x200] sm:$0xff] %v491_v0 }
  0x5e   : > { %494 = vst [vmem:[%s6791_s23 + $0x208] sm:$0xff] %v493_v1 }
  0x5f   : > { %496 = vst [vmem:[%s6791_s23 + $0x210] sm:$0xff] %v495_v2 }
  0x60   : > { %498 = vst [vmem:[%s6791_s23 + $0x218] sm:$0xff] %v497_v3 }
  0x61   : > { %500 = vst [vmem:[%s6791_s23 + $0x220] sm:$0xff] %v499_v4 }
  0x62   : > { %502 = vst [vmem:[%s6791_s23 + $0x228] sm:$0xff] %v501_v5 }
  0x63   : > { %504 = vst [vmem:[%s6791_s23 + $0x230] sm:$0xff] %v503_v6 }
  0x64   : > { %506 = vst [vmem:[%s6791_s23 + $0x238] sm:$0xff] %v505_v7 }
  0x65   : > { %508 = vst [vmem:[%s6791_s23 + $0x240] sm:$0xff] %v507_v8 }
  0x66   : > { %510 = vst [vmem:[%s6791_s23 + $0x248] sm:$0xff] %v509_v9 }
  0x67   : > { %512 = vst [vmem:[%s6791_s23 + $0x250] sm:$0xff] %v511_v10 }
  0x68   : > { %514 = vst [vmem:[%s6791_s23 + $0x258] sm:$0xff] %v513_v11 }
  0x69   : > { %516 = vst [vmem:[%s6791_s23 + $0x260] sm:$0xff] %v515_v12 }
  0x6a   : > { %518 = vst [vmem:[%s6791_s23 + $0x268] sm:$0xff] %v517_v13 }
  0x6b   : > { %520 = vst [vmem:[%s6791_s23 + $0x270] sm:$0xff] %v519_v14 }
  0x6c   : > { %522 = vst [vmem:[%s6791_s23 + $0x278] sm:$0xff] %v521_v15 }
  0x6d   : > { %524 = vst [vmem:[%s6791_s23 + $0x280] sm:$0xff] %v523_v16 }
  0x6e   : > { %526 = vst [vmem:[%s6791_s23 + $0x288] sm:$0xff] %v525_v17 }
  0x6f   : > { %528 = vst [vmem:[%s6791_s23 + $0x290] sm:$0xff] %v527_v18 }
  0x70   : > { %530 = vst [vmem:[%s6791_s23 + $0x298] sm:$0xff] %v529_v19 }
  0x71   : > { %532 = vst [vmem:[%s6791_s23 + $0x2a0] sm:$0xff] %v531_v20 }
  0x72   : > { %534 = vst [vmem:[%s6791_s23 + $0x2a8] sm:$0xff] %v533_v21 }
  0x73   : > { %536 = vst [vmem:[%s6791_s23 + $0x2b0] sm:$0xff] %v535_v22 }
  0x74   : > { %538 = vst [vmem:[%s6791_s23 + $0x2b8] sm:$0xff] %v537_v23 }
  0x75   : > { %540 = vst [vmem:[%s6791_s23 + $0x2c0] sm:$0xff] %v539_v24 }
  0x76   : > { %542 = vst [vmem:[%s6791_s23 + $0x2c8] sm:$0xff] %v541_v25 }
  0x77   : > { %544 = vst [vmem:[%s6791_s23 + $0x2d0] sm:$0xff] %v543_v26 }
  0x78   : > { %546 = vst [vmem:[%s6791_s23 + $0x2d8] sm:$0xff] %v545_v27 }
  0x79   : > { %548 = vst [vmem:[%s6791_s23 + $0x2e0] sm:$0xff] %v547_v28 }
  0x7a   : > { %550 = vst [vmem:[%s6791_s23 + $0x2e8] sm:$0xff] %v549_v29 }
  0x7b   : > { %552 = vst [vmem:[%s6791_s23 + $0x2f0] sm:$0xff] %v551_v30 }
  0x7c   : > { %554 = vst [vmem:[%s6791_s23 + $0x2f8] sm:$0xff] %v553_v31 }
  0x7d   : > { %556 = vst [vmem:[%s6791_s23 + $0x300] sm:$0xff] %v555_v32 }
  0x7e   : > { %558 = vst [vmem:[%s6791_s23 + $0x308] sm:$0xff] %v557_v33 }
  0x7f   : > { %560 = vst [vmem:[%s6791_s23 + $0x310] sm:$0xff] %v559_v34 }
  0x80   : > { %562 = vst [vmem:[%s6791_s23 + $0x318] sm:$0xff] %v561_v35 }
  0x81   : > { %564 = vst [vmem:[%s6791_s23 + $0x320] sm:$0xff] %v563_v36 }
  0x82   : > { %566 = vst [vmem:[%s6791_s23 + $0x328] sm:$0xff] %v565_v37 }
  0x83   : > { %568 = vst [vmem:[%s6791_s23 + $0x330] sm:$0xff] %v567_v38 }
  0x84   : > { %570 = vst [vmem:[%s6791_s23 + $0x338] sm:$0xff] %v569_v39 }
  0x85   : > { %572 = vst [vmem:[%s6791_s23 + $0x340] sm:$0xff] %v571_v40 }
  0x86   : > { %574 = vst [vmem:[%s6791_s23 + $0x348] sm:$0xff] %v573_v41 }
  0x87   : > { %576 = vst [vmem:[%s6791_s23 + $0x350] sm:$0xff] %v575_v42 }
  0x88   : > { %578 = vst [vmem:[%s6791_s23 + $0x358] sm:$0xff] %v577_v43 }
  0x89   : > { %580 = vst [vmem:[%s6791_s23 + $0x360] sm:$0xff] %v579_v44 }
  0x8a   : > { %582 = vst [vmem:[%s6791_s23 + $0x368] sm:$0xff] %v581_v45 }
  0x8b   : > { %584 = vst [vmem:[%s6791_s23 + $0x370] sm:$0xff] %v583_v46 }
  0x8c   : > { %586 = vst [vmem:[%s6791_s23 + $0x378] sm:$0xff] %v585_v47 }
  0x8d   : > { %588 = vst [vmem:[%s6791_s23 + $0x380] sm:$0xff] %v587_v48 }
  0x8e   : > { %590 = vst [vmem:[%s6791_s23 + $0x388] sm:$0xff] %v589_v49 }
  0x8f   : > { %592 = vst [vmem:[%s6791_s23 + $0x390] sm:$0xff] %v591_v50 }
  0x90   : > { %594 = vst [vmem:[%s6791_s23 + $0x398] sm:$0xff] %v593_v51 }
  0x91   : > { %596 = vst [vmem:[%s6791_s23 + $0x3a0] sm:$0xff] %v595_v52 }
  0x92   : > { %598 = vst [vmem:[%s6791_s23 + $0x3a8] sm:$0xff] %v597_v53 }
  0x93   : > { %600 = vst [vmem:[%s6791_s23 + $0x3b0] sm:$0xff] %v599_v54 }
  0x94   : > { %602 = vst [vmem:[%s6791_s23 + $0x3b8] sm:$0xff] %v601_v55 }
  0x95   : > { %604 = vst [vmem:[%s6791_s23 + $0x3c0] sm:$0xff] %v603_v56 }
  0x96   : > { %606 = vst [vmem:[%s6791_s23 + $0x3c8] sm:$0xff] %v605_v57 }
  0x97   : > { %608 = vst [vmem:[%s6791_s23 + $0x3d0] sm:$0xff] %v607_v58 }
  0x98   : > { %610 = vst [vmem:[%s6791_s23 + $0x3d8] sm:$0xff] %v609_v59 }
  0x99   : > { %612 = vst [vmem:[%s6791_s23 + $0x3e0] sm:$0xff] %v611_v60 }
  0x9a   : > { %614 = vst [vmem:[%s6791_s23 + $0x3e8] sm:$0xff] %v613_v61 }
  0x9b   : > { %616 = vst [vmem:[%s6791_s23 + $0x3f0] sm:$0xff] %v615_v62 }
  0x9c   : > { %618 = vst [vmem:[%s6791_s23 + $0x3f8] sm:$0xff] %v617_v63 }
  0x9d PF: > { %p4572_p7 = scmp.ge.s32.totalorder %s6665_s19, 1  ;;  %p623_p8 = scmp.lt.s32.totalorder %s6665_s19, 9 }
  0x9f   : > { %p624_p9 = pnand %p4572_p7, %p623_p8 }
  0xa0   : > { %s630_s20 = sand.u32 (!%p624_p9), 1, %s6641_s13   ;;  %s671_s24 = ssub.s32 (!%p624_p9), 1, %s6653_s16 }
  0xa1   : > { %627 = sbr.rel (%p624_p9) target bundleno = 1437 (0x59d), region = 79  ;;  %s4573_s25 = sshll.u32 (!%p624_p9), %s630_s20, 10 }
  0xa2   : > { %s672_s26 = smul.u32 (!%p624_p9), %s6649_s15, %s671_s24  ;;  %s7053_s29 = sshll.u32 (!%p624_p9), %s6649_s15, 11 }
  0xa3   : > { %s673_s28 = smul.u32 (!%p624_p9), 3, %s6653_s16  ;;  %p688_p10 = scmp.eq.s32.totalorder (!%p624_p9), %s6653_s16, 0 }
  0xa4   : > { %p689_p11 = scmp.eq.s32.totalorder (!%p624_p9), %s6649_s15, 0  ;;  %s7064_s13 = scalar_lea.vmem (!%p624_p9), [#allocation5], %s4573_s25 }
  0xa5   : > { %s674_s30 = sadd.s32 (!%p624_p9), %s673_s28, %s672_s26 }
  0xa6   : > { %s4574_s11 = sshll.u32 %s674_s30, 8  ;;  %p690_p13 = pnand %p689_p11, %p688_p10 }
  0xa7   : > { %p676_p12 = scmp.lt.s32.totalorder %s4574_s11, 1023 }
  0xa8   : > { %693 = sbr.rel (%p690_p13) target bundleno = 175 (0xaf), region = 87 }
  0xa9   : > { %s7892_s11 = smov (!%p676_p12, %s4574_s11), 1023 }
  0xaa   : > { %s4575_s12 = sshll.u32 %s7892_s11, 2 }
  0xab   : > { %s7062_s22 = scalar_lea.vmem %s7840_s2, %s4575_s12 }
  0xad   : > { %v6667_v0 = vmov 0.0  }
  0xae   : > { %694 = vst [vmem:[#allocation2] sm:$0xff] %v6667_v0 }
  0xaf PF: > { %p4577_p0 = scmp.ne.s32.totalorder %s6653_s16, 0 }
  0xb0   : > { %s698_s7 = sshra.s32 (!%p4577_p0), %s7053_s29, 7 }
  0xb1   : > { %697 = sbr.rel (%p4577_p0) target bundleno = 453 (0x1c5), region = 91  ;;  %s4578_s20 = sshll.u32 (!%p4577_p0), %s698_s7, 2 }
  0xb2   : > { %s7095_s26 = scalar_lea.vmem (!%p4577_p0), %s7838_s0, %s4578_s20 }
  0xb6   : > { %v6132_v1 = vld [vmem:[%s7062_s22 + $0x38] sm:$0xff]  ;;  %v6131_v5 = vld [vmem:[%s7062_s22 + $0x30] sm:$0xff]  ;;  %v6130_v9 = vld [vmem:[%s7062_s22 + $0x28] sm:$0xff] }
  0xb7   : > { %v6140_v2 = vld [vmem:[%s7062_s22 + $0x78] sm:$0xff]  ;;  %1791 = vmatpush.bf16.msra.mxu0 %v6132_v1  ;;  %v6139_v6 = vld [vmem:[%s7062_s22 + $0x70] sm:$0xff]  ;;  %v6138_v10 = vld [vmem:[%s7062_s22 + $0x68] sm:$0xff] }
  0xb8   : > { %v6148_v3 = vld [vmem:[%s7062_s22 + $0xb8] sm:$0xff]  ;;  %1804 = vmatpush.bf16.msra.mxu1 %v6140_v2  ;;  %v6147_v7 = vld [vmem:[%s7062_s22 + $0xb0] sm:$0xff]  ;;  %v6146_v11 = vld [vmem:[%s7062_s22 + $0xa8] sm:$0xff] }
  0xb9   : > { %v6156_v4 = vld [vmem:[%s7062_s22 + $0xf8] sm:$0xff]  ;;  %1817 = vmatpush.bf16.msra.mxu2 %v6148_v3  ;;  %v6155_v8 = vld [vmem:[%s7062_s22 + $0xf0] sm:$0xff]  ;;  %v6154_v12 = vld [vmem:[%s7062_s22 + $0xe8] sm:$0xff] }
  0xba   : > { %1830 = vmatpush.bf16.msra.mxu3 %v6156_v4  ;;  %v6129_v13 = vld [vmem:[%s7062_s22 + $0x20] sm:$0xff]  ;;  %v6128_v17 = vld [vmem:[%s7062_s22 + $0x18] sm:$0xff]  ;;  %v6127_v21 = vld [vmem:[%s7062_s22 + $0x10] sm:$0xff] }
  0xbb   : > { %1792 = vmatpush.bf16.msra.mxu0 %v6131_v5  ;;  %v6137_v14 = vld [vmem:[%s7062_s22 + $0x60] sm:$0xff]  ;;  %v6136_v18 = vld [vmem:[%s7062_s22 + $0x58] sm:$0xff]  ;;  %v6135_v22 = vld [vmem:[%s7062_s22 + $0x50] sm:$0xff] }
  0xbc   : > { %1805 = vmatpush.bf16.msra.mxu1 %v6139_v6  ;;  %v6145_v15 = vld [vmem:[%s7062_s22 + $0xa0] sm:$0xff]  ;;  %v6144_v19 = vld [vmem:[%s7062_s22 + $0x98] sm:$0xff]  ;;  %v6143_v23 = vld [vmem:[%s7062_s22 + $0x90] sm:$0xff] }
  0xbd   : > { %1818 = vmatpush.bf16.msra.mxu2 %v6147_v7  ;;  %v6153_v16 = vld [vmem:[%s7062_s22 + $0xe0] sm:$0xff]  ;;  %v6152_v20 = vld [vmem:[%s7062_s22 + $0xd8] sm:$0xff]  ;;  %v6151_v24 = vld [vmem:[%s7062_s22 + $0xd0] sm:$0xff] }
  0xbe   : > { %1831 = vmatpush.bf16.msra.mxu3 %v6155_v8  ;;  %v6126_v25 = vld [vmem:[%s7062_s22 + $0x8] sm:$0xff]  ;;  %v702_v30 = vld [vmem:[%s7095_s26] sm:$0xff]  ;;  %v6164_v39 = vld [vmem:[%s7062_s22 + $0x138] sm:$0xff] }
  0xbf   : > { %1793 = vmatpush.bf16.msra.mxu0 %v6130_v9  ;;  %v6134_v26 = vld [vmem:[%s7062_s22 + $0x48] sm:$0xff]  ;;  %v6125_v31 = vld [vmem:[%s7062_s22] sm:$0xff]  ;;  %v975_v34 = vunpack.c.l.b16 %v702_v30  ;;  %v976_v38 = vunpack.c.h.b16 %v702_v30  ;;  %v6172_v40 = vld [vmem:[%s7062_s22 + $0x178] sm:$0xff] }
  0xc0   : > { %1806 = vmatpush.bf16.msra.mxu1 %v6138_v10  ;;  %v6142_v27 = vld [vmem:[%s7062_s22 + $0x88] sm:$0xff]  ;;  %v6133_v32 = vld [vmem:[%s7062_s22 + $0x40] sm:$0xff]  ;;  %v6180_v41 = vld [vmem:[%s7062_s22 + $0x1b8] sm:$0xff] }
  0xc1   : > { %1819 = vmatpush.bf16.msra.mxu2 %v6146_v11  ;;  %v6150_v28 = vld [vmem:[%s7062_s22 + $0xc8] sm:$0xff]  ;;  %v6141_v35 = vld [vmem:[%s7062_s22 + $0x80] sm:$0xff]  ;;  %v6188_v42 = vld [vmem:[%s7062_s22 + $0x1f8] sm:$0xff]  ;;  %v991_v44 = vpack.c.b16 %v975_v34, %v975_v34  ;;  %v992_v46 = vpack.c.b16 %v976_v38, %v976_v38 }
  0xc2   : > { %1832 = vmatpush.bf16.msra.mxu3 %v6154_v12  ;;  %v703_v29 = vld [vmem:[%s7095_s26 + $0x8] sm:$0xff]  ;;  %v6149_v36 = vld [vmem:[%s7062_s22 + $0xc0] sm:$0xff]  ;;  %v6163_v47 = vld [vmem:[%s7062_s22 + $0x130] sm:$0xff] }
  0xc3   : > { %1794 = vmatpush.bf16.msra.mxu0 %v6129_v13  ;;  %v977_v33 = vunpack.c.l.b16 %v703_v29  ;;  %v978_v37 = vunpack.c.h.b16 %v703_v29  ;;  %v6171_v48 = vld [vmem:[%s7062_s22 + $0x170] sm:$0xff]  ;;  %v6162_v51 = vld [vmem:[%s7062_s22 + $0x128] sm:$0xff]  ;;  %v6161_v55 = vld [vmem:[%s7062_s22 + $0x120] sm:$0xff] }
  0xc4   : > { %1807 = vmatpush.bf16.msra.mxu1 %v6137_v14  ;;  %v6179_v49 = vld [vmem:[%s7062_s22 + $0x1b0] sm:$0xff]  ;;  %v6170_v52 = vld [vmem:[%s7062_s22 + $0x168] sm:$0xff]  ;;  %v6169_v56 = vld [vmem:[%s7062_s22 + $0x160] sm:$0xff] }
  0xc5   : > { %1820 = vmatpush.bf16.msra.mxu2 %v6145_v15  ;;  %v993_v43 = vpack.c.b16 %v977_v33, %v977_v33  ;;  %v994_v45 = vpack.c.b16 %v978_v37, %v978_v37  ;;  %v6187_v50 = vld [vmem:[%s7062_s22 + $0x1f0] sm:$0xff]  ;;  %v6178_v53 = vld [vmem:[%s7062_s22 + $0x1a8] sm:$0xff]  ;;  %v6177_v57 = vld [vmem:[%s7062_s22 + $0x1a0] sm:$0xff] }
  0xc6   : > { %1833 = vmatpush.bf16.msra.mxu3 %v6153_v16  ;;  %v6186_v54 = vld [vmem:[%s7062_s22 + $0x1e8] sm:$0xff]  ;;  %v6185_v58 = vld [vmem:[%s7062_s22 + $0x1e0] sm:$0xff]  ;;  %v6160_v59 = vld [vmem:[%s7062_s22 + $0x118] sm:$0xff] }
  0xc7   : > { %1795 = vmatpush.bf16.msra.mxu0 %v6128_v17  ;;  %v6168_v60 = vld [vmem:[%s7062_s22 + $0x158] sm:$0xff]  ;;  %v6159_v63 = vld [vmem:[%s7062_s22 + $0x110] sm:$0xff]  ;;  %v6158_v3 = vld [vmem:[%s7062_s22 + $0x108] sm:$0xff] }
  0xc8   : > { %1808 = vmatpush.bf16.msra.mxu1 %v6136_v18  ;;  %v6176_v61 = vld [vmem:[%s7062_s22 + $0x198] sm:$0xff]  ;;  %v6167_v0 = vld [vmem:[%s7062_s22 + $0x150] sm:$0xff]  ;;  %v6166_v4 = vld [vmem:[%s7062_s22 + $0x148] sm:$0xff] }
  0xc9   : > { %1821 = vmatpush.bf16.msra.mxu2 %v6144_v19  ;;  %v6184_v62 = vld [vmem:[%s7062_s22 + $0x1d8] sm:$0xff]  ;;  %v6175_v1 = vld [vmem:[%s7062_s22 + $0x190] sm:$0xff]  ;;  %v6174_v5 = vld [vmem:[%s7062_s22 + $0x188] sm:$0xff] }
  0xca   : > { %1834 = vmatpush.bf16.msra.mxu3 %v6152_v20  ;;  %v6183_v2 = vld [vmem:[%s7062_s22 + $0x1d0] sm:$0xff]  ;;  %v6182_v6 = vld [vmem:[%s7062_s22 + $0x1c8] sm:$0xff]  ;;  %v705_v7 = vld [vmem:[%s7095_s26 + $0x18] sm:$0xff] }
  0xcb   : > { %1796 = vmatpush.bf16.msra.mxu0 %v6127_v21  ;;  %v704_v8 = vld [vmem:[%s7095_s26 + $0x10] sm:$0xff]  ;;  %v6157_v9 = vld [vmem:[%s7062_s22 + $0x100] sm:$0xff]  ;;  %v981_v11 = vunpack.c.l.b16 %v705_v7  ;;  %v982_v15 = vunpack.c.h.b16 %v705_v7  ;;  %v6196_v17 = vld [vmem:[%s7062_s22 + $0x238] sm:$0xff] }
  0xcc   : > { %1809 = vmatpush.bf16.msra.mxu1 %v6135_v22  ;;  %v6165_v10 = vld [vmem:[%s7062_s22 + $0x140] sm:$0xff]  ;;  %v979_v12 = vunpack.c.l.b16 %v704_v8  ;;  %v980_v16 = vunpack.c.h.b16 %v704_v8  ;;  %v6204_v18 = vld [vmem:[%s7062_s22 + $0x278] sm:$0xff]  ;;  %v6194_v29 = vld [vmem:[%s7062_s22 + $0x228] sm:$0xff] }
  0xcd   : > { %1822 = vmatpush.bf16.msra.mxu2 %v6143_v23  ;;  %v6173_v13 = vld [vmem:[%s7062_s22 + $0x180] sm:$0xff]  ;;  %v6212_v19 = vld [vmem:[%s7062_s22 + $0x2b8] sm:$0xff]  ;;  %v997_v21 = vpack.c.b16 %v981_v11, %v981_v11  ;;  %v998_v23 = vpack.c.b16 %v982_v15, %v982_v15  ;;  %v6202_v30 = vld [vmem:[%s7062_s22 + $0x268] sm:$0xff] }
  0xce   : > { %1835 = vmatpush.bf16.msra.mxu3 %v6151_v24  ;;  %v6181_v14 = vld [vmem:[%s7062_s22 + $0x1c0] sm:$0xff]  ;;  %v6220_v20 = vld [vmem:[%s7062_s22 + $0x2f8] sm:$0xff]  ;;  %v995_v22 = vpack.c.b16 %v979_v12, %v979_v12  ;;  %v996_v24 = vpack.c.b16 %v980_v16, %v980_v16  ;;  %v6226_v7 = vld [vmem:[%s7062_s22 + $0x328] sm:$0xff] }
  0xcf   : > { %1797 = vmatpush.bf16.msra.mxu0 %v6126_v25  ;;  %v6195_v25 = vld [vmem:[%s7062_s22 + $0x230] sm:$0xff]  ;;  %v6193_v33 = vld [vmem:[%s7062_s22 + $0x220] sm:$0xff]  ;;  %v6192_v37 = vld [vmem:[%s7062_s22 + $0x218] sm:$0xff] }
  0xd0   : > { %1810 = vmatpush.bf16.msra.mxu1 %v6134_v26  ;;  %v6203_v26 = vld [vmem:[%s7062_s22 + $0x270] sm:$0xff]  ;;  %v6201_v34 = vld [vmem:[%s7062_s22 + $0x260] sm:$0xff]  ;;  %v6200_v38 = vld [vmem:[%s7062_s22 + $0x258] sm:$0xff] }
  0xd1   : > { %1823 = vmatpush.bf16.msra.mxu2 %v6142_v27  ;;  %v6211_v27 = vld [vmem:[%s7062_s22 + $0x2b0] sm:$0xff]  ;;  %v6234_v8 = vld [vmem:[%s7062_s22 + $0x368] sm:$0xff]  ;;  %v6225_v11 = vld [vmem:[%s7062_s22 + $0x320] sm:$0xff] }
  0xd2   : > { %1836 = vmatpush.bf16.msra.mxu3 %v6150_v28  ;;  %v6219_v28 = vld [vmem:[%s7062_s22 + $0x2f0] sm:$0xff]  ;;  %v6233_v12 = vld [vmem:[%s7062_s22 + $0x360] sm:$0xff]  ;;  %v6224_v15 = vld [vmem:[%s7062_s22 + $0x318] sm:$0xff] }
  0xd3   : > { %1798 = vmatpush.bf16.msra.mxu0 %v6125_v31  ;;  %v6210_v31 = vld [vmem:[%s7062_s22 + $0x2a8] sm:$0xff]  ;;  %v6232_v16 = vld [vmem:[%s7062_s22 + $0x358] sm:$0xff] }
  0xd4   : > { %1811 = vmatpush.bf16.msra.mxu1 %v6133_v32  ;;  %v6218_v32 = vld [vmem:[%s7062_s22 + $0x2e8] sm:$0xff] }
  0xd5   : > { %1824 = vmatpush.bf16.msra.mxu2 %v6141_v35  ;;  %v6209_v35 = vld [vmem:[%s7062_s22 + $0x2a0] sm:$0xff] }
  0xd6   : > { %1837 = vmatpush.bf16.msra.mxu3 %v6149_v36  ;;  %1799 = vmatmul.bf16.vlgmr.msra.gmra.mxu0 %v991_v44  ;;  %v6217_v36 = vld [vmem:[%s7062_s22 + $0x2e0] sm:$0xff]  ;;  %v6215_v44 = vld [vmem:[%s7062_s22 + $0x2d0] sm:$0xff] }
  0xd7   : > { %1843 = vmatpush.bf16.msrb.mxu0 %v6164_v39  ;;  %1812 = vmatmul.bf16.vlgmr.msra.gmra.mxu1 %v992_v46  ;;  %v6208_v39 = vld [vmem:[%s7062_s22 + $0x298] sm:$0xff]  ;;  %v6198_v46 = vld [vmem:[%s7062_s22 + $0x248] sm:$0xff] }
  0xd8   : > { %1856 = vmatpush.bf16.msrb.mxu1 %v6172_v40  ;;  %1825 = vmatmul.bf16.vlgmr.msra.gmra.mxu2 %v993_v43  ;;  %v6216_v40 = vld [vmem:[%s7062_s22 + $0x2d8] sm:$0xff]  ;;  %v6207_v43 = vld [vmem:[%s7062_s22 + $0x290] sm:$0xff] }
  0xd9   : > { %1869 = vmatpush.bf16.msrb.mxu2 %v6180_v41  ;;  %1838 = vmatmul.bf16.vlgmr.msra.gmra.mxu3 %v994_v45  ;;  %v6191_v41 = vld [vmem:[%s7062_s22 + $0x210] sm:$0xff]  ;;  %v6190_v45 = vld [vmem:[%s7062_s22 + $0x208] sm:$0xff] }
  0xda   : > { %1882 = vmatpush.bf16.msrb.mxu3 %v6188_v42  ;;  %v6199_v42 = vld [vmem:[%s7062_s22 + $0x250] sm:$0xff] }
  0xdb   : > { %1844 = vmatpush.bf16.msrb.mxu0 %v6163_v47  ;;  %v6206_v47 = vld [vmem:[%s7062_s22 + $0x288] sm:$0xff] }
  0xdc   : > { %1857 = vmatpush.bf16.msrb.mxu1 %v6171_v48  ;;  %v6214_v48 = vld [vmem:[%s7062_s22 + $0x2c8] sm:$0xff] }
  0xdd   : > { %1870 = vmatpush.bf16.msrb.mxu2 %v6179_v49  ;;  %v706_v49 = vld [vmem:[%s7095_s26 + $0x20] sm:$0xff] }
  0xde   : > { %1883 = vmatpush.bf16.msrb.mxu3 %v6187_v50  ;;  %v707_v50 = vld [vmem:[%s7095_s26 + $0x28] sm:$0xff] }
  0xdf   : > { %1845 = vmatpush.bf16.msrb.mxu0 %v6162_v51  ;;  %v6189_v51 = vld [vmem:[%s7062_s22 + $0x200] sm:$0xff] }
  0xe0   : > { %1858 = vmatpush.bf16.msrb.mxu1 %v6170_v52  ;;  %v6197_v52 = vld [vmem:[%s7062_s22 + $0x240] sm:$0xff] }
  0xe1   : > { %1871 = vmatpush.bf16.msrb.mxu2 %v6178_v53  ;;  %v983_v53 = vunpack.c.l.b16 %v706_v49 }
  0xe2   : > { %1884 = vmatpush.bf16.msrb.mxu3 %v6186_v54  ;;  %v985_v54 = vunpack.c.l.b16 %v707_v50 }
  0xe3   : > { %1846 = vmatpush.bf16.msrb.mxu0 %v6161_v55  ;;  %v6205_v55 = vld [vmem:[%s7062_s22 + $0x280] sm:$0xff] }
  0xe4   : > { %1859 = vmatpush.bf16.msrb.mxu1 %v6169_v56  ;;  %v6213_v56 = vld [vmem:[%s7062_s22 + $0x2c0] sm:$0xff] }
  0xe5   : > { %1872 = vmatpush.bf16.msrb.mxu2 %v6177_v57  ;;  %v984_v57 = vunpack.c.h.b16 %v706_v49 }
  0xe6   : > { %1885 = vmatpush.bf16.msrb.mxu3 %v6185_v58  ;;  %v986_v58 = vunpack.c.h.b16 %v707_v50 }
  0xe7   : > { %1847 = vmatpush.bf16.msrb.mxu0 %v6160_v59  ;;  %v6228_v59 = vld [vmem:[%s7062_s22 + $0x338] sm:$0xff] }
  0xe8   : > { %1860 = vmatpush.bf16.msrb.mxu1 %v6168_v60  ;;  %v6236_v60 = vld [vmem:[%s7062_s22 + $0x378] sm:$0xff] }
  0xe9   : > { %1873 = vmatpush.bf16.msrb.mxu2 %v6176_v61  ;;  %v6244_v61 = vld [vmem:[%s7062_s22 + $0x3b8] sm:$0xff] }
  0xea   : > { %1886 = vmatpush.bf16.msrb.mxu3 %v6184_v62  ;;  %v6252_v62 = vld [vmem:[%s7062_s22 + $0x3f8] sm:$0xff] }
  0xeb   : > { %1848 = vmatpush.bf16.msrb.mxu0 %v6159_v63  ;;  %v999_v63 = vpack.c.b16 %v983_v53, %v983_v53 }
  0xec   : > { %1861 = vmatpush.bf16.msrb.mxu1 %v6167_v0  ;;  %v1001_v0 = vpack.c.b16 %v985_v54, %v985_v54 }
  0xed   : > { %1874 = vmatpush.bf16.msrb.mxu2 %v6175_v1  ;;  %v1000_v1 = vpack.c.b16 %v984_v57, %v984_v57 }
  0xee   : > { %1887 = vmatpush.bf16.msrb.mxu3 %v6183_v2  ;;  %v1002_v2 = vpack.c.b16 %v986_v58, %v986_v58 }
  0xef   : > { %1849 = vmatpush.bf16.msrb.mxu0 %v6158_v3  ;;  %v6227_v3 = vld [vmem:[%s7062_s22 + $0x330] sm:$0xff] }
  0xf0   : > { %1862 = vmatpush.bf16.msrb.mxu1 %v6166_v4  ;;  %v6235_v4 = vld [vmem:[%s7062_s22 + $0x370] sm:$0xff] }
  0xf1   : > { %1875 = vmatpush.bf16.msrb.mxu2 %v6174_v5  ;;  %v6243_v5 = vld [vmem:[%s7062_s22 + $0x3b0] sm:$0xff] }
  0xf2   : > { %1888 = vmatpush.bf16.msrb.mxu3 %v6182_v6  ;;  %v6251_v6 = vld [vmem:[%s7062_s22 + $0x3f0] sm:$0xff] }
  0xf3   : > { %1850 = vmatpush.bf16.msrb.mxu0 %v6157_v9  ;;  %v6242_v9 = vld [vmem:[%s7062_s22 + $0x3a8] sm:$0xff] }
  0xf4   : > { %1863 = vmatpush.bf16.msrb.mxu1 %v6165_v10  ;;  %v6250_v10 = vld [vmem:[%s7062_s22 + $0x3e8] sm:$0xff] }
  0xf5   : > { %1876 = vmatpush.bf16.msrb.mxu2 %v6173_v13  ;;  %v6241_v13 = vld [vmem:[%s7062_s22 + $0x3a0] sm:$0xff] }
  0xf6   : > { %1889 = vmatpush.bf16.msrb.mxu3 %v6181_v14  ;;  %1851 = vmatmul.bf16.vlgmr.msrb.gmra.mxu0 %v995_v22  ;;  %v6249_v14 = vld [vmem:[%s7062_s22 + $0x3e0] sm:$0xff]  ;;  %v6247_v22 = vld [vmem:[%s7062_s22 + $0x3d0] sm:$0xff] }
  0xf7   : > { %1895 = vmatpush.bf16.msra.mxu0 %v6196_v17  ;;  %1864 = vmatmul.bf16.vlgmr.msrb.gmra.mxu1 %v996_v24  ;;  %v6240_v17 = vld [vmem:[%s7062_s22 + $0x398] sm:$0xff]  ;;  %v6230_v24 = vld [vmem:[%s7062_s22 + $0x348] sm:$0xff] }
  0xf8   : > { %1908 = vmatpush.bf16.msra.mxu1 %v6204_v18  ;;  %1877 = vmatmul.bf16.vlgmr.msrb.gmra.mxu2 %v997_v21  ;;  %v6248_v18 = vld [vmem:[%s7062_s22 + $0x3d8] sm:$0xff]  ;;  %v6239_v21 = vld [vmem:[%s7062_s22 + $0x390] sm:$0xff] }
  0xf9   : > { %1921 = vmatpush.bf16.msra.mxu2 %v6212_v19  ;;  %1890 = vmatmul.bf16.vlgmr.msrb.gmra.mxu3 %v998_v23  ;;  %v6223_v19 = vld [vmem:[%s7062_s22 + $0x310] sm:$0xff]  ;;  %v6222_v23 = vld [vmem:[%s7062_s22 + $0x308] sm:$0xff] }
  0xfa   : > { %1934 = vmatpush.bf16.msra.mxu3 %v6220_v20  ;;  %v6231_v20 = vld [vmem:[%s7062_s22 + $0x350] sm:$0xff] }
  0xfb   : > { %1896 = vmatpush.bf16.msra.mxu0 %v6195_v25  ;;  %v708_v25 = vld [vmem:[%s7095_s26 + $0x30] sm:$0xff] }
  0xfc   : > { %1909 = vmatpush.bf16.msra.mxu1 %v6203_v26  ;;  %v6238_v26 = vld [vmem:[%s7062_s22 + $0x388] sm:$0xff] }
  0xfd   : > { %1922 = vmatpush.bf16.msra.mxu2 %v6211_v27  ;;  %v6246_v27 = vld [vmem:[%s7062_s22 + $0x3c8] sm:$0xff] }
  0xfe   : > { %1935 = vmatpush.bf16.msra.mxu3 %v6219_v28  ;;  %v709_v28 = vld [vmem:[%s7095_s26 + $0x38] sm:$0xff] }
  0xff   : > { %1897 = vmatpush.bf16.msra.mxu0 %v6194_v29  ;;  %v987_v29 = vunpack.c.l.b16 %v708_v25 }
 0x100   : > { %1910 = vmatpush.bf16.msra.mxu1 %v6202_v30  ;;  %v988_v30 = vunpack.c.h.b16 %v708_v25 }
 0x101   : > { %1923 = vmatpush.bf16.msra.mxu2 %v6210_v31  ;;  %v6221_v31 = vld [vmem:[%s7062_s22 + $0x300] sm:$0xff] }
 0x102   : > { %1936 = vmatpush.bf16.msra.mxu3 %v6218_v32  ;;  %v6229_v32 = vld [vmem:[%s7062_s22 + $0x340] sm:$0xff] }
 0x103   : > { %1898 = vmatpush.bf16.msra.mxu0 %v6193_v33  ;;  %v989_v33 = vunpack.c.l.b16 %v709_v28 }
 0x104   : > { %1911 = vmatpush.bf16.msra.mxu1 %v6201_v34  ;;  %v990_v34 = vunpack.c.h.b16 %v709_v28 }
 0x105   : > { %1924 = vmatpush.bf16.msra.mxu2 %v6209_v35  ;;  %v6237_v35 = vld [vmem:[%s7062_s22 + $0x380] sm:$0xff] }
 0x106   : > { %1937 = vmatpush.bf16.msra.mxu3 %v6217_v36  ;;  %v6245_v36 = vld [vmem:[%s7062_s22 + $0x3c0] sm:$0xff] }
 0x107   : > { %1899 = vmatpush.bf16.msra.mxu0 %v6192_v37  ;;  %v1003_v37 = vpack.c.b16 %v987_v29, %v987_v29 }
 0x108   : > { %1912 = vmatpush.bf16.msra.mxu1 %v6200_v38  ;;  %v1004_v38 = vpack.c.b16 %v988_v30, %v988_v30 }
 0x109   : > { %1925 = vmatpush.bf16.msra.mxu2 %v6208_v39  ;;  %v1005_v39 = vpack.c.b16 %v989_v33, %v989_v33 }
 0x10a   : > { %1938 = vmatpush.bf16.msra.mxu3 %v6216_v40  ;;  %v1006_v40 = vpack.c.b16 %v990_v34, %v990_v34 }
 0x10b   : > { %1900 = vmatpush.bf16.msra.mxu0 %v6191_v41 }
 0x10c   : > { %1913 = vmatpush.bf16.msra.mxu1 %v6199_v42 }
 0x10d   : > { %1926 = vmatpush.bf16.msra.mxu2 %v6207_v43 }
 0x10e   : > { %1939 = vmatpush.bf16.msra.mxu3 %v6215_v44 }
 0x10f   : > { %1901 = vmatpush.bf16.msra.mxu0 %v6190_v45 }
 0x110   : > { %1914 = vmatpush.bf16.msra.mxu1 %v6198_v46 }
 0x111   : > { %1927 = vmatpush.bf16.msra.mxu2 %v6206_v47 }
 0x112   : > { %1940 = vmatpush.bf16.msra.mxu3 %v6214_v48 }
 0x113   : > { %1902 = vmatpush.bf16.msra.mxu0 %v6189_v51 }
 0x114   : > { %1915 = vmatpush.bf16.msra.mxu1 %v6197_v52 }
 0x115   : > { %1928 = vmatpush.bf16.msra.mxu2 %v6205_v55 }
 0x116   : > { %1941 = vmatpush.bf16.msra.mxu3 %v6213_v56  ;;  %1903 = vmatmul.bf16.vlgmr.msra.gmra.mxu0 %v999_v63 }
 0x117   : > { %1947 = vmatpush.bf16.msrb.mxu0 %v6228_v59  ;;  %1916 = vmatmul.bf16.vlgmr.msra.gmra.mxu1 %v1000_v1 }
 0x118   : > { %1960 = vmatpush.bf16.msrb.mxu1 %v6236_v60  ;;  %1929 = vmatmul.bf16.vlgmr.msra.gmra.mxu2 %v1001_v0 }
 0x119   : > { %1973 = vmatpush.bf16.msrb.mxu2 %v6244_v61  ;;  %1942 = vmatmul.bf16.vlgmr.msra.gmra.mxu3 %v1002_v2 }
 0x11a   : > { %1986 = vmatpush.bf16.msrb.mxu3 %v6252_v62 }
 0x11b   : > { %1948 = vmatpush.bf16.msrb.mxu0 %v6227_v3 }
 0x11c   : > { %1961 = vmatpush.bf16.msrb.mxu1 %v6235_v4 }
 0x11d   : > { %1974 = vmatpush.bf16.msrb.mxu2 %v6243_v5 }
 0x11e   : > { %1987 = vmatpush.bf16.msrb.mxu3 %v6251_v6 }
 0x11f   : > { %1949 = vmatpush.bf16.msrb.mxu0 %v6226_v7 }
 0x120   : > { %1962 = vmatpush.bf16.msrb.mxu1 %v6234_v8 }
 0x121   : > { %1975 = vmatpush.bf16.msrb.mxu2 %v6242_v9 }
 0x122   : > { %1988 = vmatpush.bf16.msrb.mxu3 %v6250_v10 }
 0x123   : > { %1950 = vmatpush.bf16.msrb.mxu0 %v6225_v11 }
 0x124   : > { %1963 = vmatpush.bf16.msrb.mxu1 %v6233_v12 }
 0x125   : > { %1976 = vmatpush.bf16.msrb.mxu2 %v6241_v13 }
 0x126   : > { %1989 = vmatpush.bf16.msrb.mxu3 %v6249_v14 }
 0x127   : > { %1951 = vmatpush.bf16.msrb.mxu0 %v6224_v15 }
 0x128   : > { %1964 = vmatpush.bf16.msrb.mxu1 %v6232_v16 }
 0x129   : > { %1977 = vmatpush.bf16.msrb.mxu2 %v6240_v17 }
 0x12a   : > { %1990 = vmatpush.bf16.msrb.mxu3 %v6248_v18 }
 0x12b   : > { %1952 = vmatpush.bf16.msrb.mxu0 %v6223_v19 }
 0x12c   : > { %1965 = vmatpush.bf16.msrb.mxu1 %v6231_v20 }
 0x12d   : > { %1978 = vmatpush.bf16.msrb.mxu2 %v6239_v21  ;;  %v710_v21 = vld [vmem:[#allocation2] sm:$0xff] }
 0x12e   : > { %1991 = vmatpush.bf16.msrb.mxu3 %v6247_v22 }
 0x12f   : > { %1953 = vmatpush.bf16.msrb.mxu0 %v6222_v23 }
 0x130   : > { %1966 = vmatpush.bf16.msrb.mxu1 %v6230_v24 }
 0x131   : > { %1979 = vmatpush.bf16.msrb.mxu2 %v6238_v26 }
 0x132   : > { %1992 = vmatpush.bf16.msrb.mxu3 %v6246_v27 }
 0x133   : > { %1954 = vmatpush.bf16.msrb.mxu0 %v6221_v31 }
 0x134   : > { %1967 = vmatpush.bf16.msrb.mxu1 %v6229_v32 }
 0x135   : > { %1980 = vmatpush.bf16.msrb.mxu2 %v6237_v35 }
 0x136   : > { %1993 = vmatpush.bf16.msrb.mxu3 %v6245_v36  ;;  %1955 = vmatmul.bf16.vlgmr.msrb.gmra.mxu0 %v1003_v37 }
 0x137   : > { %1968 = vmatmul.bf16.vlgmr.msrb.gmra.mxu1 %v1004_v38 }
 0x138   : > { %1981 = vmatmul.bf16.vlgmr.msrb.gmra.mxu2 %v1005_v39 }
 0x139   : > { %1994 = vmatmul.bf16.vlgmr.msrb.gmra.mxu3 %v1006_v40 }
 0x153   : > { %v1800_v41 = vpop.f32.mrf.mxu0 }
 0x154   : > { %v1813_v42 = vpop.f32.mrf.mxu1 }
 0x155   : > { %v1814_v43 = vadd.f32 %v1813_v42, %v1800_v41 }
 0x15b   : > { %v1826_v44 = vpop.f32.mrf.mxu2  ;;  %v1802_v47 = vpop.f32.mrf.mxu0 }
 0x15c   : > { %v1827_v45 = vadd.f32 %v1826_v44, %v1814_v43  ;;  %v1839_v46 = vpop.f32.mrf.mxu3  ;;  %v1815_v49 = vpop.f32.mrf.mxu1 }
 0x15e   : > { %v1840_v48 = vadd.f32 %v1839_v46, %v1827_v45 }
 0x163   : > { %v1828_v50 = vpop.f32.mrf.mxu2 }
 0x164   : > { %v1841_v51 = vpop.f32.mrf.mxu3 }
 0x173   : > { %v1852_v52 = vpop.f32.mrf.mxu0 }
 0x174   : > { %v1865_v53 = vpop.f32.mrf.mxu1  ;;  %v1853_v62 = vadd.f32 %v1852_v52, %v1840_v48 }
 0x176   : > { %v1866_v2 = vadd.f32 %v1865_v53, %v1853_v62 }
 0x17b   : > { %v1878_v54 = vpop.f32.mrf.mxu2  ;;  %v1854_v56 = vpop.f32.mrf.mxu0 }
 0x17c   : > { %v1891_v55 = vpop.f32.mrf.mxu3  ;;  %v1867_v57 = vpop.f32.mrf.mxu1  ;;  %v1879_v4 = vadd.f32 %v1878_v54, %v1866_v2 }
 0x17e   : > { %v1892_v7 = vadd.f32 %v1891_v55, %v1879_v4 }
 0x183   : > { %v1880_v58 = vpop.f32.mrf.mxu2 }
 0x184   : > { %v1893_v59 = vpop.f32.mrf.mxu3 }
 0x193   : > { %v1904_v60 = vpop.f32.mrf.mxu0 }
 0x194   : > { %v1917_v61 = vpop.f32.mrf.mxu1  ;;  %v1905_v8 = vadd.f32 %v1904_v60, %v1892_v7 }
 0x196   : > { %v1918_v9 = vadd.f32 %v1917_v61, %v1905_v8 }
 0x19b   : > { %v1930_v63 = vpop.f32.mrf.mxu2  ;;  %v1906_v1 = vpop.f32.mrf.mxu0 }
 0x19c   : > { %v1943_v0 = vpop.f32.mrf.mxu3  ;;  %v1919_v3 = vpop.f32.mrf.mxu1  ;;  %v1931_v10 = vadd.f32 %v1930_v63, %v1918_v9 }
 0x19e   : > { %v1944_v11 = vadd.f32 %v1943_v0, %v1931_v10 }
 0x1a3   : > { %v1932_v5 = vpop.f32.mrf.mxu2 }
 0x1a4   : > { %v1945_v6 = vpop.f32.mrf.mxu3 }
 0x1b3   : > { %v1956_v12 = vpop.f32.mrf.mxu0 }
 0x1b4   : > { %v1969_v13 = vpop.f32.mrf.mxu1  ;;  %v1957_v14 = vadd.f32 %v1956_v12, %v1944_v11 }
 0x1b6   : > { %v1970_v15 = vadd.f32 %v1969_v13, %v1957_v14 }
 0x1bb   : > { %v1982_v16 = vpop.f32.mrf.mxu2  ;;  %v1958_v19 = vpop.f32.mrf.mxu0 }
 0x1bc   : > { %v1995_v17 = vpop.f32.mrf.mxu3  ;;  %v1983_v18 = vadd.f32 %v1982_v16, %v1970_v15  ;;  %v1971_v20 = vpop.f32.mrf.mxu1 }
 0x1be   : > { %v1996_v22 = vadd.f32 %v1995_v17, %v1983_v18 }
 0x1c0   : > { %v1999_v23 = vadd.f32 %v1996_v22, %v710_v21 }
 0x1c2   : > { %2000 = vst [vmem:[#allocation2] sm:$0xff] %v1999_v23 }
 0x1c3   : > { %v1984_v24 = vpop.f32.mrf.mxu2 }
 0x1c4   : > { %v1997_v25 = vpop.f32.mrf.mxu3 }
 0x1c5 PF: > { %p2001_p1 = scmp.eq.s32.totalorder %s6649_s15, 3 }
 0x1c7   : > { %p2002_p2 = pnand %p2001_p1, %p688_p10 }
 0x1c9   : > { %2005 = sbr.rel (%p2002_p2) target bundleno = 757 (0x2f5), region = 95 }
 0x1ce   : > { %v2023_v26 = vld [vmem:[%s7841_s3 + $0x78] sm:$0xff]  ;;  %v2022_v27 = vld [vmem:[%s7841_s3 + $0x70] sm:$0xff]  ;;  %v2021_v28 = vld [vmem:[%s7841_s3 + $0x68] sm:$0xff]  ;;  %vm2061_vm0 = vcmask 523264   ;;  %vm2088_vm1 = vcmask 162816   ;;  %v6668_v56 = vmov 0.0  }
 0x1cf   : > { %2028 = vmatpush.msra.mxu0 %v2023_v26  ;;  %v2020_v29 = vld [vmem:[%s7841_s3 + $0x60] sm:$0xff]  ;;  %v2056_v30 = vld [vmem:[%s7843_s5 + $0x38] sm:$0xff]  ;;  %v2055_v32 = vld [vmem:[%s7843_s5 + $0x30] sm:$0xff]  ;;  %2089 = vst.msk [vmem:[#allocation4] sm:$0xff] %vm2088_vm1, %v6668_v56 }
 0x1d0   : > { %v2019_v31 = vld [vmem:[%s7841_s3 + $0x58] sm:$0xff]  ;;  %2073 = vmatpush.msra.mxu1 %v2056_v30  ;;  %v2054_v33 = vld [vmem:[%s7843_s5 + $0x28] sm:$0xff]  ;;  %v2018_v34 = vld [vmem:[%s7841_s3 + $0x50] sm:$0xff] }
 0x1d1   : > { %2029 = vmatpush.msra.mxu0 %v2022_v27  ;;  %v2053_v35 = vld [vmem:[%s7843_s5 + $0x20] sm:$0xff]  ;;  %v2017_v36 = vld [vmem:[%s7841_s3 + $0x48] sm:$0xff]  ;;  %v2052_v37 = vld [vmem:[%s7843_s5 + $0x18] sm:$0xff] }
 0x1d2   : > { %2074 = vmatpush.msra.mxu1 %v2055_v32  ;;  %v2016_v38 = vld [vmem:[%s7841_s3 + $0x40] sm:$0xff]  ;;  %v2015_v39 = vld [vmem:[%s7841_s3 + $0x38] sm:$0xff]  ;;  %v2014_v40 = vld [vmem:[%s7841_s3 + $0x30] sm:$0xff] }
 0x1d3   : > { %2030 = vmatpush.msra.mxu0 %v2021_v28  ;;  %v2013_v41 = vld [vmem:[%s7841_s3 + $0x28] sm:$0xff]  ;;  %v2012_v42 = vld [vmem:[%s7841_s3 + $0x20] sm:$0xff]  ;;  %v2011_v43 = vld [vmem:[%s7841_s3 + $0x18] sm:$0xff] }
 0x1d4   : > { %2075 = vmatpush.msra.mxu1 %v2054_v33  ;;  %v2010_v44 = vld [vmem:[%s7841_s3 + $0x10] sm:$0xff]  ;;  %v2006_v45 = vld [vmem:[#allocation2] sm:$0xff]  ;;  %v2009_v46 = vld [vmem:[%s7841_s3 + $0x8] sm:$0xff] }
 0x1d5   : > { %2031 = vmatpush.msra.mxu0 %v2020_v29  ;;  %v2008_v47 = vld [vmem:[%s7841_s3] sm:$0xff]  ;;  %v2007_v48 = vmax.f32 %v2006_v45, 0.0  ;;  %v2051_v49 = vld [vmem:[%s7843_s5 + $0x10] sm:$0xff]  ;;  %v2050_v50 = vld [vmem:[%s7843_s5 + $0x8] sm:$0xff] }
 0x1d6   : > { %2076 = vmatpush.msra.mxu1 %v2053_v35  ;;  %v2049_v51 = vld [vmem:[%s7843_s5] sm:$0xff] }
 0x1d7   : > { %2032 = vmatpush.msra.mxu0 %v2019_v31  ;;  %v6576_v52 = vld [vmem:[%s7842_s4] ss:$0 sm:$0xff] }
 0x1d8   : > { %2077 = vmatpush.msra.mxu1 %v2052_v37  ;;  %v6577_v57 = vld [vmem:[%s7844_s6] ss:$0 sm:$0xff] }
 0x1d9   : > { %2033 = vmatpush.msra.mxu0 %v2018_v34 }
 0x1da   : > { %2078 = vmatpush.msra.mxu1 %v2051_v49 }
 0x1db   : > { %2034 = vmatpush.msra.mxu0 %v2017_v36 }
 0x1dc   : > { %2079 = vmatpush.msra.mxu1 %v2050_v50 }
 0x1dd   : > { %2035 = vmatpush.msra.mxu0 %v2016_v38 }
 0x1de   : > { %2080 = vmatpush.msra.mxu1 %v2049_v51 }
 0x1df   : > { %2036 = vmatpush.msra.mxu0 %v2015_v39 }
 0x1e1   : > { %2037 = vmatpush.msra.mxu0 %v2014_v40 }
 0x1e3   : > { %2038 = vmatpush.msra.mxu0 %v2013_v41 }
 0x1e5   : > { %2039 = vmatpush.msra.mxu0 %v2012_v42 }
 0x1e7   : > { %2040 = vmatpush.msra.mxu0 %v2011_v43 }
 0x1e9   : > { %2041 = vmatpush.msra.mxu0 %v2010_v44 }
 0x1eb   : > { %2042 = vmatpush.msra.mxu0 %v2009_v46 }
 0x1ed   : > { %2043 = vmatpush.msra.mxu0 %v2008_v47 }
 0x1ee   : > { %2044 = vmatmul.f32.vlgmr.msra.gmra.mxu0 %v2007_v48 }
 0x26b   : > { %v2045_v53 = vpop.f32.mrf.mxu0 }
 0x26c   : > { %v2046_v54 = vadd.f32 %v6576_v52, %v2045_v53 }
 0x26e   : > { %v2048_v55 = vmax.f32 %v2046_v54, 0.0 }
 0x270   : > { %5091 = vmatmul.msk.f32.vlgmr.msra.gmra.mxu1 %vm2061_vm0, %v2048_v55 }
 0x2ed   : > { %v2082_v58 = vpop.f32.mrf.mxu1 }
 0x2ee   : > { %v2083_v59 = vadd.f32 %v6577_v57, %v2082_v58 }
 0x2f0   : > { %v2085_v60 = vmax.f32 %v2083_v59, 0.0 }
 0x2f2   : > { %v2086_v61 = vpack.c.bf16 %v2085_v60, %v2085_v60 }
 0x2f4   : > { %2087 = vst [vmem:[#allocation3] sm:$0xf] %v2086_v61 }
 0x2f5 PF: > { %p2090_p3 = scmp.eq.s32.totalorder %s6653_s16, 1  ;;  %p5092_p4 = scmp.ne.s32.totalorder %s6653_s16, 1 }
 0x2f6   : > { %s3149_s24 = sshra.s32 (!%p5092_p4), %s7053_s29, 3 }
 0x2f7   : > { %2093 = sbr.rel (%p5092_p4) target bundleno = 1176 (0x498), region = 99  ;;  %s5607_s25 = sshll.u32 (!%p5092_p4), %s3149_s24, 2 }
 0x2f8   : > { %s7568_s28 = scalar_lea.vmem (!%p5092_p4), %s7846_s8, %s5607_s25 }
 0x2fc   : > { %v5543_v62 = vld [vmem:[%s7064_s13 + $0x380] sm:$0xf]  ;;  %v6365_v0 = vld [vmem:[%s7064_s13 + $0x384] sm:$0xf]  ;;  %v5551_v3 = vld [vmem:[%s7064_s13 + $0x388] sm:$0xf] }
 0x2fd   : > { %v6373_v63 = vld [vmem:[%s7064_s13 + $0x3bc] sm:$0xf0]  ;;  %v5545_v2 = vld [vmem:[%s7064_s13 + $0x3c0] sm:$0xf0]  ;;  %v6374_v4 = vld [vmem:[%s7064_s13 + $0x3c4] sm:$0xf0] }
 0x2fe   : > { %v5544_v1 = vor.u32 %v6373_v63, %v5543_v62  ;;  %v5548_v5 = vor.u32 %v6365_v0, %v5545_v2  ;;  %v5552_v6 = vor.u32 %v6374_v4, %v5551_v3  ;;  %v6366_v7 = vld [vmem:[%s7064_s13 + $0x38c] sm:$0xf]  ;;  %v5479_v9 = vld [vmem:[%s7064_s13 + $0x300] sm:$0xf]  ;;  %v6349_v12 = vld [vmem:[%s7064_s13 + $0x304] sm:$0xf] }
 0x2ff   : > { %v5553_v8 = vld [vmem:[%s7064_s13 + $0x3c8] sm:$0xf0]  ;;  %v6357_v11 = vld [vmem:[%s7064_s13 + $0x33c] sm:$0xf0]  ;;  %v5481_v13 = vld [vmem:[%s7064_s13 + $0x340] sm:$0xf0] }
 0x300   : > { %2863 = vmatpush.bf16.msra.mxu0 %v5544_v1  ;;  %v5556_v10 = vor.u32 %v6366_v7, %v5553_v8  ;;  %2876 = vmatpush.bf16.msra.mxu1 %v5548_v5  ;;  %v5480_v14 = vor.u32 %v6357_v11, %v5479_v9  ;;  %v5484_v15 = vor.u32 %v6349_v12, %v5481_v13  ;;  %v5487_v16 = vld [vmem:[%s7064_s13 + $0x308] sm:$0xf]  ;;  %v6350_v18 = vld [vmem:[%s7064_s13 + $0x30c] sm:$0xf]  ;;  %v5415_v21 = vld [vmem:[%s7064_s13 + $0x280] sm:$0xf] }
 0x301   : > { %2889 = vmatpush.bf16.msra.mxu2 %v5552_v6  ;;  %v6358_v17 = vld [vmem:[%s7064_s13 + $0x344] sm:$0xf0]  ;;  %v5489_v20 = vld [vmem:[%s7064_s13 + $0x348] sm:$0xf0]  ;;  %v6341_v22 = vld [vmem:[%s7064_s13 + $0x2bc] sm:$0xf0] }
 0x302   : > { %2902 = vmatpush.bf16.msra.mxu3 %v5556_v10  ;;  %v5488_v19 = vor.u32 %v6358_v17, %v5487_v16  ;;  %v5492_v23 = vor.u32 %v6350_v18, %v5489_v20  ;;  %v6333_v24 = vld [vmem:[%s7064_s13 + $0x284] sm:$0xf]  ;;  %v5423_v26 = vld [vmem:[%s7064_s13 + $0x288] sm:$0xf]  ;;  %v5416_v27 = vor.u32 %v6341_v22, %v5415_v21  ;;  %v6334_v29 = vld [vmem:[%s7064_s13 + $0x28c] sm:$0xf] }
 0x303   : > { %v5417_v25 = vld [vmem:[%s7064_s13 + $0x2c0] sm:$0xf0]  ;;  %v6342_v28 = vld [vmem:[%s7064_s13 + $0x2c4] sm:$0xf0]  ;;  %v5425_v30 = vld [vmem:[%s7064_s13 + $0x2c8] sm:$0xf0] }
 0x304   : > { %2864 = vmatpush.bf16.msra.mxu0 %v5480_v14  ;;  %2877 = vmatpush.bf16.msra.mxu1 %v5484_v15  ;;  %v5420_v31 = vor.u32 %v6333_v24, %v5417_v25  ;;  %v5424_v32 = vor.u32 %v6342_v28, %v5423_v26  ;;  %v5351_v33 = vld [vmem:[%s7064_s13 + $0x200] sm:$0xf]  ;;  %v6317_v35 = vld [vmem:[%s7064_s13 + $0x204] sm:$0xf]  ;;  %v5428_v36 = vor.u32 %v6334_v29, %v5425_v30  ;;  %v5359_v38 = vld [vmem:[%s7064_s13 + $0x208] sm:$0xf] }
 0x305   : > { %2890 = vmatpush.bf16.msra.mxu2 %v5488_v19  ;;  %v6325_v34 = vld [vmem:[%s7064_s13 + $0x23c] sm:$0xf0]  ;;  %v5353_v37 = vld [vmem:[%s7064_s13 + $0x240] sm:$0xf0]  ;;  %v6326_v39 = vld [vmem:[%s7064_s13 + $0x244] sm:$0xf0] }
 0x306   : > { %2903 = vmatpush.bf16.msra.mxu3 %v5492_v23  ;;  %v6318_v40 = vld [vmem:[%s7064_s13 + $0x20c] sm:$0xf]  ;;  %v5352_v42 = vor.u32 %v6325_v34, %v5351_v33  ;;  %v5356_v43 = vor.u32 %v6317_v35, %v5353_v37  ;;  %v5360_v44 = vor.u32 %v6326_v39, %v5359_v38  ;;  %v5287_v45 = vld [vmem:[%s7064_s13 + $0x180] sm:$0xf]  ;;  %v6301_v47 = vld [vmem:[%s7064_s13 + $0x184] sm:$0xf] }
 0x307   : > { %v5361_v41 = vld [vmem:[%s7064_s13 + $0x248] sm:$0xf0]  ;;  %v6309_v46 = vld [vmem:[%s7064_s13 + $0x1bc] sm:$0xf0]  ;;  %v5289_v49 = vld [vmem:[%s7064_s13 + $0x1c0] sm:$0xf0] }
 0x308   : > { %2865 = vmatpush.bf16.msra.mxu0 %v5416_v27  ;;  %2878 = vmatpush.bf16.msra.mxu1 %v5420_v31  ;;  %v5364_v48 = vor.u32 %v6318_v40, %v5361_v41  ;;  %v5295_v50 = vld [vmem:[%s7064_s13 + $0x188] sm:$0xf]  ;;  %v6302_v52 = vld [vmem:[%s7064_s13 + $0x18c] sm:$0xf]  ;;  %v5288_v54 = vor.u32 %v6309_v46, %v5287_v45  ;;  %v5292_v55 = vor.u32 %v6301_v47, %v5289_v49  ;;  %v5223_v57 = vld [vmem:[%s7064_s13 + $0x100] sm:$0xf] }
 0x309   : > { %2891 = vmatpush.bf16.msra.mxu2 %v5424_v32  ;;  %v6310_v51 = vld [vmem:[%s7064_s13 + $0x1c4] sm:$0xf0]  ;;  %v5297_v53 = vld [vmem:[%s7064_s13 + $0x1c8] sm:$0xf0]  ;;  %v6293_v58 = vld [vmem:[%s7064_s13 + $0x13c] sm:$0xf0] }
 0x30a   : > { %2904 = vmatpush.bf16.msra.mxu3 %v5428_v36  ;;  %v5296_v56 = vor.u32 %v6310_v51, %v5295_v50  ;;  %v6285_v59 = vld [vmem:[%s7064_s13 + $0x104] sm:$0xf]  ;;  %v5300_v60 = vor.u32 %v6302_v52, %v5297_v53  ;;  %v5231_v62 = vld [vmem:[%s7064_s13 + $0x108] sm:$0xf]  ;;  %v6286_v0 = vld [vmem:[%s7064_s13 + $0x10c] sm:$0xf]  ;;  %v5224_v2 = vor.u32 %v6293_v58, %v5223_v57 }
 0x30b   : > { %v5225_v61 = vld [vmem:[%s7064_s13 + $0x140] sm:$0xf0]  ;;  %v6294_v63 = vld [vmem:[%s7064_s13 + $0x144] sm:$0xf0]  ;;  %v5233_v1 = vld [vmem:[%s7064_s13 + $0x148] sm:$0xf0] }
 0x30c   : > { %2866 = vmatpush.bf16.msra.mxu0 %v5352_v42  ;;  %2879 = vmatpush.bf16.msra.mxu1 %v5356_v43  ;;  %v5228_v3 = vor.u32 %v6285_v59, %v5225_v61  ;;  %v5232_v4 = vor.u32 %v6294_v63, %v5231_v62  ;;  %v5159_v5 = vld [vmem:[%s7064_s13 + $0x80] sm:$0xf]  ;;  %v6269_v7 = vld [vmem:[%s7064_s13 + $0x84] sm:$0xf]  ;;  %v5236_v8 = vor.u32 %v6286_v0, %v5233_v1  ;;  %v5167_v10 = vld [vmem:[%s7064_s13 + $0x88] sm:$0xf] }
 0x30d   : > { %2892 = vmatpush.bf16.msra.mxu2 %v5360_v44  ;;  %v6277_v6 = vld [vmem:[%s7064_s13 + $0xbc] sm:$0xf0]  ;;  %v5161_v9 = vld [vmem:[%s7064_s13 + $0xc0] sm:$0xf0]  ;;  %v6278_v11 = vld [vmem:[%s7064_s13 + $0xc4] sm:$0xf0] }
 0x30e   : > { %2905 = vmatpush.bf16.msra.mxu3 %v5364_v48  ;;  %v6270_v12 = vld [vmem:[%s7064_s13 + $0x8c] sm:$0xf]  ;;  %v5160_v14 = vor.u32 %v6277_v6, %v5159_v5  ;;  %v5095_v15 = vld [vmem:[%s7064_s13] sm:$0xf]  ;;  %v5164_v17 = vor.u32 %v6269_v7, %v5161_v9  ;;  %v5168_v18 = vor.u32 %v6278_v11, %v5167_v10  ;;  %v6253_v19 = vld [vmem:[%s7064_s13 + $0x4] sm:$0xf] }
 0x30f   : > { %v5169_v13 = vld [vmem:[%s7064_s13 + $0xc8] sm:$0xf0]  ;;  %v6261_v16 = vld [vmem:[%s7064_s13 + $0x3c] sm:$0xf0]  ;;  %v5097_v20 = vld [vmem:[%s7064_s13 + $0x40] sm:$0xf0] }
 0x310   : > { %2867 = vmatpush.bf16.msra.mxu0 %v5288_v54  ;;  %2880 = vmatpush.bf16.msra.mxu1 %v5292_v55  ;;  %v5103_v21 = vld [vmem:[%s7064_s13 + $0x8] sm:$0xf]  ;;  %v5172_v22 = vor.u32 %v6270_v12, %v5169_v13  ;;  %v6254_v24 = vld [vmem:[%s7064_s13 + $0xc] sm:$0xf]  ;;  %v5559_v26 = vld [vmem:[%s7064_s13 + $0x390] sm:$0xf]  ;;  %v5096_v29 = vor.u32 %v6261_v16, %v5095_v15  ;;  %v5100_v33 = vor.u32 %v6253_v19, %v5097_v20 }
 0x311   : > { %2893 = vmatpush.bf16.msra.mxu2 %v5296_v56  ;;  %v6262_v23 = vld [vmem:[%s7064_s13 + $0x44] sm:$0xf0]  ;;  %v5105_v25 = vld [vmem:[%s7064_s13 + $0x48] sm:$0xf0]  ;;  %v6375_v27 = vld [vmem:[%s7064_s13 + $0x3cc] sm:$0xf0] }
 0x312   : > { %2906 = vmatpush.bf16.msra.mxu3 %v5300_v60  ;;  %v6367_v28 = vld [vmem:[%s7064_s13 + $0x394] sm:$0xf]  ;;  %v5567_v31 = vld [vmem:[%s7064_s13 + $0x398] sm:$0xf]  ;;  %v5104_v34 = vor.u32 %v6262_v23, %v5103_v21  ;;  %v6368_v35 = vld [vmem:[%s7064_s13 + $0x39c] sm:$0xf]  ;;  %v5108_v37 = vor.u32 %v6254_v24, %v5105_v25  ;;  %v5560_v38 = vor.u32 %v6375_v27, %v5559_v26 }
 0x313   : > { %v5561_v30 = vld [vmem:[%s7064_s13 + $0x3d0] sm:$0xf0]  ;;  %v6376_v32 = vld [vmem:[%s7064_s13 + $0x3d4] sm:$0xf0]  ;;  %v5569_v36 = vld [vmem:[%s7064_s13 + $0x3d8] sm:$0xf0] }
 0x314   : > { %2868 = vmatpush.bf16.msra.mxu0 %v5224_v2  ;;  %2881 = vmatpush.bf16.msra.mxu1 %v5228_v3  ;;  %v5564_v39 = vor.u32 %v6367_v28, %v5561_v30  ;;  %v5568_v40 = vor.u32 %v6376_v32, %v5567_v31  ;;  %v5495_v41 = vld [vmem:[%s7064_s13 + $0x310] sm:$0xf]  ;;  %v6351_v43 = vld [vmem:[%s7064_s13 + $0x314] sm:$0xf]  ;;  %v5572_v44 = vor.u32 %v6368_v35, %v5569_v36  ;;  %v5503_v46 = vld [vmem:[%s7064_s13 + $0x318] sm:$0xf] }
 0x315   : > { %2894 = vmatpush.bf16.msra.mxu2 %v5232_v4  ;;  %v6359_v42 = vld [vmem:[%s7064_s13 + $0x34c] sm:$0xf0]  ;;  %v5497_v45 = vld [vmem:[%s7064_s13 + $0x350] sm:$0xf0]  ;;  %v6360_v47 = vld [vmem:[%s7064_s13 + $0x354] sm:$0xf0] }
 0x316   : > { %2907 = vmatpush.bf16.msra.mxu3 %v5236_v8  ;;  %v6352_v48 = vld [vmem:[%s7064_s13 + $0x31c] sm:$0xf]  ;;  %v5496_v50 = vor.u32 %v6359_v42, %v5495_v41  ;;  %v5431_v51 = vld [vmem:[%s7064_s13 + $0x290] sm:$0xf]  ;;  %v5500_v52 = vor.u32 %v6351_v43, %v5497_v45  ;;  %v5504_v53 = vor.u32 %v6360_v47, %v5503_v46  ;;  %v6335_v55 = vld [vmem:[%s7064_s13 + $0x294] sm:$0xf] }
 0x317   : > { %v5505_v49 = vld [vmem:[%s7064_s13 + $0x358] sm:$0xf0]  ;;  %v6343_v54 = vld [vmem:[%s7064_s13 + $0x2cc] sm:$0xf0]  ;;  %v7377_v56 = vld [vmem:[#allocation3] sm:$0xf] }
 0x318   : > { %2869 = vmatpush.bf16.msra.mxu0 %v5160_v14  ;;  %2882 = vmatpush.bf16.msra.mxu1 %v5164_v17  ;;  %v5508_v57 = vor.u32 %v6352_v48, %v5505_v49  ;;  %v5433_v58 = vld [vmem:[%s7064_s13 + $0x2d0] sm:$0xf0]  ;;  %v5439_v59 = vld [vmem:[%s7064_s13 + $0x298] sm:$0xf]  ;;  %v6336_v61 = vld [vmem:[%s7064_s13 + $0x29c] sm:$0xf]  ;;  %v5432_v63 = vor.u32 %v6343_v54, %v5431_v51 }
 0x319   : > { %2895 = vmatpush.bf16.msra.mxu2 %v5168_v18  ;;  %v6344_v60 = vld [vmem:[%s7064_s13 + $0x2d4] sm:$0xf0]  ;;  %v5441_v62 = vld [vmem:[%s7064_s13 + $0x2d8] sm:$0xf0]  ;;  %v5436_v0 = vor.u32 %v6335_v55, %v5433_v58  ;;  %v5367_v2 = vld [vmem:[%s7064_s13 + $0x210] sm:$0xf] }
 0x31a   : > { %2908 = vmatpush.bf16.msra.mxu3 %v5172_v22  ;;  %v5440_v1 = vor.u32 %v6344_v60, %v5439_v59  ;;  %v6327_v3 = vld [vmem:[%s7064_s13 + $0x24c] sm:$0xf0]  ;;  %v6319_v4 = vld [vmem:[%s7064_s13 + $0x214] sm:$0xf]  ;;  %v5444_v5 = vor.u32 %v6336_v61, %v5441_v62  ;;  %v5375_v7 = vld [vmem:[%s7064_s13 + $0x218] sm:$0xf] }
 0x31b   : > { %v5369_v6 = vld [vmem:[%s7064_s13 + $0x250] sm:$0xf0]  ;;  %v6328_v8 = vld [vmem:[%s7064_s13 + $0x254] sm:$0xf0]  ;;  %v6320_v9 = vld [vmem:[%s7064_s13 + $0x21c] sm:$0xf]  ;;  %v5368_v11 = vor.u32 %v6327_v3, %v5367_v2 }
 0x31c   : > { %2870 = vmatpush.bf16.msra.mxu0 %v5096_v29  ;;  %2883 = vmatpush.bf16.msra.mxu1 %v5100_v33  ;;  %v5377_v10 = vld [vmem:[%s7064_s13 + $0x258] sm:$0xf0]  ;;  %v5372_v12 = vor.u32 %v6319_v4, %v5369_v6  ;;  %v5376_v13 = vor.u32 %v6328_v8, %v5375_v7  ;;  %v5303_v14 = vld [vmem:[%s7064_s13 + $0x190] sm:$0xf]  ;;  %v6303_v16 = vld [vmem:[%s7064_s13 + $0x194] sm:$0xf] }
 0x31d   : > { %2896 = vmatpush.bf16.msra.mxu2 %v5104_v34  ;;  %v6311_v15 = vld [vmem:[%s7064_s13 + $0x1cc] sm:$0xf0]  ;;  %v5380_v17 = vor.u32 %v6320_v9, %v5377_v10  ;;  %v5305_v18 = vld [vmem:[%s7064_s13 + $0x1d0] sm:$0xf0]  ;;  %v5311_v19 = vld [vmem:[%s7064_s13 + $0x198] sm:$0xf] }
 0x31e   : > { %2909 = vmatpush.bf16.msra.mxu3 %v5108_v37  ;;  %v6312_v20 = vld [vmem:[%s7064_s13 + $0x1d4] sm:$0xf0]  ;;  %v6304_v21 = vld [vmem:[%s7064_s13 + $0x19c] sm:$0xf]  ;;  %v5304_v23 = vor.u32 %v6311_v15, %v5303_v14  ;;  %v5308_v24 = vor.u32 %v6303_v16, %v5305_v18  ;;  %v5239_v26 = vld [vmem:[%s7064_s13 + $0x110] sm:$0xf] }
 0x31f   : > { %2871 = vmatmul.bf16.vlgmr.msra.gmra.mxu0 %v7377_v56  ;;  %2884 = vmatmul.bf16.vlgmr.msra.gmra.mxu1 %v7377_v56  ;;  %v5313_v22 = vld [vmem:[%s7064_s13 + $0x1d8] sm:$0xf0]  ;;  %v5312_v25 = vor.u32 %v6312_v20, %v5311_v19  ;;  %v6295_v27 = vld [vmem:[%s7064_s13 + $0x14c] sm:$0xf0]  ;;  %v6287_v28 = vld [vmem:[%s7064_s13 + $0x114] sm:$0xf] }
 0x320   : > { %2915 = vmatpush.bf16.msrb.mxu0 %v5560_v38  ;;  %2928 = vmatpush.bf16.msrb.mxu1 %v5564_v39  ;;  %v5316_v29 = vor.u32 %v6304_v21, %v5313_v22  ;;  %v5241_v30 = vld [vmem:[%s7064_s13 + $0x150] sm:$0xf0]  ;;  %v5247_v31 = vld [vmem:[%s7064_s13 + $0x118] sm:$0xf]  ;;  %v6288_v33 = vld [vmem:[%s7064_s13 + $0x11c] sm:$0xf]  ;;  %v5240_v35 = vor.u32 %v6295_v27, %v5239_v26 }
 0x321   : > { %2941 = vmatpush.bf16.msrb.mxu2 %v5568_v40  ;;  %2910 = vmatmul.bf16.vlgmr.msra.gmra.mxu3 %v7377_v56  ;;  %v6296_v32 = vld [vmem:[%s7064_s13 + $0x154] sm:$0xf0]  ;;  %v5249_v34 = vld [vmem:[%s7064_s13 + $0x158] sm:$0xf0]  ;;  %v5244_v36 = vor.u32 %v6287_v28, %v5241_v30  ;;  %v5175_v38 = vld [vmem:[%s7064_s13 + $0x90] sm:$0xf] }
 0x322   : > { %2954 = vmatpush.bf16.msrb.mxu3 %v5572_v44  ;;  %2897 = vmatmul.bf16.vlgmr.msra.gmra.mxu2 %v7377_v56  ;;  %v5248_v37 = vor.u32 %v6296_v32, %v5247_v31  ;;  %v6279_v39 = vld [vmem:[%s7064_s13 + $0xcc] sm:$0xf0]  ;;  %v6271_v40 = vld [vmem:[%s7064_s13 + $0x94] sm:$0xf]  ;;  %v5252_v41 = vor.u32 %v6288_v33, %v5249_v34  ;;  %v5183_v43 = vld [vmem:[%s7064_s13 + $0x98] sm:$0xf] }
 0x323   : > { %v5177_v42 = vld [vmem:[%s7064_s13 + $0xd0] sm:$0xf0]  ;;  %v6280_v44 = vld [vmem:[%s7064_s13 + $0xd4] sm:$0xf0]  ;;  %v6272_v45 = vld [vmem:[%s7064_s13 + $0x9c] sm:$0xf]  ;;  %v5176_v47 = vor.u32 %v6279_v39, %v5175_v38 }
 0x324   : > { %2916 = vmatpush.bf16.msrb.mxu0 %v5496_v50  ;;  %2929 = vmatpush.bf16.msrb.mxu1 %v5500_v52  ;;  %v5185_v46 = vld [vmem:[%s7064_s13 + $0xd8] sm:$0xf0]  ;;  %v5111_v48 = vld [vmem:[%s7064_s13 + $0x10] sm:$0xf]  ;;  %v5180_v50 = vor.u32 %v6271_v40, %v5177_v42  ;;  %v5184_v51 = vor.u32 %v6280_v44, %v5183_v43  ;;  %v6255_v52 = vld [vmem:[%s7064_s13 + $0x14] sm:$0xf] }
 0x325   : > { %2942 = vmatpush.bf16.msrb.mxu2 %v5504_v53  ;;  %v6263_v49 = vld [vmem:[%s7064_s13 + $0x4c] sm:$0xf0]  ;;  %v5113_v53 = vld [vmem:[%s7064_s13 + $0x50] sm:$0xf0]  ;;  %v5119_v54 = vld [vmem:[%s7064_s13 + $0x18] sm:$0xf]  ;;  %v5188_v55 = vor.u32 %v6272_v45, %v5185_v46 }
 0x326   : > { %2955 = vmatpush.bf16.msrb.mxu3 %v5508_v57  ;;  %v6264_v57 = vld [vmem:[%s7064_s13 + $0x54] sm:$0xf0]  ;;  %v6256_v58 = vld [vmem:[%s7064_s13 + $0x1c] sm:$0xf]  ;;  %v5575_v60 = vld [vmem:[%s7064_s13 + $0x3a0] sm:$0xf]  ;;  %v5116_v3 = vor.u32 %v6255_v52, %v5113_v53 }
 0x327   : > { %v5121_v59 = vld [vmem:[%s7064_s13 + $0x58] sm:$0xf0]  ;;  %v6377_v61 = vld [vmem:[%s7064_s13 + $0x3dc] sm:$0xf0]  ;;  %v6369_v62 = vld [vmem:[%s7064_s13 + $0x3a4] sm:$0xf]  ;;  %v5120_v4 = vor.u32 %v6264_v57, %v5119_v54 }
 0x328   : > { %2917 = vmatpush.bf16.msrb.mxu0 %v5432_v63  ;;  %2930 = vmatpush.bf16.msrb.mxu1 %v5436_v0  ;;  %v5112_v63 = vor.u32 %v6263_v49, %v5111_v48  ;;  %v5577_v0 = vld [vmem:[%s7064_s13 + $0x3e0] sm:$0xf0]  ;;  %v6378_v2 = vld [vmem:[%s7064_s13 + $0x3e4] sm:$0xf0]  ;;  %v5585_v6 = vld [vmem:[%s7064_s13 + $0x3e8] sm:$0xf0]  ;;  %v5124_v7 = vor.u32 %v6256_v58, %v5121_v59  ;;  %v5576_v8 = vor.u32 %v6377_v61, %v5575_v60 }
 0x329   : > { %2943 = vmatpush.bf16.msrb.mxu2 %v5440_v1  ;;  %v5583_v1 = vld [vmem:[%s7064_s13 + $0x3a8] sm:$0xf]  ;;  %v5580_v9 = vor.u32 %v6369_v62, %v5577_v0  ;;  %v5513_v15 = vld [vmem:[%s7064_s13 + $0x360] sm:$0xf0]  ;;  %v6354_v18 = vld [vmem:[%s7064_s13 + $0x32c] sm:$0xf] }
 0x32a   : > { %2956 = vmatpush.bf16.msrb.mxu3 %v5444_v5  ;;  %v6370_v5 = vld [vmem:[%s7064_s13 + $0x3ac] sm:$0xf]  ;;  %v5584_v10 = vor.u32 %v6378_v2, %v5583_v1  ;;  %v5519_v16 = vld [vmem:[%s7064_s13 + $0x328] sm:$0xf]  ;;  %v5449_v27 = vld [vmem:[%s7064_s13 + $0x2e0] sm:$0xf0] }
 0x32b   : > { %v5588_v14 = vor.u32 %v6370_v5, %v5585_v6  ;;  %v5521_v19 = vld [vmem:[%s7064_s13 + $0x368] sm:$0xf0]  ;;  %v5455_v28 = vld [vmem:[%s7064_s13 + $0x2a8] sm:$0xf]  ;;  %v5385_v39 = vld [vmem:[%s7064_s13 + $0x260] sm:$0xf0] }
 0x32c   : > { %2918 = vmatpush.bf16.msrb.mxu0 %v5368_v11  ;;  %2931 = vmatpush.bf16.msrb.mxu1 %v5372_v12  ;;  %v5511_v11 = vld [vmem:[%s7064_s13 + $0x320] sm:$0xf]  ;;  %v5524_v26 = vor.u32 %v6354_v18, %v5521_v19  ;;  %v6338_v30 = vld [vmem:[%s7064_s13 + $0x2ac] sm:$0xf]  ;;  %v5391_v40 = vld [vmem:[%s7064_s13 + $0x228] sm:$0xf] }
 0x32d   : > { %2944 = vmatpush.bf16.msrb.mxu2 %v5376_v13  ;;  %v6361_v12 = vld [vmem:[%s7064_s13 + $0x35c] sm:$0xf0]  ;;  %v6353_v13 = vld [vmem:[%s7064_s13 + $0x324] sm:$0xf]  ;;  %v5457_v31 = vld [vmem:[%s7064_s13 + $0x2e8] sm:$0xf0] }
 0x32e   : > { %2957 = vmatpush.bf16.msrb.mxu3 %v5380_v17  ;;  %v6362_v17 = vld [vmem:[%s7064_s13 + $0x364] sm:$0xf0]  ;;  %v5512_v20 = vor.u32 %v6361_v12, %v5511_v11  ;;  %v5516_v21 = vor.u32 %v6353_v13, %v5513_v15  ;;  %v5460_v38 = vor.u32 %v6338_v30, %v5457_v31  ;;  %v6322_v42 = vld [vmem:[%s7064_s13 + $0x22c] sm:$0xf]  ;;  %v6313_v48 = vld [vmem:[%s7064_s13 + $0x1dc] sm:$0xf0] }
 0x32f   : > { %v5520_v22 = vor.u32 %v6362_v17, %v5519_v16  ;;  %v5393_v43 = vld [vmem:[%s7064_s13 + $0x268] sm:$0xf0]  ;;  %v6305_v49 = vld [vmem:[%s7064_s13 + $0x1a4] sm:$0xf]  ;;  %v5327_v52 = vld [vmem:[%s7064_s13 + $0x1a8] sm:$0xf] }
 0x330   : > { %2919 = vmatpush.bf16.msrb.mxu0 %v5304_v23  ;;  %2932 = vmatpush.bf16.msrb.mxu1 %v5308_v24  ;;  %v5447_v23 = vld [vmem:[%s7064_s13 + $0x2a0] sm:$0xf]  ;;  %v6314_v53 = vld [vmem:[%s7064_s13 + $0x1e4] sm:$0xf0]  ;;  %v6306_v54 = vld [vmem:[%s7064_s13 + $0x1ac] sm:$0xf] }
 0x331   : > { %2945 = vmatpush.bf16.msrb.mxu2 %v5312_v25  ;;  %v6345_v24 = vld [vmem:[%s7064_s13 + $0x2dc] sm:$0xf0]  ;;  %v6337_v25 = vld [vmem:[%s7064_s13 + $0x2a4] sm:$0xf]  ;;  %v5328_v59 = vor.u32 %v6314_v53, %v5327_v52  ;;  %v5263_v1 = vld [vmem:[%s7064_s13 + $0x128] sm:$0xf] }
 0x332   : > { %2958 = vmatpush.bf16.msrb.mxu3 %v5316_v29  ;;  %v6346_v29 = vld [vmem:[%s7064_s13 + $0x2e4] sm:$0xf0]  ;;  %v5448_v32 = vor.u32 %v6345_v24, %v5447_v23  ;;  %v5452_v33 = vor.u32 %v6337_v25, %v5449_v27  ;;  %v5255_v60 = vld [vmem:[%s7064_s13 + $0x120] sm:$0xf]  ;;  %v6289_v62 = vld [vmem:[%s7064_s13 + $0x124] sm:$0xf] }
 0x333   : > { %v5456_v34 = vor.u32 %v6346_v29, %v5455_v28  ;;  %v6297_v61 = vld [vmem:[%s7064_s13 + $0x15c] sm:$0xf0]  ;;  %v5257_v0 = vld [vmem:[%s7064_s13 + $0x160] sm:$0xf0]  ;;  %v6298_v2 = vld [vmem:[%s7064_s13 + $0x164] sm:$0xf0] }
 0x334   : > { %2920 = vmatpush.bf16.msrb.mxu0 %v5240_v35  ;;  %2933 = vmatpush.bf16.msrb.mxu1 %v5244_v36  ;;  %v5383_v35 = vld [vmem:[%s7064_s13 + $0x220] sm:$0xf]  ;;  %v5256_v5 = vor.u32 %v6297_v61, %v5255_v60  ;;  %v5260_v6 = vor.u32 %v6289_v62, %v5257_v0  ;;  %v5193_v12 = vld [vmem:[%s7064_s13 + $0xe0] sm:$0xf0]  ;;  %v5199_v13 = vld [vmem:[%s7064_s13 + $0xa8] sm:$0xf] }
 0x335   : > { %2946 = vmatpush.bf16.msrb.mxu2 %v5248_v37  ;;  %v6329_v36 = vld [vmem:[%s7064_s13 + $0x25c] sm:$0xf0]  ;;  %v6321_v37 = vld [vmem:[%s7064_s13 + $0x224] sm:$0xf]  ;;  %v6274_v15 = vld [vmem:[%s7064_s13 + $0xac] sm:$0xf] }
 0x336   : > { %2959 = vmatpush.bf16.msrb.mxu3 %v5252_v41  ;;  %v6330_v41 = vld [vmem:[%s7064_s13 + $0x264] sm:$0xf0]  ;;  %v5384_v44 = vor.u32 %v6329_v36, %v5383_v35  ;;  %v5388_v45 = vor.u32 %v6321_v37, %v5385_v39  ;;  %v5201_v16 = vld [vmem:[%s7064_s13 + $0xe8] sm:$0xf0]  ;;  %v5127_v18 = vld [vmem:[%s7064_s13 + $0x20] sm:$0xf] }
 0x337   : > { %v5392_v46 = vor.u32 %v6330_v41, %v5391_v40  ;;  %v6265_v19 = vld [vmem:[%s7064_s13 + $0x5c] sm:$0xf0]  ;;  %v5129_v23 = vld [vmem:[%s7064_s13 + $0x60] sm:$0xf0]  ;;  %v5135_v24 = vld [vmem:[%s7064_s13 + $0x28] sm:$0xf]  ;;  %v5204_v25 = vor.u32 %v6274_v15, %v5201_v16 }
 0x338   : > { %2921 = vmatpush.bf16.msrb.mxu0 %v5176_v47  ;;  %2934 = vmatpush.bf16.msrb.mxu1 %v5180_v50  ;;  %v5319_v47 = vld [vmem:[%s7064_s13 + $0x1a0] sm:$0xf]  ;;  %v5396_v50 = vor.u32 %v6322_v42, %v5393_v43  ;;  %v6258_v27 = vld [vmem:[%s7064_s13 + $0x2c] sm:$0xf]  ;;  %v5591_v29 = vld [vmem:[%s7064_s13 + $0x3b0] sm:$0xf] }
 0x339   : > { %2947 = vmatpush.bf16.msrb.mxu2 %v5184_v51  ;;  %v5321_v51 = vld [vmem:[%s7064_s13 + $0x1e0] sm:$0xf0]  ;;  %v5320_v57 = vor.u32 %v6313_v48, %v5319_v47  ;;  %v5137_v28 = vld [vmem:[%s7064_s13 + $0x68] sm:$0xf0]  ;;  %v6379_v30 = vld [vmem:[%s7064_s13 + $0x3ec] sm:$0xf0] }
 0x33a   : > { %2960 = vmatpush.bf16.msrb.mxu3 %v5188_v55  ;;  %v5329_v55 = vld [vmem:[%s7064_s13 + $0x1e8] sm:$0xf0]  ;;  %v5324_v58 = vor.u32 %v6305_v49, %v5321_v51  ;;  %v6371_v31 = vld [vmem:[%s7064_s13 + $0x3b4] sm:$0xf]  ;;  %v6380_v35 = vld [vmem:[%s7064_s13 + $0x3f4] sm:$0xf0]  ;;  %v5140_v40 = vor.u32 %v6258_v27, %v5137_v28  ;;  %v5592_v41 = vor.u32 %v6379_v30, %v5591_v29 }
 0x33b   : > { %v5601_v39 = vld [vmem:[%s7064_s13 + $0x3f8] sm:$0xf0]  ;;  %v5529_v48 = vld [vmem:[%s7064_s13 + $0x370] sm:$0xf0]  ;;  %v5535_v49 = vld [vmem:[%s7064_s13 + $0x338] sm:$0xf] }
 0x33c   : > { %2922 = vmatpush.bf16.msrb.mxu0 %v5112_v63  ;;  %2935 = vmatpush.bf16.msrb.mxu1 %v5116_v3  ;;  %v5332_v63 = vor.u32 %v6306_v54, %v5329_v55  ;;  %v6290_v3 = vld [vmem:[%s7064_s13 + $0x12c] sm:$0xf]  ;;  %v6356_v51 = vld [vmem:[%s7064_s13 + $0x33c] sm:$0xf]  ;;  %v5465_v61 = vld [vmem:[%s7064_s13 + $0x2f0] sm:$0xf0] }
 0x33d   : > { %2948 = vmatpush.bf16.msrb.mxu2 %v5120_v4  ;;  %v5265_v4 = vld [vmem:[%s7064_s13 + $0x168] sm:$0xf0]  ;;  %v5537_v52 = vld [vmem:[%s7064_s13 + $0x378] sm:$0xf0]  ;;  %v5471_v62 = vld [vmem:[%s7064_s13 + $0x2b8] sm:$0xf] }
 0x33e   : > { %2961 = vmatpush.bf16.msrb.mxu3 %v5124_v7  ;;  %v5264_v7 = vor.u32 %v6298_v2, %v5263_v1  ;;  %v5268_v11 = vor.u32 %v6290_v3, %v5265_v4  ;;  %v5540_v60 = vor.u32 %v6356_v51, %v5537_v52  ;;  %v6340_v0 = vld [vmem:[%s7064_s13 + $0x2bc] sm:$0xf]  ;;  %v5271_v29 = vld [vmem:[%s7064_s13 + $0x130] sm:$0xf] }
 0x33f   : > { %2923 = vmatmul.bf16.vlgmr.msrb.gmra.mxu0 %v7377_v56  ;;  %2936 = vmatmul.bf16.vlgmr.msrb.gmra.mxu1 %v7377_v56  ;;  %v5473_v1 = vld [vmem:[%s7064_s13 + $0x2f8] sm:$0xf0]  ;;  %v6299_v30 = vld [vmem:[%s7064_s13 + $0x16c] sm:$0xf0] }
 0x340   : > { %2967 = vmatpush.bf16.msra.mxu0 %v5576_v8  ;;  %2980 = vmatpush.bf16.msra.mxu1 %v5580_v9  ;;  %v5191_v8 = vld [vmem:[%s7064_s13 + $0xa0] sm:$0xf] }
 0x341   : > { %2993 = vmatpush.bf16.msra.mxu2 %v5584_v10  ;;  %2962 = vmatmul.bf16.vlgmr.msrb.gmra.mxu3 %v7377_v56  ;;  %v6281_v9 = vld [vmem:[%s7064_s13 + $0xdc] sm:$0xf0]  ;;  %v6273_v10 = vld [vmem:[%s7064_s13 + $0xa4] sm:$0xf] }
 0x342   : > { %3006 = vmatpush.bf16.msra.mxu3 %v5588_v14  ;;  %2949 = vmatmul.bf16.vlgmr.msrb.gmra.mxu2 %v7377_v56  ;;  %v6282_v14 = vld [vmem:[%s7064_s13 + $0xe4] sm:$0xf0]  ;;  %v5192_v17 = vor.u32 %v6281_v9, %v5191_v8  ;;  %v5476_v8 = vor.u32 %v6340_v0, %v5473_v1  ;;  %v5401_v9 = vld [vmem:[%s7064_s13 + $0x270] sm:$0xf0] }
 0x344   : > { %2968 = vmatpush.bf16.msra.mxu0 %v5512_v20  ;;  %2981 = vmatpush.bf16.msra.mxu1 %v5516_v21  ;;  %v5196_v20 = vor.u32 %v6273_v10, %v5193_v12  ;;  %v5200_v21 = vor.u32 %v6282_v14, %v5199_v13  ;;  %v5407_v10 = vld [vmem:[%s7064_s13 + $0x238] sm:$0xf]  ;;  %v6324_v12 = vld [vmem:[%s7064_s13 + $0x23c] sm:$0xf] }
 0x345   : > { %2994 = vmatpush.bf16.msra.mxu2 %v5520_v22  ;;  %v6257_v22 = vld [vmem:[%s7064_s13 + $0x24] sm:$0xf]  ;;  %v5409_v13 = vld [vmem:[%s7064_s13 + $0x278] sm:$0xf0] }
 0x346   : > { %3007 = vmatpush.bf16.msra.mxu3 %v5524_v26  ;;  %v6266_v26 = vld [vmem:[%s7064_s13 + $0x64] sm:$0xf0]  ;;  %v5132_v36 = vor.u32 %v6257_v22, %v5129_v23  ;;  %v5343_v22 = vld [vmem:[%s7064_s13 + $0x1b8] sm:$0xf] }
 0x347   : > { %v5136_v37 = vor.u32 %v6266_v26, %v5135_v24  ;;  %v6316_v23 = vld [vmem:[%s7064_s13 + $0x1f4] sm:$0xf0]  ;;  %v6308_v24 = vld [vmem:[%s7064_s13 + $0x1bc] sm:$0xf] }
 0x348   : > { %2969 = vmatpush.bf16.msra.mxu0 %v5448_v32  ;;  %2982 = vmatpush.bf16.msra.mxu1 %v5452_v33  ;;  %v5128_v32 = vor.u32 %v6265_v19, %v5127_v18  ;;  %v5593_v33 = vld [vmem:[%s7064_s13 + $0x3f0] sm:$0xf0]  ;;  %v6315_v18 = vld [vmem:[%s7064_s13 + $0x1ec] sm:$0xf0]  ;;  %v5344_v28 = vor.u32 %v6316_v23, %v5343_v22  ;;  %v6408_v22 = vld [vmem:[%s7568_s28 + $0xd8] sm:$0xff] }
 0x349   : > { %2995 = vmatpush.bf16.msra.mxu2 %v5456_v34  ;;  %v5599_v34 = vld [vmem:[%s7064_s13 + $0x3b8] sm:$0xf]  ;;  %v5596_v42 = vor.u32 %v6371_v31, %v5593_v33  ;;  %v6307_v19 = vld [vmem:[%s7064_s13 + $0x1b4] sm:$0xf]  ;;  %v6391_v23 = vld [vmem:[%s7568_s28 + $0x50] sm:$0xff] }
 0x34a   : > { %3008 = vmatpush.bf16.msra.mxu3 %v5460_v38  ;;  %v6372_v38 = vld [vmem:[%s7064_s13 + $0x3bc] sm:$0xf]  ;;  %v5600_v43 = vor.u32 %v6380_v35, %v5599_v34  ;;  %v6291_v31 = vld [vmem:[%s7064_s13 + $0x134] sm:$0xf]  ;;  %v5279_v34 = vld [vmem:[%s7064_s13 + $0x138] sm:$0xf] }
 0x34b   : > { %v5604_v47 = vor.u32 %v6372_v38, %v5601_v39  ;;  %v5273_v33 = vld [vmem:[%s7064_s13 + $0x170] sm:$0xf0]  ;;  %v6300_v35 = vld [vmem:[%s7064_s13 + $0x174] sm:$0xf0]  ;;  %v5272_v38 = vor.u32 %v6299_v30, %v5271_v29  ;;  %v6381_v29 = vld [vmem:[%s7568_s28] sm:$0xff] }
 0x34c   : > { %2970 = vmatpush.bf16.msra.mxu0 %v5384_v44  ;;  %2983 = vmatpush.bf16.msra.mxu1 %v5388_v45  ;;  %v5527_v44 = vld [vmem:[%s7064_s13 + $0x330] sm:$0xf]  ;;  %v5276_v39 = vor.u32 %v6291_v31, %v5273_v33  ;;  %v6406_v30 = vld [vmem:[%s7568_s28 + $0xc8] sm:$0xff]  ;;  %v6428_v33 = vld [vmem:[%s7568_s28 + $0x178] sm:$0xff] }
 0x34d   : > { %2996 = vmatpush.bf16.msra.mxu2 %v5392_v46  ;;  %v6363_v45 = vld [vmem:[%s7064_s13 + $0x36c] sm:$0xf0]  ;;  %v6355_v46 = vld [vmem:[%s7064_s13 + $0x334] sm:$0xf] }
 0x34e   : > { %3009 = vmatpush.bf16.msra.mxu3 %v5396_v50  ;;  %v6364_v50 = vld [vmem:[%s7064_s13 + $0x374] sm:$0xf0]  ;;  %v5528_v53 = vor.u32 %v6363_v45, %v5527_v44  ;;  %v5532_v54 = vor.u32 %v6355_v46, %v5529_v48  ;;  %v5209_v45 = vld [vmem:[%s7064_s13 + $0xf0] sm:$0xf0]  ;;  %v6276_v48 = vld [vmem:[%s7064_s13 + $0xbc] sm:$0xf] }
 0x34f   : > { %v5536_v55 = vor.u32 %v6364_v50, %v5535_v49  ;;  %v5215_v46 = vld [vmem:[%s7064_s13 + $0xb8] sm:$0xf]  ;;  %v5217_v49 = vld [vmem:[%s7064_s13 + $0xf8] sm:$0xf0]  ;;  %v6389_v31 = vld [vmem:[%s7568_s28 + $0x40] sm:$0xff] }
 0x350   : > { %2971 = vmatpush.bf16.msra.mxu0 %v5320_v57  ;;  %2984 = vmatpush.bf16.msra.mxu1 %v5324_v58  ;;  %v5463_v57 = vld [vmem:[%s7064_s13 + $0x2b0] sm:$0xf] }
 0x351   : > { %2997 = vmatpush.bf16.msra.mxu2 %v5328_v59  ;;  %v6347_v58 = vld [vmem:[%s7064_s13 + $0x2ec] sm:$0xf0]  ;;  %v6339_v59 = vld [vmem:[%s7064_s13 + $0x2b4] sm:$0xf] }
 0x352   : > { %3010 = vmatpush.bf16.msra.mxu3 %v5332_v63  ;;  %v6348_v63 = vld [vmem:[%s7064_s13 + $0x2f4] sm:$0xf0]  ;;  %v5464_v2 = vor.u32 %v6347_v58, %v5463_v57  ;;  %v5468_v3 = vor.u32 %v6339_v59, %v5465_v61  ;;  %v5220_v57 = vor.u32 %v6276_v48, %v5217_v49  ;;  %v5145_v58 = vld [vmem:[%s7064_s13 + $0x70] sm:$0xf0]  ;;  %v6260_v61 = vld [vmem:[%s7064_s13 + $0x3c] sm:$0xf] }
 0x353   : > { %v5472_v4 = vor.u32 %v6348_v63, %v5471_v62  ;;  %v5151_v59 = vld [vmem:[%s7064_s13 + $0x38] sm:$0xf]  ;;  %v5153_v62 = vld [vmem:[%s7064_s13 + $0x78] sm:$0xf0] }
 0x354   : > { %2972 = vmatpush.bf16.msra.mxu0 %v5256_v5  ;;  %2985 = vmatpush.bf16.msra.mxu1 %v5260_v6  ;;  %v5399_v5 = vld [vmem:[%s7064_s13 + $0x230] sm:$0xf]  ;;  %v6434_v48 = vld [vmem:[%s7568_s28 + $0x1a8] sm:$0xff] }
 0x355   : > { %2998 = vmatpush.bf16.msra.mxu2 %v5264_v7  ;;  %v6331_v6 = vld [vmem:[%s7064_s13 + $0x26c] sm:$0xf0]  ;;  %v6323_v7 = vld [vmem:[%s7064_s13 + $0x234] sm:$0xf] }
 0x356   : > { %3011 = vmatpush.bf16.msra.mxu3 %v5268_v11  ;;  %v6332_v11 = vld [vmem:[%s7064_s13 + $0x274] sm:$0xf0]  ;;  %v5400_v14 = vor.u32 %v6331_v6, %v5399_v5  ;;  %v5404_v15 = vor.u32 %v6323_v7, %v5401_v9  ;;  %v6404_v5 = vld [vmem:[%s7568_s28 + $0xb8] sm:$0xff]  ;;  %v6387_v6 = vld [vmem:[%s7568_s28 + $0x30] sm:$0xff] }
 0x357   : > { %v5408_v16 = vor.u32 %v6332_v11, %v5407_v10  ;;  %v6412_v7 = vld [vmem:[%s7568_s28 + $0xf8] sm:$0xff]  ;;  %v6403_v9 = vld [vmem:[%s7568_s28 + $0xb0] sm:$0xff]  ;;  %v6386_v10 = vld [vmem:[%s7568_s28 + $0x28] sm:$0xff] }
 0x358   : > { %2973 = vmatpush.bf16.msra.mxu0 %v5192_v17  ;;  %2986 = vmatpush.bf16.msra.mxu1 %v5196_v20  ;;  %v5335_v17 = vld [vmem:[%s7064_s13 + $0x1b0] sm:$0xf]  ;;  %v5412_v20 = vor.u32 %v6324_v12, %v5409_v13  ;;  %v6411_v11 = vld [vmem:[%s7568_s28 + $0xf0] sm:$0xff]  ;;  %v6394_v12 = vld [vmem:[%s7568_s28 + $0x68] sm:$0xff] }
 0x359   : > { %2999 = vmatpush.bf16.msra.mxu2 %v5200_v21  ;;  %v5337_v21 = vld [vmem:[%s7064_s13 + $0x1f0] sm:$0xf0]  ;;  %v5336_v26 = vor.u32 %v6315_v18, %v5335_v17  ;;  %v6384_v17 = vld [vmem:[%s7568_s28 + $0x18] sm:$0xff]  ;;  %v6409_v18 = vld [vmem:[%s7568_s28 + $0xe0] sm:$0xff] }
 0x35a   : > { %3012 = vmatpush.bf16.msra.mxu3 %v5204_v25  ;;  %v5345_v25 = vld [vmem:[%s7064_s13 + $0x1f8] sm:$0xf0]  ;;  %v5340_v27 = vor.u32 %v6307_v19, %v5337_v21  ;;  %v6402_v13 = vld [vmem:[%s7568_s28 + $0xa8] sm:$0xff]  ;;  %v6392_v19 = vld [vmem:[%s7568_s28 + $0x58] sm:$0xff] }
 0x35b   : > { %v6383_v21 = vld [vmem:[%s7568_s28 + $0x10] sm:$0xff] }
 0x35c   : > { %2974 = vmatpush.bf16.msra.mxu0 %v5128_v32  ;;  %2987 = vmatpush.bf16.msra.mxu1 %v5132_v36  ;;  %v5348_v32 = vor.u32 %v6308_v24, %v5345_v25  ;;  %v6292_v36 = vld [vmem:[%s7064_s13 + $0x13c] sm:$0xf]  ;;  %v6382_v25 = vld [vmem:[%s7568_s28 + $0x8] sm:$0xff] }
 0x35d   : > { %3000 = vmatpush.bf16.msra.mxu2 %v5136_v37  ;;  %v5281_v37 = vld [vmem:[%s7064_s13 + $0x178] sm:$0xf0] }
 0x35e   : > { %3013 = vmatpush.bf16.msra.mxu3 %v5140_v40  ;;  %v5280_v40 = vor.u32 %v6300_v35, %v5279_v34  ;;  %v5284_v44 = vor.u32 %v6292_v36, %v5281_v37  ;;  %v6399_v24 = vld [vmem:[%s7568_s28 + $0x90] sm:$0xff]  ;;  %v6397_v34 = vld [vmem:[%s7568_s28 + $0x80] sm:$0xff]  ;;  %v6436_v36 = vld [vmem:[%s7568_s28 + $0x1b8] sm:$0xff] }
 0x35f   : > { %2975 = vmatmul.bf16.vlgmr.msra.gmra.mxu0 %v7377_v56  ;;  %2988 = vmatmul.bf16.vlgmr.msra.gmra.mxu1 %v7377_v56  ;;  %v6405_v35 = vld [vmem:[%s7568_s28 + $0xc0] sm:$0xff]  ;;  %v6419_v37 = vld [vmem:[%s7568_s28 + $0x130] sm:$0xff] }
 0x360   : > { %3019 = vmatpush.bf16.msrb.mxu0 %v5592_v41  ;;  %3032 = vmatpush.bf16.msrb.mxu1 %v5596_v42  ;;  %v5207_v41 = vld [vmem:[%s7064_s13 + $0xb0] sm:$0xf] }
 0x361   : > { %3045 = vmatpush.bf16.msrb.mxu2 %v5600_v43  ;;  %3014 = vmatmul.bf16.vlgmr.msra.gmra.mxu3 %v7377_v56  ;;  %v6283_v42 = vld [vmem:[%s7064_s13 + $0xec] sm:$0xf0]  ;;  %v6275_v43 = vld [vmem:[%s7064_s13 + $0xb4] sm:$0xf] }
 0x362   : > { %3058 = vmatpush.bf16.msrb.mxu3 %v5604_v47  ;;  %3001 = vmatmul.bf16.vlgmr.msra.gmra.mxu2 %v7377_v56  ;;  %v6284_v47 = vld [vmem:[%s7064_s13 + $0xf4] sm:$0xf0]  ;;  %v5208_v50 = vor.u32 %v6283_v42, %v5207_v41  ;;  %v5212_v51 = vor.u32 %v6275_v43, %v5209_v45  ;;  %v6435_v41 = vld [vmem:[%s7568_s28 + $0x1b0] sm:$0xff] }
 0x363   : > { %v5216_v52 = vor.u32 %v6284_v47, %v5215_v46  ;;  %v6443_v45 = vld [vmem:[%s7568_s28 + $0x1f0] sm:$0xff]  ;;  %v6426_v46 = vld [vmem:[%s7568_s28 + $0x168] sm:$0xff] }
 0x364   : > { %3020 = vmatpush.bf16.msrb.mxu0 %v5528_v53  ;;  %3033 = vmatpush.bf16.msrb.mxu1 %v5532_v54  ;;  %v5143_v53 = vld [vmem:[%s7064_s13 + $0x30] sm:$0xf] }
 0x365   : > { %3046 = vmatpush.bf16.msrb.mxu2 %v5536_v55  ;;  %v6267_v54 = vld [vmem:[%s7064_s13 + $0x6c] sm:$0xf0]  ;;  %v6259_v55 = vld [vmem:[%s7064_s13 + $0x34] sm:$0xf] }
 0x366   : > { %3059 = vmatpush.bf16.msrb.mxu3 %v5540_v60  ;;  %v6268_v60 = vld [vmem:[%s7064_s13 + $0x74] sm:$0xf0]  ;;  %v5144_v63 = vor.u32 %v6267_v54, %v5143_v53  ;;  %v5148_v0 = vor.u32 %v6259_v55, %v5145_v58  ;;  %s3071_s13 = sshra.s32 %s7053_s29, 7  ;;  %v6425_v55 = vld [vmem:[%s7568_s28 + $0x160] sm:$0xff] }
 0x367   : > { %v5152_v1 = vor.u32 %v6268_v60, %v5151_v59  ;;  %s7606_s30 = sshll.u32 %s3071_s13, 2  ;;  %v6433_v60 = vld [vmem:[%s7568_s28 + $0x1a0] sm:$0xff] }
 0x368   : > { %3021 = vmatpush.bf16.msrb.mxu0 %v5464_v2  ;;  %3034 = vmatpush.bf16.msrb.mxu1 %v5468_v3  ;;  %v5156_v2 = vor.u32 %v6260_v61, %v5153_v62  ;;  %v6388_v3 = vld [vmem:[%s7568_s28 + $0x38] sm:$0xff]  ;;  %s7616_s12 = scalar_lea.vmem %s7839_s1, %s7606_s30  ;;  %s7643_s20 = scalar_lea.vmem %s7838_s0, %s7606_s30 }
 0x369   : > { %3047 = vmatpush.bf16.msrb.mxu2 %v5472_v4  ;;  %v6396_v4 = vld [vmem:[%s7568_s28 + $0x78] sm:$0xff]  ;;  %v3086_v47 = vld [vmem:[%s7616_s12 + $0x8] sm:$0xff]  ;;  %v3075_v59 = vld [vmem:[%s7643_s20] sm:$0xff] }
 0x36a   : > { %3060 = vmatpush.bf16.msrb.mxu3 %v5476_v8  ;;  %v6395_v8 = vld [vmem:[%s7568_s28 + $0x70] sm:$0xff]  ;;  %v3095_v53 = vunpack.c.l.bf16 %v3086_v47  ;;  %v3096_v54 = vunpack.c.h.bf16 %v3086_v47  ;;  %v6416_v62 = vld [vmem:[%s7568_s28 + $0x118] sm:$0xff]  ;;  %v3090_v49 = vld [vmem:[%s7616_s12 + $0x28] sm:$0xff] }
 0x36b   : > { %v6475_v47 = vld [vmem:[%s7568_s28 + $0x2f0] sm:$0xff] }
 0x36c   : > { %3022 = vmatpush.bf16.msrb.mxu0 %v5400_v14  ;;  %3035 = vmatpush.bf16.msrb.mxu1 %v5404_v15  ;;  %v6385_v14 = vld [vmem:[%s7568_s28 + $0x20] sm:$0xff]  ;;  %vm7652_vm5 = vcmp.gt.f32.partialorder %v3095_v53, 0.5  ;;  %vm7656_vm6 = vcmp.gt.f32.partialorder %v3096_v54, 0.5 }
 0x36d   : > { %3048 = vmatpush.bf16.msrb.mxu2 %v5408_v16  ;;  %v6393_v15 = vld [vmem:[%s7568_s28 + $0x60] sm:$0xff]  ;;  %vm3134_vm7 = vmpackc.low %vm7656_vm6, %vm7652_vm5 }
 0x36e   : > { %3061 = vmatpush.bf16.msrb.mxu3 %v5412_v20  ;;  %v6401_v16 = vld [vmem:[%s7568_s28 + $0xa0] sm:$0xff]  ;;  %v6400_v20 = vld [vmem:[%s7568_s28 + $0x98] sm:$0xff] }
 0x36f   : > { %v6457_v54 = vld [vmem:[%s7568_s28 + $0x260] sm:$0xff] }
 0x370   : > { %3023 = vmatpush.bf16.msrb.mxu0 %v5336_v26  ;;  %3036 = vmatpush.bf16.msrb.mxu1 %v5340_v27  ;;  %v6407_v26 = vld [vmem:[%s7568_s28 + $0xd0] sm:$0xff]  ;;  %v6390_v27 = vld [vmem:[%s7568_s28 + $0x48] sm:$0xff] }
 0x371   : > { %3049 = vmatpush.bf16.msrb.mxu2 %v5344_v28  ;;  %v6398_v28 = vld [vmem:[%s7568_s28 + $0x88] sm:$0xff] }
 0x372   : > { %3062 = vmatpush.bf16.msrb.mxu3 %v5348_v32  ;;  %v6420_v32 = vld [vmem:[%s7568_s28 + $0x138] sm:$0xff] }
 0x374   : > { %3024 = vmatpush.bf16.msrb.mxu0 %v5272_v38  ;;  %3037 = vmatpush.bf16.msrb.mxu1 %v5276_v39  ;;  %v6444_v38 = vld [vmem:[%s7568_s28 + $0x1f8] sm:$0xff]  ;;  %v3085_v39 = vld [vmem:[%s7616_s12] sm:$0xff] }
 0x375   : > { %3050 = vmatpush.bf16.msrb.mxu2 %v5280_v40  ;;  %v6427_v40 = vld [vmem:[%s7568_s28 + $0x170] sm:$0xff]  ;;  %v3093_v42 = vunpack.c.l.bf16 %v3085_v39  ;;  %v3094_v43 = vunpack.c.h.bf16 %v3085_v39 }
 0x376   : > { %3063 = vmatpush.bf16.msrb.mxu3 %v5284_v44  ;;  %v6418_v44 = vld [vmem:[%s7568_s28 + $0x128] sm:$0xff]  ;;  %v3087_v39 = vld [vmem:[%s7616_s12 + $0x10] sm:$0xff] }
 0x377   : > { %vm7628_vm2 = vcmp.gt.f32.partialorder %v3093_v42, 0.5  ;;  %vm7632_vm3 = vcmp.gt.f32.partialorder %v3094_v43, 0.5  ;;  %v3098_v42 = vunpack.c.h.bf16 %v3087_v39  ;;  %v6450_v43 = vld [vmem:[%s7568_s28 + $0x228] sm:$0xff] }
 0x378   : > { %3025 = vmatpush.bf16.msrb.mxu0 %v5208_v50  ;;  %3038 = vmatpush.bf16.msrb.mxu1 %v5212_v51  ;;  %v6417_v51 = vld [vmem:[%s7568_s28 + $0x120] sm:$0xff]  ;;  %vm3133_vm4 = vmpackc.low %vm7632_vm3, %vm7628_vm2 }
 0x379   : > { %3051 = vmatpush.bf16.msrb.mxu2 %v5216_v52  ;;  %v6442_v52 = vld [vmem:[%s7568_s28 + $0x1e8] sm:$0xff]  ;;  %vm7697_vm9 = vcmp.gt.f32.partialorder %v3098_v42, 0.5  ;;  %v6449_v50 = vld [vmem:[%s7568_s28 + $0x220] sm:$0xff] }
 0x37a   : > { %3064 = vmatpush.bf16.msrb.mxu3 %v5220_v57 }
 0x37c   : > { %3026 = vmatpush.bf16.msrb.mxu0 %v5144_v63  ;;  %3039 = vmatpush.bf16.msrb.mxu1 %v5148_v0  ;;  %v6488_v63 = vld [vmem:[%s7568_s28 + $0x358] sm:$0xff] }
 0x37d   : > { %3052 = vmatpush.bf16.msrb.mxu2 %v5152_v1  ;;  %v6441_v1 = vld [vmem:[%s7568_s28 + $0x1e0] sm:$0xff] }
 0x37e   : > { %3065 = vmatpush.bf16.msrb.mxu3 %v5156_v2  ;;  %v6424_v2 = vld [vmem:[%s7568_s28 + $0x158] sm:$0xff] }
 0x37f   : > { %3027 = vmatmul.bf16.vlgmr.msrb.gmra.mxu0 %v7377_v56  ;;  %3040 = vmatmul.bf16.vlgmr.msrb.gmra.mxu1 %v7377_v56 }
 0x380   : > { %4234 = vmatpush.bf16.msra.mxu0 %v6388_v3  ;;  %4247 = vmatpush.bf16.msra.mxu1 %v6396_v4 }
 0x381   : > { %3053 = vmatmul.bf16.vlgmr.msrb.gmra.mxu2 %v7377_v56  ;;  %3066 = vmatmul.bf16.vlgmr.msrb.gmra.mxu3 %v7377_v56  ;;  %v6410_v56 = vld [vmem:[%s7568_s28 + $0xe8] sm:$0xff] }
 0x382   : > { %4260 = vmatpush.bf16.msra.mxu2 %v6404_v5  ;;  %4273 = vmatpush.bf16.msra.mxu3 %v6412_v7 }
 0x384   : > { %4235 = vmatpush.bf16.msra.mxu0 %v6387_v6  ;;  %4248 = vmatpush.bf16.msra.mxu1 %v6395_v8  ;;  %v3076_v8 = vld [vmem:[%s7643_s20 + $0x8] sm:$0xff] }
 0x386   : > { %4261 = vmatpush.bf16.msra.mxu2 %v6403_v9  ;;  %4274 = vmatpush.bf16.msra.mxu3 %v6411_v11  ;;  %v6432_v9 = vld [vmem:[%s7568_s28 + $0x198] sm:$0xff] }
 0x388   : > { %4236 = vmatpush.bf16.msra.mxu0 %v6386_v10  ;;  %4249 = vmatpush.bf16.msra.mxu1 %v6394_v12 }
 0x38a   : > { %4262 = vmatpush.bf16.msra.mxu2 %v6402_v13  ;;  %4275 = vmatpush.bf16.msra.mxu3 %v6410_v56  ;;  %v6415_v13 = vld [vmem:[%s7568_s28 + $0x110] sm:$0xff] }
 0x38b   : > { %v6423_v56 = vld [vmem:[%s7568_s28 + $0x150] sm:$0xff] }
 0x38c   : > { %4237 = vmatpush.bf16.msra.mxu0 %v6385_v14  ;;  %4250 = vmatpush.bf16.msra.mxu1 %v6393_v15  ;;  %v6440_v14 = vld [vmem:[%s7568_s28 + $0x1d8] sm:$0xff] }
 0x38e   : > { %4263 = vmatpush.bf16.msra.mxu2 %v6401_v16  ;;  %4276 = vmatpush.bf16.msra.mxu3 %v6409_v18 }
 0x390   : > { %4238 = vmatpush.bf16.msra.mxu0 %v6384_v17  ;;  %4251 = vmatpush.bf16.msra.mxu1 %v6392_v19 }
 0x392   : > { %4264 = vmatpush.bf16.msra.mxu2 %v6400_v20  ;;  %4277 = vmatpush.bf16.msra.mxu3 %v6408_v22  ;;  %v6414_v20 = vld [vmem:[%s7568_s28 + $0x108] sm:$0xff] }
 0x394   : > { %4239 = vmatpush.bf16.msra.mxu0 %v6383_v21  ;;  %4252 = vmatpush.bf16.msra.mxu1 %v6391_v23  ;;  %v6431_v21 = vld [vmem:[%s7568_s28 + $0x190] sm:$0xff] }
 0x396   : > { %4265 = vmatpush.bf16.msra.mxu2 %v6399_v24  ;;  %4278 = vmatpush.bf16.msra.mxu3 %v6407_v26  ;;  %v6422_v24 = vld [vmem:[%s7568_s28 + $0x148] sm:$0xff] }
 0x398   : > { %4240 = vmatpush.bf16.msra.mxu0 %v6382_v25  ;;  %4253 = vmatpush.bf16.msra.mxu1 %v6390_v27  ;;  %v6439_v25 = vld [vmem:[%s7568_s28 + $0x1d0] sm:$0xff] }
 0x39a   : > { %4266 = vmatpush.bf16.msra.mxu2 %v6398_v28  ;;  %4279 = vmatpush.bf16.msra.mxu3 %v6406_v30  ;;  %v6413_v28 = vld [vmem:[%s7568_s28 + $0x100] sm:$0xff] }
 0x39b   : > { %v6421_v30 = vld [vmem:[%s7568_s28 + $0x140] sm:$0xff] }
 0x39c   : > { %4241 = vmatpush.bf16.msra.mxu0 %v6381_v29  ;;  %4254 = vmatpush.bf16.msra.mxu1 %v6389_v31  ;;  %v2872_v57 = vpop.f32.mrf.mxu0  ;;  %v2885_v58 = vpop.f32.mrf.mxu1  ;;  %v6430_v29 = vld [vmem:[%s7568_s28 + $0x188] sm:$0xff]  ;;  %v6452_v31 = vld [vmem:[%s7568_s28 + $0x238] sm:$0xff] }
 0x39d   : > { %v3125_v61 = vpack.c.bf16 %v2885_v58, %v2872_v57  ;;  %v6474_v57 = vld [vmem:[%s7568_s28 + $0x2e8] sm:$0xff] }
 0x39e   : > { %4267 = vmatpush.bf16.msra.mxu2 %v6397_v34  ;;  %4280 = vmatpush.bf16.msra.mxu3 %v6405_v35  ;;  %v6429_v34 = vld [vmem:[%s7568_s28 + $0x180] sm:$0xff]  ;;  %v6451_v35 = vld [vmem:[%s7568_s28 + $0x230] sm:$0xff] }
 0x39f   : > { %v3141_v3 = vsel %vm3133_vm4, %v3075_v59, %v3125_v61  ;;  %v3077_v59 = vld [vmem:[%s7643_s20 + $0x10] sm:$0xff]  ;;  %v6448_v61 = vld [vmem:[%s7568_s28 + $0x218] sm:$0xff] }
 0x3a0   : > { %4286 = vmatpush.bf16.msrb.mxu0 %v6420_v32  ;;  %4299 = vmatpush.bf16.msrb.mxu1 %v6428_v33  ;;  %v3418_v5 = vunpack.c.l.b16 %v3141_v3  ;;  %v3419_v6 = vunpack.c.h.b16 %v3141_v3  ;;  %v6438_v32 = vld [vmem:[%s7568_s28 + $0x1c8] sm:$0xff]  ;;  %v6460_v33 = vld [vmem:[%s7568_s28 + $0x278] sm:$0xff]  ;;  %v6473_v3 = vld [vmem:[%s7568_s28 + $0x2e0] sm:$0xff] }
 0x3a2   : > { %4312 = vmatpush.bf16.msrb.mxu2 %v6436_v36  ;;  %4325 = vmatpush.bf16.msrb.mxu3 %v6444_v38  ;;  %v3434_v11 = vpack.c.b16 %v3418_v5, %v3418_v5  ;;  %v3435_v12 = vpack.c.b16 %v3419_v6, %v3419_v6  ;;  %v6468_v36 = vld [vmem:[%s7568_s28 + $0x2b8] sm:$0xff]  ;;  %v6459_v38 = vld [vmem:[%s7568_s28 + $0x270] sm:$0xff] }
 0x3a3   : > { %v3078_v5 = vld [vmem:[%s7643_s20 + $0x18] sm:$0xff] }
 0x3a4   : > { %4287 = vmatpush.bf16.msrb.mxu0 %v6419_v37  ;;  %4300 = vmatpush.bf16.msrb.mxu1 %v6427_v40  ;;  %v2911_v7 = vpop.f32.mrf.mxu3  ;;  %v2874_v15 = vpop.f32.mrf.mxu0  ;;  %v6437_v37 = vld [vmem:[%s7568_s28 + $0x1c0] sm:$0xff]  ;;  %v6476_v40 = vld [vmem:[%s7568_s28 + $0x2f8] sm:$0xff] }
 0x3a5   : > { %v2898_v4 = vpop.f32.mrf.mxu2  ;;  %v2887_v17 = vpop.f32.mrf.mxu1  ;;  %4242 = vmatmul.bf16.vlgmr.msra.gmra.mxu0 %v3434_v11  ;;  %4255 = vmatmul.bf16.vlgmr.msra.gmra.mxu1 %v3435_v12  ;;  %v6472_v15 = vld [vmem:[%s7568_s28 + $0x2d8] sm:$0xff] }
 0x3a6   : > { %4313 = vmatpush.bf16.msrb.mxu2 %v6435_v41  ;;  %4326 = vmatpush.bf16.msrb.mxu3 %v6443_v45  ;;  %v3126_v10 = vpack.c.bf16 %v2911_v7, %v2898_v4  ;;  %v3097_v41 = vunpack.c.l.bf16 %v3087_v39  ;;  %v6458_v45 = vld [vmem:[%s7568_s28 + $0x268] sm:$0xff]  ;;  %v6500_v39 = vld [vmem:[%s7568_s28 + $0x3b8] sm:$0xff] }
 0x3a8   : > { %4288 = vmatpush.bf16.msrb.mxu0 %v6418_v44  ;;  %4301 = vmatpush.bf16.msrb.mxu1 %v6426_v46  ;;  %v3142_v16 = vsel %vm3134_vm7, %v3076_v8, %v3126_v10  ;;  %v6467_v44 = vld [vmem:[%s7568_s28 + $0x2b0] sm:$0xff]  ;;  %v3088_v46 = vld [vmem:[%s7616_s12 + $0x18] sm:$0xff]  ;;  %vm7693_vm8 = vcmp.gt.f32.partialorder %v3097_v41, 0.5 }
 0x3a9   : > { %v3420_v18 = vunpack.c.l.b16 %v3142_v16  ;;  %v3421_v19 = vunpack.c.h.b16 %v3142_v16  ;;  %v3100_v53 = vunpack.c.h.bf16 %v3088_v46  ;;  %vm3135_vm10 = vmpackc.low %vm7697_vm9, %vm7693_vm8  ;;  %v6464_v10 = vld [vmem:[%s7568_s28 + $0x298] sm:$0xff] }
 0x3aa   : > { %4314 = vmatpush.bf16.msrb.mxu2 %v6434_v48  ;;  %4327 = vmatpush.bf16.msrb.mxu3 %v6442_v52  ;;  %v3099_v52 = vunpack.c.l.bf16 %v3088_v46  ;;  %v6507_v46 = vld [vmem:[%s7568_s28 + $0x3f0] sm:$0xff] }
 0x3ab   : > { %v3436_v22 = vpack.c.b16 %v3420_v18, %v3420_v18  ;;  %v3437_v23 = vpack.c.b16 %v3421_v19, %v3421_v19  ;;  %vm7716_vm12 = vcmp.gt.f32.partialorder %v3100_v53, 0.5  ;;  %v6489_v53 = vld [vmem:[%s7568_s28 + $0x360] sm:$0xff] }
 0x3ac   : > { %4289 = vmatpush.bf16.msrb.mxu0 %v6417_v51  ;;  %4302 = vmatpush.bf16.msrb.mxu1 %v6425_v55  ;;  %v2913_v27 = vpop.f32.mrf.mxu3  ;;  %v6466_v51 = vld [vmem:[%s7568_s28 + $0x2a8] sm:$0xff]  ;;  %vm7712_vm11 = vcmp.gt.f32.partialorder %v3099_v52, 0.5  ;;  %v3079_v52 = vld [vmem:[%s7643_s20 + $0x20] sm:$0xff] }
 0x3ad   : > { %v2900_v26 = vpop.f32.mrf.mxu2  ;;  %4268 = vmatmul.bf16.vlgmr.msra.gmra.mxu2 %v3436_v22  ;;  %4281 = vmatmul.bf16.vlgmr.msra.gmra.mxu3 %v3437_v23  ;;  %vm3136_vm13 = vmpackc.low %vm7716_vm12, %vm7712_vm11 }
 0x3ae   : > { %4315 = vmatpush.bf16.msrb.mxu2 %v6433_v60  ;;  %4328 = vmatpush.bf16.msrb.mxu3 %v6441_v1  ;;  %v6456_v1 = vld [vmem:[%s7568_s28 + $0x258] sm:$0xff] }
 0x3b0   : > { %4290 = vmatpush.bf16.msrb.mxu0 %v6416_v62  ;;  %4303 = vmatpush.bf16.msrb.mxu1 %v6424_v2  ;;  %v6465_v62 = vld [vmem:[%s7568_s28 + $0x2a0] sm:$0xff] }
 0x3b2   : > { %4316 = vmatpush.bf16.msrb.mxu2 %v6432_v9  ;;  %4329 = vmatpush.bf16.msrb.mxu3 %v6440_v14  ;;  %v6447_v9 = vld [vmem:[%s7568_s28 + $0x210] sm:$0xff] }
 0x3b3   : > { %v6455_v14 = vld [vmem:[%s7568_s28 + $0x250] sm:$0xff] }
 0x3b4   : > { %4291 = vmatpush.bf16.msrb.mxu0 %v6415_v13  ;;  %4304 = vmatpush.bf16.msrb.mxu1 %v6423_v56 }
 0x3b6   : > { %4317 = vmatpush.bf16.msrb.mxu2 %v6431_v21  ;;  %4330 = vmatpush.bf16.msrb.mxu3 %v6439_v25  ;;  %v6454_v21 = vld [vmem:[%s7568_s28 + $0x248] sm:$0xff]  ;;  %v6471_v25 = vld [vmem:[%s7568_s28 + $0x2d0] sm:$0xff] }
 0x3b8   : > { %4292 = vmatpush.bf16.msrb.mxu0 %v6414_v20  ;;  %4305 = vmatpush.bf16.msrb.mxu1 %v6422_v24  ;;  %v6446_v20 = vld [vmem:[%s7568_s28 + $0x208] sm:$0xff]  ;;  %v6463_v24 = vld [vmem:[%s7568_s28 + $0x290] sm:$0xff] }
 0x3ba   : > { %4318 = vmatpush.bf16.msrb.mxu2 %v6430_v29  ;;  %4331 = vmatpush.bf16.msrb.mxu3 %v6438_v32  ;;  %v6453_v29 = vld [vmem:[%s7568_s28 + $0x240] sm:$0xff]  ;;  %v6470_v32 = vld [vmem:[%s7568_s28 + $0x2c8] sm:$0xff] }
 0x3bc   : > { %4293 = vmatpush.bf16.msrb.mxu0 %v6413_v28  ;;  %4306 = vmatpush.bf16.msrb.mxu1 %v6421_v30  ;;  %v2924_v55 = vpop.f32.mrf.mxu0  ;;  %v2937_v58 = vpop.f32.mrf.mxu1  ;;  %v6445_v28 = vld [vmem:[%s7568_s28 + $0x200] sm:$0xff]  ;;  %v6484_v30 = vld [vmem:[%s7568_s28 + $0x338] sm:$0xff] }
 0x3bd   : > { %v3127_v60 = vpack.c.bf16 %v2937_v58, %v2924_v55  ;;  %v3103_v55 = vunpack.c.l.bf16 %v3090_v49  ;;  %v6498_v58 = vld [vmem:[%s7568_s28 + $0x3a8] sm:$0xff] }
 0x3be   : > { %4319 = vmatpush.bf16.msrb.mxu2 %v6429_v34  ;;  %4332 = vmatpush.bf16.msrb.mxu3 %v6437_v37  ;;  %v3089_v34 = vld [vmem:[%s7616_s12 + $0x20] sm:$0xff] }
 0x3bf   : > { %v3143_v2 = vsel %vm3135_vm10, %v3077_v59, %v3127_v60  ;;  %v6469_v37 = vld [vmem:[%s7568_s28 + $0x2c0] sm:$0xff]  ;;  %v3101_v41 = vunpack.c.l.bf16 %v3089_v34  ;;  %v3102_v42 = vunpack.c.h.bf16 %v3089_v34  ;;  %v6506_v59 = vld [vmem:[%s7568_s28 + $0x3e8] sm:$0xff]  ;;  %vm7772_vm1 = vcmp.gt.f32.partialorder %v3103_v55, 0.5 }
 0x3c0   : > { %4338 = vmatpush.bf16.msra.mxu0 %v6452_v31  ;;  %4351 = vmatpush.bf16.msra.mxu1 %v6460_v33  ;;  %v3422_v6 = vunpack.c.l.b16 %v3143_v2  ;;  %v3423_v7 = vunpack.c.h.b16 %v3143_v2  ;;  %v6462_v31 = vld [vmem:[%s7568_s28 + $0x288] sm:$0xff]  ;;  %v6492_v33 = vld [vmem:[%s7568_s28 + $0x378] sm:$0xff]  ;;  %v6501_v34 = vld [vmem:[%s7568_s28 + $0x3c0] sm:$0xff]  ;;  %vm4443_vm10 = vcmask 162816  }
 0x3c1   : > { %vm7752_vm14 = vcmp.gt.f32.partialorder %v3101_v41, 0.5  ;;  %vm7756_vm15 = vcmp.gt.f32.partialorder %v3102_v42, 0.5 }
 0x3c2   : > { %4364 = vmatpush.bf16.msra.mxu2 %v6468_v36  ;;  %4377 = vmatpush.bf16.msra.mxu3 %v6476_v40  ;;  %v3438_v12 = vpack.c.b16 %v3422_v6, %v3422_v6  ;;  %v3439_v13 = vpack.c.b16 %v3423_v7, %v3423_v7  ;;  %v6461_v36 = vld [vmem:[%s7568_s28 + $0x280] sm:$0xff]  ;;  %v6508_v40 = vld [vmem:[%s7568_s28 + $0x3f8] sm:$0xff]  ;;  %vm3137_vm0 = vmpackc.low %vm7756_vm15, %vm7752_vm14 }
 0x3c4   : > { %4339 = vmatpush.bf16.msra.mxu0 %v6451_v35  ;;  %4352 = vmatpush.bf16.msra.mxu1 %v6459_v38  ;;  %v2963_v8 = vpop.f32.mrf.mxu3  ;;  %v2926_v56 = vpop.f32.mrf.mxu0  ;;  %v6483_v35 = vld [vmem:[%s7568_s28 + $0x330] sm:$0xff] }
 0x3c5   : > { %v2950_v4 = vpop.f32.mrf.mxu2  ;;  %4294 = vmatmul.bf16.vlgmr.msrb.gmra.mxu0 %v3438_v12  ;;  %v2939_v17 = vpop.f32.mrf.mxu1  ;;  %4307 = vmatmul.bf16.vlgmr.msrb.gmra.mxu1 %v3439_v13  ;;  %v6491_v38 = vld [vmem:[%s7568_s28 + $0x370] sm:$0xff] }
 0x3c6   : > { %4365 = vmatpush.bf16.msra.mxu2 %v6467_v44  ;;  %4378 = vmatpush.bf16.msra.mxu3 %v6475_v47  ;;  %v3128_v11 = vpack.c.bf16 %v2963_v8, %v2950_v4  ;;  %v6490_v44 = vld [vmem:[%s7568_s28 + $0x368] sm:$0xff]  ;;  %v6497_v4 = vld [vmem:[%s7568_s28 + $0x3a0] sm:$0xff]  ;;  %v6487_v13 = vld [vmem:[%s7568_s28 + $0x350] sm:$0xff] }
 0x3c8   : > { %4340 = vmatpush.bf16.msra.mxu0 %v6450_v43  ;;  %4353 = vmatpush.bf16.msra.mxu1 %v6458_v45  ;;  %v3144_v16 = vsel %vm3136_vm13, %v3078_v5, %v3128_v11  ;;  %v6482_v43 = vld [vmem:[%s7568_s28 + $0x328] sm:$0xff]  ;;  %v6499_v45 = vld [vmem:[%s7568_s28 + $0x3b0] sm:$0xff]  ;;  %v6505_v5 = vld [vmem:[%s7568_s28 + $0x3e0] sm:$0xff] }
 0x3c9   : > { %v3424_v18 = vunpack.c.l.b16 %v3144_v16  ;;  %v3425_v19 = vunpack.c.h.b16 %v3144_v16  ;;  %v3080_v11 = vld [vmem:[%s7643_s20 + $0x28] sm:$0xff]  ;;  %v6504_v16 = vld [vmem:[%s7568_s28 + $0x3d8] sm:$0xff] }
 0x3ca   : > { %4366 = vmatpush.bf16.msra.mxu2 %v6466_v51  ;;  %4379 = vmatpush.bf16.msra.mxu3 %v6474_v57  ;;  %v3104_v57 = vunpack.c.h.bf16 %v3090_v49 }
 0x3cb   : > { %v3440_v22 = vpack.c.b16 %v3424_v18, %v3424_v18  ;;  %v3441_v23 = vpack.c.b16 %v3425_v19, %v3425_v19  ;;  %v6478_v18 = vld [vmem:[%s7568_s28 + $0x308] sm:$0xff] }
 0x3cc   : > { %4341 = vmatpush.bf16.msra.mxu0 %v6449_v50  ;;  %4354 = vmatpush.bf16.msra.mxu1 %v6457_v54  ;;  %v2965_v27 = vpop.f32.mrf.mxu3  ;;  %v6481_v50 = vld [vmem:[%s7568_s28 + $0x320] sm:$0xff]  ;;  %vm7776_vm2 = vcmp.gt.f32.partialorder %v3104_v57, 0.5 }
 0x3cd   : > { %v2952_v26 = vpop.f32.mrf.mxu2  ;;  %4320 = vmatmul.bf16.vlgmr.msrb.gmra.mxu2 %v3440_v22  ;;  %4333 = vmatmul.bf16.vlgmr.msrb.gmra.mxu3 %v3441_v23  ;;  %vm3138_vm3 = vmpackc.low %vm7776_vm2, %vm7772_vm1  ;;  %v6477_v27 = vld [vmem:[%s7568_s28 + $0x300] sm:$0xff] }
 0x3ce   : > { %4367 = vmatpush.bf16.msra.mxu2 %v6465_v62  ;;  %4380 = vmatpush.bf16.msra.mxu3 %v6473_v3 }
 0x3d0   : > { %4342 = vmatpush.bf16.msra.mxu0 %v6448_v61  ;;  %4355 = vmatpush.bf16.msra.mxu1 %v6456_v1  ;;  %v6480_v61 = vld [vmem:[%s7568_s28 + $0x318] sm:$0xff] }
 0x3d2   : > { %4368 = vmatpush.bf16.msra.mxu2 %v6464_v10  ;;  %4381 = vmatpush.bf16.msra.mxu3 %v6472_v15  ;;  %v6496_v15 = vld [vmem:[%s7568_s28 + $0x398] sm:$0xff] }
 0x3d4   : > { %4343 = vmatpush.bf16.msra.mxu0 %v6447_v9  ;;  %4356 = vmatpush.bf16.msra.mxu1 %v6455_v14  ;;  %v6479_v9 = vld [vmem:[%s7568_s28 + $0x310] sm:$0xff] }
 0x3d6   : > { %4369 = vmatpush.bf16.msra.mxu2 %v6463_v24  ;;  %4382 = vmatpush.bf16.msra.mxu3 %v6471_v25  ;;  %v6495_v24 = vld [vmem:[%s7568_s28 + $0x390] sm:$0xff] }
 0x3d7   : > { %v6503_v25 = vld [vmem:[%s7568_s28 + $0x3d0] sm:$0xff] }
 0x3d8   : > { %4344 = vmatpush.bf16.msra.mxu0 %v6446_v20  ;;  %4357 = vmatpush.bf16.msra.mxu1 %v6454_v21  ;;  %v6486_v21 = vld [vmem:[%s7568_s28 + $0x348] sm:$0xff] }
 0x3da   : > { %4370 = vmatpush.bf16.msra.mxu2 %v6462_v31  ;;  %4383 = vmatpush.bf16.msra.mxu3 %v6470_v32  ;;  %v6502_v31 = vld [vmem:[%s7568_s28 + $0x3c8] sm:$0xff]  ;;  %v3091_v32 = vld [vmem:[%s7616_s12 + $0x30] sm:$0xff] }
 0x3dc   : > { %4345 = vmatpush.bf16.msra.mxu0 %v6445_v28  ;;  %4358 = vmatpush.bf16.msra.mxu1 %v6453_v29  ;;  %v2976_v51 = vpop.f32.mrf.mxu0  ;;  %v2989_v54 = vpop.f32.mrf.mxu1  ;;  %v6485_v29 = vld [vmem:[%s7568_s28 + $0x340] sm:$0xff] }
 0x3dd   : > { %v3129_v60 = vpack.c.bf16 %v2989_v54, %v2976_v51  ;;  %v3082_v51 = vld [vmem:[%s7643_s20 + $0x38] sm:$0xff] }
 0x3de   : > { %4371 = vmatpush.bf16.msra.mxu2 %v6461_v36  ;;  %4384 = vmatpush.bf16.msra.mxu3 %v6469_v37  ;;  %v3106_v36 = vunpack.c.h.bf16 %v3091_v32  ;;  %v3092_v37 = vld [vmem:[%s7616_s12 + $0x38] sm:$0xff] }
 0x3df   : > { %v3145_v62 = vsel %vm3137_vm0, %v3079_v52, %v3129_v60  ;;  %v3107_v41 = vunpack.c.l.bf16 %v3092_v37  ;;  %v3108_v42 = vunpack.c.h.bf16 %v3092_v37 }
 0x3e0   : > { %4390 = vmatpush.bf16.msrb.mxu0 %v6484_v30  ;;  %4403 = vmatpush.bf16.msrb.mxu1 %v6492_v33  ;;  %v3426_v0 = vunpack.c.l.b16 %v3145_v62  ;;  %v3427_v1 = vunpack.c.h.b16 %v3145_v62  ;;  %v6494_v30 = vld [vmem:[%s7568_s28 + $0x388] sm:$0xff]  ;;  %v6493_v33 = vld [vmem:[%s7568_s28 + $0x380] sm:$0xff]  ;;  %vm3122_vm5 = vcmp.gt.f32.partialorder %v3106_v36, 0.5 }
 0x3e1   : > { %vm3123_vm7 = vcmp.gt.f32.partialorder %v3107_v41, 0.5  ;;  %vm3124_vm8 = vcmp.gt.f32.partialorder %v3108_v42, 0.5  ;;  %v3409_v42 = vld [vmem:[#allocation4] sm:$0xff] }
 0x3e2   : > { %4416 = vmatpush.bf16.msrb.mxu2 %v6500_v39  ;;  %4429 = vmatpush.bf16.msrb.mxu3 %v6508_v40  ;;  %v3442_v6 = vpack.c.b16 %v3426_v0, %v3426_v0  ;;  %v3443_v7 = vpack.c.b16 %v3427_v1, %v3427_v1  ;;  %v3081_v40 = vld [vmem:[%s7643_s20 + $0x30] sm:$0xff]  ;;  %vm3140_vm9 = vmpackc.low %vm3124_vm8, %vm3123_vm7 }
 0x3e4   : > { %4391 = vmatpush.bf16.msrb.mxu0 %v6483_v35  ;;  %4404 = vmatpush.bf16.msrb.mxu1 %v6491_v38  ;;  %v3015_v10 = vpop.f32.mrf.mxu3  ;;  %v2978_v12 = vpop.f32.mrf.mxu0  ;;  %v3105_v35 = vunpack.c.l.bf16 %v3091_v32 }
 0x3e5   : > { %v3002_v8 = vpop.f32.mrf.mxu2  ;;  %4346 = vmatmul.bf16.vlgmr.msra.gmra.mxu0 %v3442_v6  ;;  %4359 = vmatmul.bf16.vlgmr.msra.gmra.mxu1 %v3443_v7  ;;  %v2991_v56 = vpop.f32.mrf.mxu1 }
 0x3e6   : > { %4417 = vmatpush.bf16.msrb.mxu2 %v6499_v45  ;;  %4430 = vmatpush.bf16.msrb.mxu3 %v6507_v46  ;;  %v3130_v14 = vpack.c.bf16 %v3015_v10, %v3002_v8  ;;  %vm3121_vm4 = vcmp.gt.f32.partialorder %v3105_v35, 0.5 }
 0x3e7   : > { %vm3139_vm6 = vmpackc.low %vm3122_vm5, %vm3121_vm4 }
 0x3e8   : > { %4392 = vmatpush.bf16.msrb.mxu0 %v6482_v43  ;;  %4405 = vmatpush.bf16.msrb.mxu1 %v6490_v44  ;;  %v3146_v17 = vsel %vm3138_vm3, %v3080_v11, %v3130_v14 }
 0x3e9   : > { %v3428_v19 = vunpack.c.l.b16 %v3146_v17  ;;  %v3429_v20 = vunpack.c.h.b16 %v3146_v17 }
 0x3ea   : > { %4418 = vmatpush.bf16.msrb.mxu2 %v6498_v58  ;;  %4431 = vmatpush.bf16.msrb.mxu3 %v6506_v59 }
 0x3eb   : > { %v3444_v22 = vpack.c.b16 %v3428_v19, %v3428_v19  ;;  %v3445_v23 = vpack.c.b16 %v3429_v20, %v3429_v20 }
 0x3ec   : > { %4393 = vmatpush.bf16.msrb.mxu0 %v6481_v50  ;;  %4406 = vmatpush.bf16.msrb.mxu1 %v6489_v53  ;;  %v3017_v28 = vpop.f32.mrf.mxu3 }
 0x3ed   : > { %v3004_v26 = vpop.f32.mrf.mxu2  ;;  %4372 = vmatmul.bf16.vlgmr.msra.gmra.mxu2 %v3444_v22  ;;  %4385 = vmatmul.bf16.vlgmr.msra.gmra.mxu3 %v3445_v23 }
 0x3ee   : > { %4419 = vmatpush.bf16.msrb.mxu2 %v6497_v4  ;;  %4432 = vmatpush.bf16.msrb.mxu3 %v6505_v5 }
 0x3f0   : > { %4394 = vmatpush.bf16.msrb.mxu0 %v6480_v61  ;;  %4407 = vmatpush.bf16.msrb.mxu1 %v6488_v63 }
 0x3f2   : > { %4420 = vmatpush.bf16.msrb.mxu2 %v6496_v15  ;;  %4433 = vmatpush.bf16.msrb.mxu3 %v6504_v16 }
 0x3f4   : > { %4395 = vmatpush.bf16.msrb.mxu0 %v6479_v9  ;;  %4408 = vmatpush.bf16.msrb.mxu1 %v6487_v13 }
 0x3f6   : > { %4421 = vmatpush.bf16.msrb.mxu2 %v6495_v24  ;;  %4434 = vmatpush.bf16.msrb.mxu3 %v6503_v25 }
 0x3f8   : > { %4396 = vmatpush.bf16.msrb.mxu0 %v6478_v18  ;;  %4409 = vmatpush.bf16.msrb.mxu1 %v6486_v21 }
 0x3fa   : > { %4422 = vmatpush.bf16.msrb.mxu2 %v6494_v30  ;;  %4435 = vmatpush.bf16.msrb.mxu3 %v6502_v31 }
 0x3fc   : > { %4397 = vmatpush.bf16.msrb.mxu0 %v6477_v27  ;;  %4410 = vmatpush.bf16.msrb.mxu1 %v6485_v29  ;;  %v3028_v38 = vpop.f32.mrf.mxu0  ;;  %v3041_v39 = vpop.f32.mrf.mxu1 }
 0x3fd   : > { %v3131_v43 = vpack.c.bf16 %v3041_v39, %v3028_v38 }
 0x3fe   : > { %4423 = vmatpush.bf16.msrb.mxu2 %v6493_v33  ;;  %4436 = vmatpush.bf16.msrb.mxu3 %v6501_v34 }
 0x3ff   : > { %v3147_v44 = vsel %vm3139_vm6, %v3081_v40, %v3131_v43 }
 0x400   : > { %v3430_v45 = vunpack.c.l.b16 %v3147_v44  ;;  %v3431_v46 = vunpack.c.h.b16 %v3147_v44 }
 0x402   : > { %v3446_v47 = vpack.c.b16 %v3430_v45, %v3430_v45  ;;  %v3447_v48 = vpack.c.b16 %v3431_v46, %v3431_v46 }
 0x404   : > { %v3054_v49 = vpop.f32.mrf.mxu2  ;;  %v3067_v50 = vpop.f32.mrf.mxu3  ;;  %4398 = vmatmul.bf16.vlgmr.msrb.gmra.mxu0 %v3446_v47  ;;  %4411 = vmatmul.bf16.vlgmr.msrb.gmra.mxu1 %v3447_v48 }
 0x405   : > { %v3030_v52 = vpop.f32.mrf.mxu0  ;;  %v3132_v53 = vpack.c.bf16 %v3067_v50, %v3054_v49  ;;  %v3043_v54 = vpop.f32.mrf.mxu1 }
 0x407   : > { %v3148_v55 = vsel %vm3140_vm9, %v3082_v51, %v3132_v53 }
 0x408   : > { %v3432_v57 = vunpack.c.l.b16 %v3148_v55  ;;  %v3433_v58 = vunpack.c.h.b16 %v3148_v55 }
 0x40a   : > { %v3448_v59 = vpack.c.b16 %v3432_v57, %v3432_v57  ;;  %v3449_v60 = vpack.c.b16 %v3433_v58, %v3433_v58 }
 0x40c   : > { %v3056_v61 = vpop.f32.mrf.mxu2  ;;  %v3069_v62 = vpop.f32.mrf.mxu3  ;;  %4424 = vmatmul.bf16.vlgmr.msrb.gmra.mxu2 %v3448_v59  ;;  %4437 = vmatmul.bf16.vlgmr.msrb.gmra.mxu3 %v3449_v60 }
 0x422   : > { %v4243_v63 = vpop.f32.mrf.mxu0  ;;  %v4256_v0 = vpop.f32.mrf.mxu1 }
 0x423   : > { %v4257_v1 = vadd.f32 %v4256_v0, %v4243_v63 }
 0x42a   : > { %v4245_v2 = vpop.f32.mrf.mxu0  ;;  %v4258_v3 = vpop.f32.mrf.mxu1 }
 0x430   : > { %v4269_v4 = vpop.f32.mrf.mxu2  ;;  %v4282_v5 = vpop.f32.mrf.mxu3 }
 0x431   : > { %v4270_v6 = vadd.f32 %v4269_v4, %v4257_v1 }
 0x433   : > { %v4283_v7 = vadd.f32 %v4282_v5, %v4270_v6 }
 0x438   : > { %v4271_v8 = vpop.f32.mrf.mxu2  ;;  %v4284_v9 = vpop.f32.mrf.mxu3 }
 0x442   : > { %v4295_v10 = vpop.f32.mrf.mxu0  ;;  %v4308_v11 = vpop.f32.mrf.mxu1 }
 0x443   : > { %v4296_v21 = vadd.f32 %v4295_v10, %v4283_v7 }
 0x445   : > { %v4309_v24 = vadd.f32 %v4308_v11, %v4296_v21 }
 0x44a   : > { %v4297_v12 = vpop.f32.mrf.mxu0  ;;  %v4310_v13 = vpop.f32.mrf.mxu1 }
 0x450   : > { %v4321_v14 = vpop.f32.mrf.mxu2  ;;  %v4334_v56 = vpop.f32.mrf.mxu3 }
 0x451   : > { %v4322_v25 = vadd.f32 %v4321_v14, %v4309_v24 }
 0x453   : > { %v4335_v28 = vadd.f32 %v4334_v56, %v4322_v25 }
 0x458   : > { %v4323_v15 = vpop.f32.mrf.mxu2  ;;  %v4336_v16 = vpop.f32.mrf.mxu3 }
 0x462   : > { %v4347_v17 = vpop.f32.mrf.mxu0  ;;  %v4360_v18 = vpop.f32.mrf.mxu1 }
 0x463   : > { %v4348_v29 = vadd.f32 %v4347_v17, %v4335_v28 }
 0x465   : > { %v4361_v30 = vadd.f32 %v4360_v18, %v4348_v29 }
 0x46a   : > { %v4349_v19 = vpop.f32.mrf.mxu0  ;;  %v4362_v20 = vpop.f32.mrf.mxu1 }
 0x470   : > { %v4373_v22 = vpop.f32.mrf.mxu2  ;;  %v4386_v23 = vpop.f32.mrf.mxu3 }
 0x471   : > { %v4374_v33 = vadd.f32 %v4373_v22, %v4361_v30 }
 0x473   : > { %v4387_v34 = vadd.f32 %v4386_v23, %v4374_v33 }
 0x478   : > { %v4375_v26 = vpop.f32.mrf.mxu2  ;;  %v4388_v27 = vpop.f32.mrf.mxu3 }
 0x481   : > { %v4399_v31 = vpop.f32.mrf.mxu0  ;;  %v4412_v32 = vpop.f32.mrf.mxu1 }
 0x482   : > { %v4400_v35 = vadd.f32 %v4399_v31, %v4387_v34 }
 0x484   : > { %v4413_v38 = vadd.f32 %v4412_v32, %v4400_v35 }
 0x489   : > { %v4401_v36 = vpop.f32.mrf.mxu0  ;;  %v4414_v37 = vpop.f32.mrf.mxu1 }
 0x48f   : > { %v4425_v39 = vpop.f32.mrf.mxu2  ;;  %v4438_v40 = vpop.f32.mrf.mxu3 }
 0x490   : > { %v4426_v41 = vadd.f32 %v4425_v39, %v4413_v38 }
 0x492   : > { %v4439_v43 = vadd.f32 %v4438_v40, %v4426_v41 }
 0x494   : > { %v4442_v44 = vadd.f32 %v4439_v43, %v3409_v42 }
 0x496   : > { %4444 = vst.msk [vmem:[#allocation4] sm:$0xff] %vm4443_vm10, %v4442_v44 }
 0x497   : > { %v4427_v45 = vpop.f32.mrf.mxu2  ;;  %v4440_v46 = vpop.f32.mrf.mxu3 }
 0x498 PF: > { %p4445_p5 = pnand %p2090_p3, %p2001_p1 }
 0x499   : > { %s6670_s15 = smov (!%p4445_p5), 118  }
 0x49a   : > { %4448 = sbr.rel (%p4445_p5) target bundleno = 1431 (0x597), region = 103 }
 0x49f   : > { %v4450_v47 = vld [vmem:[%s7847_s9] sm:$0xff]  ;;  %v6669_v48 = vmov 0   ;;  %v4449_v49 = vld [vmem:[#allocation4] sm:$0xff]  ;;  %vm4457_vm11 = vcmask 80896   ;;  %vm4467_vm12 = vcmask 162896   ;;  %vm4465_vm13 = vcmask 73728  }
 0x4a0   : > { %6578 = vset.pattern.permute.xlu0 %v6669_v48 }
 0x4a1   : > { %4453 = vperm.xlu0 %6578, %v4450_v47  }
 0x513   : > { %v4454_v50 = vpop.permute.xlu0 %4453 }
 0x514   : > { %v4456_v51 = vmul.f32 %v4454_v50, %v4449_v49 }
 0x516   : > { %v4458_v52 = vsel %vm4457_vm11, %v4456_v51, 0.0  ;;  %v4468_v53 = vsel %vm4467_vm12, %v4456_v51, 0.0 }
 0x517   : > { %v4459_v54 = vrot.slane %v4458_v52, 4  ;;  %v4469_v55 = vrot.slane %v4468_v53, 4 }
 0x519   : > { %v4460_v57 = vadd.f32 %v4459_v54, %v4458_v52  ;;  %v4470_v58 = vadd.f32 %v4469_v55, %v4468_v53 }
 0x51b   : > { %v4461_v59 = vrot.slane %v4460_v57, 2  ;;  %v4471_v60 = vrot.slane %v4470_v58, 2 }
 0x51d   : > { %v4462_v61 = vadd.f32 %v4461_v59, %v4460_v57  ;;  %v4472_v62 = vadd.f32 %v4471_v60, %v4470_v58 }
 0x51f   : > { %v4473_v63 = vrot.slane %v4472_v62, 1  ;;  %v4463_v0 = vrot.slane %v4462_v61, 1 }
 0x521   : > { %v4474_v1 = vadd.f32 %v4473_v63, %v4472_v62  ;;  %v4464_v2 = vadd.f32 %v4463_v0, %v4462_v61 }
 0x523   : > { %4476 = vrot.lane.b32.xlu0 %v4474_v1, %s6670_s15  ;;  %4466 = vst.msk [vmem:[#allocation6] sm:$0x1] %vm4465_vm13, %v4464_v2 }
 0x595   : > { %v4477_v3 = vpop.permute.xlu0 %4476 }
 0x596   : > { %4479 = vst.msk [vmem:[#allocation6 + $0x1] sm:$0x1] %vm4465_vm13, %v4477_v3 }
 0x597 PF: > { %s7877_s16 = sadd.s32 4294967295, %s6665_s19   ;;  %s4488_s28 = sshll.u32 %s7848_s10, 4  ;;  %s4489_s28 = int_to_ptr.hbm [resolvable:$true] %s4488_s28 }
 0x598   : > { %p6513_p6 = scmp.eq.s32.totalorder %s7877_s16, 7  ;;  %s6671_s13 = smov [#allocation6]  }
 0x599   : > { %s4486_s30 = sshll.u32 %s6671_s13, 4  ;;  %s4487_s30 = int_to_ptr.vmem [resolvable:$true] %s4486_s30 }
 0x59a   : > { %6510 = dma.vmem_to_hbm [thread:$0]  (%p6513_p6), %s4487_s30, 32, %s4489_s28, [#allocation7]  }
 0x59b   : > { %6636 = dma.done.wait (%p6513_p6), [#allocation7], 32  }
 0x59c   : > { %6638 = vsyncadd (%p6513_p6), [#allocation7], 4294967264 }
 0x59d PF: > { %s21_s19 = sadd.s32 1, %s6665_s19   ;;  %s7878_s29 = sld [smem:[#allocation9_spill]] }
 0x59e   : > { %p18_p7 = scmp.ge.s32.totalorder %s21_s19, 10   ;;  %s7879_s13 = smov %s6645_s14 }
 0x59f   : > { %s7880_s14 = smov %s6779_s27  ;;  %s7881_s15 = smov %s6657_s17 }
 0x5a0   : > { %s7882_s16 = smov %s6661_s18  ;;  %s7883_s17 = smov %s7886_s21 }
 0x5a1   :  { %20 = sbr.rel (!%p18_p7) target bundleno = 6 (0x6), region = 142 }
 0x5a3   : > { %s7884_s18 = smov %s7878_s29 }
 0x5a6   :  { %4502 = vsyncpa [#allocation7], 1 }
 0x5a7   :  { %4504 = vsyncpa [#allocation7 + $0x1], 1 }

</bundles_post_ra>
